<compile_context>
chip_gen: v6e
topology: v6e:2x2x1
jax: 0.10.0
libtpu: 0.0.40
codegen_flags: <defaults>
</compile_context>

<pallas_src>
import jax
import jax.numpy as jnp
from jax.experimental import pallas as pl
from jax.experimental.pallas import tpu as pltpu

# ---------------------------------------------------------------------------
# Model dimensions
# ---------------------------------------------------------------------------
N_CLASSES = 18
B = 2            # batch
N_PTS = 128      # points per cloud
H1, H2, FEAT = 64, 128, 256      # shared-MLP widths (3 -> 64 -> 128 -> 256)
CLS_H1, CLS_H2 = 128, 64         # classifier head widths
CEN_H = 64                       # centre head width
T_H = 128                        # translation head width
OUT_PAD = 128                    # packed head-output column length


# ---------------------------------------------------------------------------
# Fused kernel: rot stage + in-kernel bin lookup + t stage
# ---------------------------------------------------------------------------
def fused_kernel(p0_ref, p1_ref,
                 # rotation encoder
                 rw1, rb1, rw2, rb2, rw3, rb3,
                 # rotation-classifier head
                 wc1a, wc1b, bc1, wc2, bc2, wc3p, bc3p,
                 # rotation-bin lookup table [cos, sin, rot_norm]
                 rot_tab,
                 # t encoder
                 tw1, tb1, tw2, tb2, tw3, tb3,
                 # centre heads
                 wcen0, bcen0, wcen1, bcen1,
                 # translation head (concat(g0,g1,rot) split into contributions)
                 wt1a, wt1b, wt1c, bt1,
                 # packed final layers
                 w2tp, w2c0p, w2c1p, b2p,
                 logits_ref, tout_ref):
    npts = p0_ref.shape[2]
    x0 = p0_ref[0]                                     # (3, N)
    x1 = p1_ref[0]                                     # (3, N)
    x = jnp.concatenate([x0, x1], axis=-1)             # (3, 2N)

    # ------------------- rotation encoder (both objects) -------------------
    rw1f = rw1[...]
    h = (rw1f[:, 0:1] * x[0:1, :] + rw1f[:, 1:2] * x[1:2, :]
         + rw1f[:, 2:3] * x[2:3, :] + rb1[...])
    h = jnp.maximum(h, 0.0)                            # (H1, 2N) — VPU FMAs
    h = jnp.maximum(jnp.dot(rw2[...], h.astype(jnp.bfloat16),
                            preferred_element_type=jnp.float32) + rb2[...], 0.0)
    h = jnp.maximum(jnp.dot(rw3[...], h.astype(jnp.bfloat16),
                            preferred_element_type=jnp.float32) + rb3[...], 0.0)

    # global max-pool per object (lane reduction)
    f0 = jnp.max(h[:, :npts], axis=1, keepdims=True).astype(jnp.bfloat16)  # (FEAT,1)
    f1 = jnp.max(h[:, npts:], axis=1, keepdims=True).astype(jnp.bfloat16)

    # classifier head on concat(f0, f1) as a sum of two matmuls (no concat)
    hh = (jnp.dot(wc1a[...], f0, preferred_element_type=jnp.float32)
          + jnp.dot(wc1b[...], f1, preferred_element_type=jnp.float32)
          + bc1[...])
    hh = jnp.maximum(hh, 0.0)                                            # (CLS_H1,1)
    hh = jnp.maximum(jnp.dot(wc2[...], hh.astype(jnp.bfloat16),
                             preferred_element_type=jnp.float32) + bc2[...], 0.0)
    logits = jnp.dot(wc3p[...], hh.astype(jnp.bfloat16),
                     preferred_element_type=jnp.float32) + bc3p[...]     # (128,1)
    logits_ref[0] = logits

    # --------- in-kernel argmax over bins -> (cos, sin, rot_norm) lookup ---------
    idx_i = jax.lax.broadcasted_iota(jnp.int32, (OUT_PAD, 1), 0)
    idx = idx_i.astype(jnp.float32)
    masked = jnp.where(idx_i < N_CLASSES, logits, -jnp.inf)
    mx = jnp.max(masked, axis=0, keepdims=True)                          # (1,1)
    cand = jnp.where(masked == mx, idx, jnp.float32(OUT_PAD))
    k = jnp.min(cand, axis=0, keepdims=True)          # first argmax (matches torch)
    onehot = (idx == k).astype(jnp.float32)                              # (128,1)
    csr = jnp.sum(onehot * rot_tab[...], axis=0, keepdims=True)          # (1,3)
    c, s, r = csr[:, 0:1], csr[:, 1:2], csr[:, 2:3]

    # --------------- t encoder (obj1 z-rotation folded into layer 1) --------------
    tw1f = tw1[...]
    tb1f = tb1[...]
    h0 = jnp.maximum(tw1f[:, 0:1] * x0[0:1, :] + tw1f[:, 1:2] * x0[1:2, :]
                     + tw1f[:, 2:3] * x0[2:3, :] + tb1f, 0.0)            # (H1, N)
    # z-rotation (x'=c*x-s*y, y'=s*x+c*y) folded into the x/y weight columns
    w1x = c * tw1f[:, 0:1] + s * tw1f[:, 1:2]                            # (H1, 1)
    w1y = c * tw1f[:, 1:2] - s * tw1f[:, 0:1]
    h1 = jnp.maximum(w1x * x1[0:1, :] + w1y * x1[1:2, :]
                     + tw1f[:, 2:3] * x1[2:3, :] + tb1f, 0.0)            # (H1, N)

    ht = jnp.concatenate([h0, h1], axis=-1)                              # (H1, 2N)
    ht = jnp.maximum(jnp.dot(tw2[...], ht.astype(jnp.bfloat16),
                             preferred_element_type=jnp.float32) + tb2[...], 0.0)
    ht = jnp.maximum(jnp.dot(tw3[...], ht.astype(jnp.bfloat16),
                             preferred_element_type=jnp.float32) + tb3[...], 0.0)

    g0 = jnp.max(ht[:, :npts], axis=1, keepdims=True).astype(jnp.bfloat16)  # (FEAT,1)
    g1 = jnp.max(ht[:, npts:], axis=1, keepdims=True).astype(jnp.bfloat16)

    # centre heads
    hc0 = jnp.maximum(jnp.dot(wcen0[...], g0,
                              preferred_element_type=jnp.float32) + bcen0[...], 0.0)
    hc1 = jnp.maximum(jnp.dot(wcen1[...], g1,
                              preferred_element_type=jnp.float32) + bcen1[...], 0.0)
    # translation head on concat(g0, g1, rot) as a sum of contributions
    hT = (jnp.dot(wt1a[...], g0, preferred_element_type=jnp.float32)
          + jnp.dot(wt1b[...], g1, preferred_element_type=jnp.float32)
          + wt1c[...] * r + bt1[...])
    hT = jnp.maximum(hT, 0.0)                                            # (T_H, 1)

    # final layers packed into one 128-row column:
    #   rows 0:3 = t_pred, 3:6 = obj0 centre, 6:9 = obj1 centre (rest zero)
    tout = (jnp.dot(w2tp[...], hT.astype(jnp.bfloat16),
                    preferred_element_type=jnp.float32)
            + jnp.dot(w2c0p[...], hc0.astype(jnp.bfloat16),
                      preferred_element_type=jnp.float32)
            + jnp.dot(w2c1p[...], hc1.astype(jnp.bfloat16),
                      preferred_element_type=jnp.float32)
            + b2p[...])
    tout_ref[0] = tout


# ---------------------------------------------------------------------------
# pallas_call wrapper
# ---------------------------------------------------------------------------
def pointnet_fused(pts0, pts1, ws):
    batch, _, n = pts0.shape
    pt_spec = pl.BlockSpec((1, 3, n), lambda b: (b, 0, 0))
    logits_pad, t_pack = pl.pallas_call(
        fused_kernel,
        out_shape=(jax.ShapeDtypeStruct((batch, OUT_PAD, 1), jnp.float32),
                   jax.ShapeDtypeStruct((batch, OUT_PAD, 1), jnp.float32)),
        grid=(batch,),
        in_specs=[pt_spec, pt_spec]
                 + [pl.BlockSpec(w.shape, lambda b: (0, 0)) for w in ws],
        out_specs=(pl.BlockSpec((1, OUT_PAD, 1), lambda b: (b, 0, 0)),
                   pl.BlockSpec((1, OUT_PAD, 1), lambda b: (b, 0, 0))),
        compiler_params=pltpu.CompilerParams(dimension_semantics=("parallel",)),
    )(pts0, pts1, *ws)
    return logits_pad[:, :N_CLASSES, 0], t_pack[:, :9, 0]


# ---------------------------------------------------------------------------
# Parameters: natural (out, in) weights, then packed into kernel-ready form
# ---------------------------------------------------------------------------
def _linear(key, cin, cout, scale=0.05):
    w = scale * jax.random.normal(key, (cout, cin), dtype=jnp.float32)
    b = jnp.zeros((cout,), dtype=jnp.float32)
    return w, b


def init_params(key):
    ks = iter(jax.random.split(key, 15))          # distinct key per layer (no reuse)
    p = {}
    p["rot_enc"] = (_linear(next(ks), 3, H1), _linear(next(ks), H1, H2),
                    _linear(next(ks), H2, FEAT))
    p["rot_cls"] = (_linear(next(ks), 2 * FEAT, CLS_H1),
                    _linear(next(ks), CLS_H1, CLS_H2),
                    _linear(next(ks), CLS_H2, N_CLASSES))
    p["t_enc"] = (_linear(next(ks), 3, H1), _linear(next(ks), H1, H2),
                  _linear(next(ks), H2, FEAT))
    p["centre0"] = (_linear(next(ks), FEAT, CEN_H), _linear(next(ks), CEN_H, 3))
    p["centre1"] = (_linear(next(ks), FEAT, CEN_H), _linear(next(ks), CEN_H, 3))
    p["t_head"] = (_linear(next(ks), 2 * FEAT + 1, T_H), _linear(next(ks), T_H, 3))
    return p


def pack_params(p):
    """Kernel-ready weight tuple (order matches fused_kernel signature):
    bf16 matmul weights, (out,1) f32 biases, split first layers of concat-heads,
    padded/packed final layers, and the rotation-bin (cos,sin,rot) lookup table."""
    f32, bf16 = jnp.float32, jnp.bfloat16

    def col(b):
        return b.reshape(-1, 1).astype(f32)

    # ---- rotation stage ----
    (ew1, eb1), (ew2, eb2), (ew3, eb3) = p["rot_enc"]
    (cw1, cb1), (cw2, cb2), (cw3, cb3) = p["rot_cls"]
    wc3p = jnp.zeros((OUT_PAD, CLS_H2), f32).at[:N_CLASSES].set(cw3).astype(bf16)
    bc3p = jnp.zeros((OUT_PAD, 1), f32).at[:N_CLASSES, 0].set(cb3)

    # ---- rotation-bin lookup table: rows k -> [cos(ang_k), sin(ang_k), rot_norm_k]
    k_idx = jnp.arange(N_CLASSES, dtype=f32)
    bin_size = 2.0 / N_CLASSES
    rot_norm = (k_idx + 0.5) * bin_size - 1.0
    ang = rot_norm * jnp.pi
    rot_tab = (jnp.zeros((OUT_PAD, 3), f32)
               .at[:N_CLASSES, 0].set(jnp.cos(ang))
               .at[:N_CLASSES, 1].set(jnp.sin(ang))
               .at[:N_CLASSES, 2].set(rot_norm))

    # ---- translation stage ----
    (tw1, tb1), (tw2, tb2), (tw3, tb3) = p["t_enc"]
    (c0w1, c0b1), (c0w2, c0b2) = p["centre0"]
    (c1w1, c1b1), (c1w2, c1b2) = p["centre1"]
    (hw1, hb1), (hw2, hb2) = p["t_head"]
    w2tp = jnp.zeros((OUT_PAD, T_H), f32).at[0:3].set(hw2).astype(bf16)
    w2c0p = jnp.zeros((OUT_PAD, CEN_H), f32).at[3:6].set(c0w2).astype(bf16)
    w2c1p = jnp.zeros((OUT_PAD, CEN_H), f32).at[6:9].set(c1w2).astype(bf16)
    b2p = (jnp.zeros((OUT_PAD, 1), f32)
           .at[0:3, 0].set(hb2).at[3:6, 0].set(c0b2).at[6:9, 0].set(c1b2))

    ws = (
        # rot encoder
        ew1.astype(f32), col(eb1),
        ew2.astype(bf16), col(eb2),
        ew3.astype(bf16), col(eb3),
        # rot classifier head
        cw1[:, :FEAT].astype(bf16), cw1[:, FEAT:].astype(bf16), col(cb1),
        cw2.astype(bf16), col(cb2),
        wc3p, bc3p,
        # bin lookup
        rot_tab,
        # t encoder
        tw1.astype(f32), col(tb1),
        tw2.astype(bf16), col(tb2),
        tw3.astype(bf16), col(tb3),
        # centre heads
        c0w1.astype(bf16), col(c0b1),
        c1w1.astype(bf16), col(c1b1),
        # t head
        hw1[:, :FEAT].astype(bf16), hw1[:, FEAT:2 * FEAT].astype(bf16),
        hw1[:, 2 * FEAT:].astype(f32), col(hb1),
        # packed final layers
        w2tp, w2c0p, w2c1p, b2p,
    )
    return ws


# ---------------------------------------------------------------------------
# Full PointNetv1 forward
# ---------------------------------------------------------------------------
@jax.jit
def pointnetv1_forward(kernel_params, pts0_ncw, pts1_ncw):
    """pts*_ncw: (B, 3, N) point clouds of obj0 / obj1 (PyTorch NCW layout).
    Returns (rot_class_pred, t_pred, obj0_centre_pred, obj1_centre_pred)."""
    rot_class_pred, t_out = pointnet_fused(pts0_ncw, pts1_ncw, kernel_params)
    t_pred = t_out[:, 0:3]
    obj0_centre_pred = t_out[:, 3:6]
    obj1_centre_pred = t_out[:, 6:9]
    return rot_class_pred, t_pred, obj0_centre_pred, obj1_centre_pred


def run_model(kernel_params, batch):
    rot_class_pred, t_pred, c0, c1 = pointnetv1_forward(
        kernel_params, batch["pts0"], batch["pts1"])
    batch["rot_pred"] = rot_class_pred
    batch["t_pred"] = t_pred
    batch["obj0_centre_pred"] = c0
    batch["obj1_centre_pred"] = c1
    return rot_class_pred, t_pred


# ---------------------------------------------------------------------------
if __name__ == "__main__":
    key = jax.random.PRNGKey(0)
    k0, k1, kp = jax.random.split(key, 3)
    batch = {
        "pts0": jax.random.normal(k0, (B, 3, N_PTS), dtype=jnp.float32),
        "pts1": jax.random.normal(k1, (B, 3, N_PTS), dtype=jnp.float32),
    }
    params = init_params(kp)
    kernel_params = pack_params(params)

    rot_class_pred, t_pred = run_model(kernel_params, batch)
    jax.block_until_ready(rot_class_pred)
    jax.block_until_ready(t_pred)

    assert rot_class_pred.shape == (B, N_CLASSES)
    assert t_pred.shape == (B, 3)
    assert batch["obj0_centre_pred"].shape == (B, 3)
    assert batch["obj1_centre_pred"].shape == (B, 3)
    assert bool(jnp.all(jnp.isfinite(rot_class_pred)))
    assert bool(jnp.all(jnp.isfinite(t_pred)))
    print("KERNEL_OK")
</pallas_src>

<mosaic_0001>
module attributes {stable_mosaic.version = 11 : i64} {
  func.func @fused_kernel(%arg0: i32, %arg1: memref<1x3x128xf32, #tpu.memory_space<vmem>>, %arg2: memref<1x3x128xf32, #tpu.memory_space<vmem>>, %arg3: memref<64x3xf32, #tpu.memory_space<vmem>>, %arg4: memref<64x1xf32, #tpu.memory_space<vmem>>, %arg5: memref<128x64xbf16, #tpu.memory_space<vmem>>, %arg6: memref<128x1xf32, #tpu.memory_space<vmem>>, %arg7: memref<256x128xbf16, #tpu.memory_space<vmem>>, %arg8: memref<256x1xf32, #tpu.memory_space<vmem>>, %arg9: memref<128x256xbf16, #tpu.memory_space<vmem>>, %arg10: memref<128x256xbf16, #tpu.memory_space<vmem>>, %arg11: memref<128x1xf32, #tpu.memory_space<vmem>>, %arg12: memref<64x128xbf16, #tpu.memory_space<vmem>>, %arg13: memref<64x1xf32, #tpu.memory_space<vmem>>, %arg14: memref<128x64xbf16, #tpu.memory_space<vmem>>, %arg15: memref<128x1xf32, #tpu.memory_space<vmem>>, %arg16: memref<128x3xf32, #tpu.memory_space<vmem>>, %arg17: memref<64x3xf32, #tpu.memory_space<vmem>>, %arg18: memref<64x1xf32, #tpu.memory_space<vmem>>, %arg19: memref<128x64xbf16, #tpu.memory_space<vmem>>, %arg20: memref<128x1xf32, #tpu.memory_space<vmem>>, %arg21: memref<256x128xbf16, #tpu.memory_space<vmem>>, %arg22: memref<256x1xf32, #tpu.memory_space<vmem>>, %arg23: memref<64x256xbf16, #tpu.memory_space<vmem>>, %arg24: memref<64x1xf32, #tpu.memory_space<vmem>>, %arg25: memref<64x256xbf16, #tpu.memory_space<vmem>>, %arg26: memref<64x1xf32, #tpu.memory_space<vmem>>, %arg27: memref<128x256xbf16, #tpu.memory_space<vmem>>, %arg28: memref<128x256xbf16, #tpu.memory_space<vmem>>, %arg29: memref<128x1xf32, #tpu.memory_space<vmem>>, %arg30: memref<128x1xf32, #tpu.memory_space<vmem>>, %arg31: memref<128x128xbf16, #tpu.memory_space<vmem>>, %arg32: memref<128x64xbf16, #tpu.memory_space<vmem>>, %arg33: memref<128x64xbf16, #tpu.memory_space<vmem>>, %arg34: memref<128x1xf32, #tpu.memory_space<vmem>>, %arg35: memref<1x128x1xf32, #tpu.memory_space<vmem>>, %arg36: memref<1x128x1xf32, #tpu.memory_space<vmem>>) attributes {dimension_semantics = [#tpu.dimension_semantics<parallel>], iteration_bounds = array<i64: 2>, scalar_prefetch = 0 : i64, scratch_operands = 0 : i64, tpu.core_type = #tpu.core_type<tc>, window_params = [{transform_indices = @transform_0, window_bounds = array<i64: 1, 3, 128>}, {transform_indices = @transform_1, window_bounds = array<i64: 1, 3, 128>}, {pipeline_mode = #tpu.pipeline_mode<synchronous>, transform_indices = @transform_2, window_bounds = array<i64: 64, 3>}, {pipeline_mode = #tpu.pipeline_mode<synchronous>, transform_indices = @transform_3, window_bounds = array<i64: 64, 1>}, {pipeline_mode = #tpu.pipeline_mode<synchronous>, transform_indices = @transform_4, window_bounds = array<i64: 128, 64>}, {pipeline_mode = #tpu.pipeline_mode<synchronous>, transform_indices = @transform_5, window_bounds = array<i64: 128, 1>}, {pipeline_mode = #tpu.pipeline_mode<synchronous>, transform_indices = @transform_6, window_bounds = array<i64: 256, 128>}, {pipeline_mode = #tpu.pipeline_mode<synchronous>, transform_indices = @transform_7, window_bounds = array<i64: 256, 1>}, {pipeline_mode = #tpu.pipeline_mode<synchronous>, transform_indices = @transform_8, window_bounds = array<i64: 128, 256>}, {pipeline_mode = #tpu.pipeline_mode<synchronous>, transform_indices = @transform_9, window_bounds = array<i64: 128, 256>}, {pipeline_mode = #tpu.pipeline_mode<synchronous>, transform_indices = @transform_10, window_bounds = array<i64: 128, 1>}, {pipeline_mode = #tpu.pipeline_mode<synchronous>, transform_indices = @transform_11, window_bounds = array<i64: 64, 128>}, {pipeline_mode = #tpu.pipeline_mode<synchronous>, transform_indices = @transform_12, window_bounds = array<i64: 64, 1>}, {pipeline_mode = #tpu.pipeline_mode<synchronous>, transform_indices = @transform_13, window_bounds = array<i64: 128, 64>}, {pipeline_mode = #tpu.pipeline_mode<synchronous>, transform_indices = @transform_14, window_bounds = array<i64: 128, 1>}, {pipeline_mode = #tpu.pipeline_mode<synchronous>, transform_indices = @transform_15, window_bounds = array<i64: 128, 3>}, {pipeline_mode = #tpu.pipeline_mode<synchronous>, transform_indices = @transform_16, window_bounds = array<i64: 64, 3>}, {pipeline_mode = #tpu.pipeline_mode<synchronous>, transform_indices = @transform_17, window_bounds = array<i64: 64, 1>}, {pipeline_mode = #tpu.pipeline_mode<synchronous>, transform_indices = @transform_18, window_bounds = array<i64: 128, 64>}, {pipeline_mode = #tpu.pipeline_mode<synchronous>, transform_indices = @transform_19, window_bounds = array<i64: 128, 1>}, {pipeline_mode = #tpu.pipeline_mode<synchronous>, transform_indices = @transform_20, window_bounds = array<i64: 256, 128>}, {pipeline_mode = #tpu.pipeline_mode<synchronous>, transform_indices = @transform_21, window_bounds = array<i64: 256, 1>}, {pipeline_mode = #tpu.pipeline_mode<synchronous>, transform_indices = @transform_22, window_bounds = array<i64: 64, 256>}, {pipeline_mode = #tpu.pipeline_mode<synchronous>, transform_indices = @transform_23, window_bounds = array<i64: 64, 1>}, {pipeline_mode = #tpu.pipeline_mode<synchronous>, transform_indices = @transform_24, window_bounds = array<i64: 64, 256>}, {pipeline_mode = #tpu.pipeline_mode<synchronous>, transform_indices = @transform_25, window_bounds = array<i64: 64, 1>}, {pipeline_mode = #tpu.pipeline_mode<synchronous>, transform_indices = @transform_26, window_bounds = array<i64: 128, 256>}, {pipeline_mode = #tpu.pipeline_mode<synchronous>, transform_indices = @transform_27, window_bounds = array<i64: 128, 256>}, {pipeline_mode = #tpu.pipeline_mode<synchronous>, transform_indices = @transform_28, window_bounds = array<i64: 128, 1>}, {pipeline_mode = #tpu.pipeline_mode<synchronous>, transform_indices = @transform_29, window_bounds = array<i64: 128, 1>}, {pipeline_mode = #tpu.pipeline_mode<synchronous>, transform_indices = @transform_30, window_bounds = array<i64: 128, 128>}, {pipeline_mode = #tpu.pipeline_mode<synchronous>, transform_indices = @transform_31, window_bounds = array<i64: 128, 64>}, {pipeline_mode = #tpu.pipeline_mode<synchronous>, transform_indices = @transform_32, window_bounds = array<i64: 128, 64>}, {pipeline_mode = #tpu.pipeline_mode<synchronous>, transform_indices = @transform_33, window_bounds = array<i64: 128, 1>}, {transform_indices = @transform_34, window_bounds = array<i64: 1, 128, 1>}, {transform_indices = @transform_35, window_bounds = array<i64: 1, 128, 1>}]} {
    %c0 = arith.constant 0 : index
    %c0_0 = arith.constant 0 : index
    %c0_1 = arith.constant 0 : index
    %0 = vector.load %arg1[%c0, %c0_0, %c0_1] : memref<1x3x128xf32, #tpu.memory_space<vmem>>, vector<1x3x128xf32>
    %1 = vector.shape_cast %0 : vector<1x3x128xf32> to vector<3x128xf32>
    %c0_2 = arith.constant 0 : index
    %c0_3 = arith.constant 0 : index
    %c0_4 = arith.constant 0 : index
    %2 = vector.load %arg2[%c0_2, %c0_3, %c0_4] : memref<1x3x128xf32, #tpu.memory_space<vmem>>, vector<1x3x128xf32>
    %3 = vector.shape_cast %2 : vector<1x3x128xf32> to vector<3x128xf32>
    %4 = tpu.concatenate %1, %3 in 1 : vector<3x128xf32>, vector<3x128xf32> -> vector<3x256xf32>
    %c0_5 = arith.constant 0 : index
    %c0_6 = arith.constant 0 : index
    %5 = vector.load %arg3[%c0_5, %c0_6] : memref<64x3xf32, #tpu.memory_space<vmem>>, vector<64x3xf32>
    %6 = vector.extract_strided_slice %5 {offsets = [0, 0], sizes = [64, 1], strides = [1, 1]} : vector<64x3xf32> to vector<64x1xf32>
    %7 = vector.extract_strided_slice %4 {offsets = [0, 0], sizes = [1, 256], strides = [1, 1]} : vector<3x256xf32> to vector<1x256xf32>
    %8 = vector.broadcast %6 : vector<64x1xf32> to vector<64x256xf32>
    %9 = vector.broadcast %7 : vector<1x256xf32> to vector<64x256xf32>
    %10 = arith.mulf %8, %9 : vector<64x256xf32>
    %11 = vector.extract_strided_slice %5 {offsets = [0, 1], sizes = [64, 1], strides = [1, 1]} : vector<64x3xf32> to vector<64x1xf32>
    %12 = vector.extract_strided_slice %4 {offsets = [1, 0], sizes = [1, 256], strides = [1, 1]} : vector<3x256xf32> to vector<1x256xf32>
    %13 = vector.broadcast %11 : vector<64x1xf32> to vector<64x256xf32>
    %14 = vector.broadcast %12 : vector<1x256xf32> to vector<64x256xf32>
    %15 = arith.mulf %13, %14 : vector<64x256xf32>
    %16 = arith.addf %10, %15 : vector<64x256xf32>
    %17 = vector.extract_strided_slice %5 {offsets = [0, 2], sizes = [64, 1], strides = [1, 1]} : vector<64x3xf32> to vector<64x1xf32>
    %18 = vector.extract_strided_slice %4 {offsets = [2, 0], sizes = [1, 256], strides = [1, 1]} : vector<3x256xf32> to vector<1x256xf32>
    %19 = vector.broadcast %17 : vector<64x1xf32> to vector<64x256xf32>
    %20 = vector.broadcast %18 : vector<1x256xf32> to vector<64x256xf32>
    %21 = arith.mulf %19, %20 : vector<64x256xf32>
    %22 = arith.addf %16, %21 : vector<64x256xf32>
    %c0_7 = arith.constant 0 : index
    %c0_8 = arith.constant 0 : index
    %23 = vector.load %arg4[%c0_7, %c0_8] : memref<64x1xf32, #tpu.memory_space<vmem>>, vector<64x1xf32>
    %24 = vector.broadcast %23 : vector<64x1xf32> to vector<64x256xf32>
    %25 = arith.addf %22, %24 : vector<64x256xf32>
    %cst = arith.constant 0.000000e+00 : f32
    %26 = vector.broadcast %cst : f32 to vector<64x256xf32>
    %27 = arith.maximumf %25, %26 : vector<64x256xf32>
    %c0_9 = arith.constant 0 : index
    %c0_10 = arith.constant 0 : index
    %28 = vector.load %arg5[%c0_9, %c0_10] : memref<128x64xbf16, #tpu.memory_space<vmem>>, vector<128x64xbf16>
    %29 = arith.truncf %27 : vector<64x256xf32> to vector<64x256xbf16>
    %cst_11 = arith.constant dense<0.000000e+00> : vector<128x256xf32>
    %30 = tpu.matmul %28, %29, %cst_11 {dimension_numbers = #tpu.dot_dimension_numbers<[1], [0], [0], [1], [0, 0, 1, 1], [], []>} : vector<128x64xbf16>, vector<64x256xbf16>, vector<128x256xf32> -> vector<128x256xf32>
    %c0_12 = arith.constant 0 : index
    %c0_13 = arith.constant 0 : index
    %31 = vector.load %arg6[%c0_12, %c0_13] : memref<128x1xf32, #tpu.memory_space<vmem>>, vector<128x1xf32>
    %32 = vector.broadcast %31 : vector<128x1xf32> to vector<128x256xf32>
    %33 = arith.addf %30, %32 : vector<128x256xf32>
    %cst_14 = arith.constant 0.000000e+00 : f32
    %34 = vector.broadcast %cst_14 : f32 to vector<128x256xf32>
    %35 = arith.maximumf %33, %34 : vector<128x256xf32>
    %c0_15 = arith.constant 0 : index
    %c0_16 = arith.constant 0 : index
    %36 = vector.load %arg7[%c0_15, %c0_16] : memref<256x128xbf16, #tpu.memory_space<vmem>>, vector<256x128xbf16>
    %37 = arith.truncf %35 : vector<128x256xf32> to vector<128x256xbf16>
    %cst_17 = arith.constant dense<0.000000e+00> : vector<256x256xf32>
    %38 = tpu.matmul %36, %37, %cst_17 {dimension_numbers = #tpu.dot_dimension_numbers<[1], [0], [0], [1], [0, 0, 1, 1], [], []>} : vector<256x128xbf16>, vector<128x256xbf16>, vector<256x256xf32> -> vector<256x256xf32>
    %c0_18 = arith.constant 0 : index
    %c0_19 = arith.constant 0 : index
    %39 = vector.load %arg8[%c0_18, %c0_19] : memref<256x1xf32, #tpu.memory_space<vmem>>, vector<256x1xf32>
    %40 = vector.broadcast %39 : vector<256x1xf32> to vector<256x256xf32>
    %41 = arith.addf %38, %40 : vector<256x256xf32>
    %cst_20 = arith.constant 0.000000e+00 : f32
    %42 = vector.broadcast %cst_20 : f32 to vector<256x256xf32>
    %43 = arith.maximumf %41, %42 : vector<256x256xf32>
    %44 = vector.extract_strided_slice %43 {offsets = [0, 0], sizes = [256, 128], strides = [1, 1]} : vector<256x256xf32> to vector<256x128xf32>
    %cst_21 = arith.constant dense<0xFF800000> : vector<256xf32>
    %45 = vector.multi_reduction <maximumf>, %44, %cst_21 [1] : vector<256x128xf32> to vector<256xf32>
    %46 = vector.shape_cast %45 : vector<256xf32> to vector<256x1xf32>
    %47 = arith.truncf %46 : vector<256x1xf32> to vector<256x1xbf16>
    %48 = vector.extract_strided_slice %43 {offsets = [0, 128], sizes = [256, 128], strides = [1, 1]} : vector<256x256xf32> to vector<256x128xf32>
    %cst_22 = arith.constant dense<0xFF800000> : vector<256xf32>
    %49 = vector.multi_reduction <maximumf>, %48, %cst_22 [1] : vector<256x128xf32> to vector<256xf32>
    %50 = vector.shape_cast %49 : vector<256xf32> to vector<256x1xf32>
    %51 = arith.truncf %50 : vector<256x1xf32> to vector<256x1xbf16>
    %c0_23 = arith.constant 0 : index
    %c0_24 = arith.constant 0 : index
    %52 = vector.load %arg9[%c0_23, %c0_24] : memref<128x256xbf16, #tpu.memory_space<vmem>>, vector<128x256xbf16>
    %cst_25 = arith.constant dense<0.000000e+00> : vector<128x1xf32>
    %53 = tpu.matmul %52, %47, %cst_25 {dimension_numbers = #tpu.dot_dimension_numbers<[1], [0], [0], [1], [0, 0, 1, 1], [], []>} : vector<128x256xbf16>, vector<256x1xbf16>, vector<128x1xf32> -> vector<128x1xf32>
    %c0_26 = arith.constant 0 : index
    %c0_27 = arith.constant 0 : index
    %54 = vector.load %arg10[%c0_26, %c0_27] : memref<128x256xbf16, #tpu.memory_space<vmem>>, vector<128x256xbf16>
    %cst_28 = arith.constant dense<0.000000e+00> : vector<128x1xf32>
    %55 = tpu.matmul %54, %51, %cst_28 {dimension_numbers = #tpu.dot_dimension_numbers<[1], [0], [0], [1], [0, 0, 1, 1], [], []>} : vector<128x256xbf16>, vector<256x1xbf16>, vector<128x1xf32> -> vector<128x1xf32>
    %56 = arith.addf %53, %55 : vector<128x1xf32>
    %c0_29 = arith.constant 0 : index
    %c0_30 = arith.constant 0 : index
    %57 = vector.load %arg11[%c0_29, %c0_30] : memref<128x1xf32, #tpu.memory_space<vmem>>, vector<128x1xf32>
    %58 = arith.addf %56, %57 : vector<128x1xf32>
    %cst_31 = arith.constant 0.000000e+00 : f32
    %59 = vector.broadcast %cst_31 : f32 to vector<128x1xf32>
    %60 = arith.maximumf %58, %59 : vector<128x1xf32>
    %c0_32 = arith.constant 0 : index
    %c0_33 = arith.constant 0 : index
    %61 = vector.load %arg12[%c0_32, %c0_33] : memref<64x128xbf16, #tpu.memory_space<vmem>>, vector<64x128xbf16>
    %62 = arith.truncf %60 : vector<128x1xf32> to vector<128x1xbf16>
    %cst_34 = arith.constant dense<0.000000e+00> : vector<64x1xf32>
    %63 = tpu.matmul %61, %62, %cst_34 {dimension_numbers = #tpu.dot_dimension_numbers<[1], [0], [0], [1], [0, 0, 1, 1], [], []>} : vector<64x128xbf16>, vector<128x1xbf16>, vector<64x1xf32> -> vector<64x1xf32>
    %c0_35 = arith.constant 0 : index
    %c0_36 = arith.constant 0 : index
    %64 = vector.load %arg13[%c0_35, %c0_36] : memref<64x1xf32, #tpu.memory_space<vmem>>, vector<64x1xf32>
    %65 = arith.addf %63, %64 : vector<64x1xf32>
    %cst_37 = arith.constant 0.000000e+00 : f32
    %66 = vector.broadcast %cst_37 : f32 to vector<64x1xf32>
    %67 = arith.maximumf %65, %66 : vector<64x1xf32>
    %c0_38 = arith.constant 0 : index
    %c0_39 = arith.constant 0 : index
    %68 = vector.load %arg14[%c0_38, %c0_39] : memref<128x64xbf16, #tpu.memory_space<vmem>>, vector<128x64xbf16>
    %69 = arith.truncf %67 : vector<64x1xf32> to vector<64x1xbf16>
    %cst_40 = arith.constant dense<0.000000e+00> : vector<128x1xf32>
    %70 = tpu.matmul %68, %69, %cst_40 {dimension_numbers = #tpu.dot_dimension_numbers<[1], [0], [0], [1], [0, 0, 1, 1], [], []>} : vector<128x64xbf16>, vector<64x1xbf16>, vector<128x1xf32> -> vector<128x1xf32>
    %c0_41 = arith.constant 0 : index
    %c0_42 = arith.constant 0 : index
    %71 = vector.load %arg15[%c0_41, %c0_42] : memref<128x1xf32, #tpu.memory_space<vmem>>, vector<128x1xf32>
    %72 = arith.addf %70, %71 : vector<128x1xf32>
    %c0_43 = arith.constant 0 : index
    %c0_44 = arith.constant 0 : index
    %c0_45 = arith.constant 0 : index
    %73 = vector.load %arg35[%c0_43, %c0_44, %c0_45] : memref<1x128x1xf32, #tpu.memory_space<vmem>>, vector<1x128x1xf32>
    %74 = vector.shape_cast %73 : vector<1x128x1xf32> to vector<128x1xf32>
    %75 = vector.shape_cast %72 : vector<128x1xf32> to vector<1x128x1xf32>
    tpu.vector_store %arg35[%c0_43, %c0_44, %c0_45], %75 {strides = array<i32>} : memref<1x128x1xf32, #tpu.memory_space<vmem>>, vector<1x128x1xf32>,
    %76 = tpu.iota {dimensions = array<i32: 0>} : vector<128x1xi32>
    %77 = arith.sitofp %76 : vector<128x1xi32> to vector<128x1xf32>
    %c18_i32 = arith.constant 18 : i32
    %78 = vector.broadcast %c18_i32 : i32 to vector<128x1xi32>
    %79 = arith.cmpi slt, %76, %78 : vector<128x1xi32>
    %cst_46 = arith.constant 0xFF800000 : f32
    %80 = vector.broadcast %cst_46 : f32 to vector<128x1xf32>
    %81 = arith.select %79, %72, %80 : vector<128x1xi1>, vector<128x1xf32>
    %cst_47 = arith.constant dense<0xFF800000> : vector<1xf32>
    %82 = vector.multi_reduction <maximumf>, %81, %cst_47 [0] : vector<128x1xf32> to vector<1xf32>
    %83 = vector.shape_cast %82 : vector<1xf32> to vector<1x1xf32>
    %84 = vector.broadcast %83 : vector<1x1xf32> to vector<128x1xf32>
    %85 = arith.cmpf oeq, %81, %84 : vector<128x1xf32>
    %cst_48 = arith.constant 1.280000e+02 : f32
    %86 = vector.broadcast %cst_48 : f32 to vector<128x1xf32>
    %87 = arith.select %85, %77, %86 : vector<128x1xi1>, vector<128x1xf32>
    %cst_49 = arith.constant dense<0x7F800000> : vector<1xf32>
    %88 = vector.multi_reduction <minimumf>, %87, %cst_49 [0] : vector<128x1xf32> to vector<1xf32>
    %89 = vector.shape_cast %88 : vector<1xf32> to vector<1x1xf32>
    %90 = vector.broadcast %89 : vector<1x1xf32> to vector<128x1xf32>
    %91 = arith.cmpf oeq, %77, %90 : vector<128x1xf32>
    %92 = arith.extui %91 : vector<128x1xi1> to vector<128x1xi32>
    %93 = arith.sitofp %92 : vector<128x1xi32> to vector<128x1xf32>
    %c0_50 = arith.constant 0 : index
    %c0_51 = arith.constant 0 : index
    %94 = vector.load %arg16[%c0_50, %c0_51] : memref<128x3xf32, #tpu.memory_space<vmem>>, vector<128x3xf32>
    %95 = vector.broadcast %93 : vector<128x1xf32> to vector<128x3xf32>
    %96 = arith.mulf %95, %94 : vector<128x3xf32>
    %cst_52 = arith.constant dense<0.000000e+00> : vector<3xf32>
    %97 = vector.multi_reduction <add>, %96, %cst_52 [0] : vector<128x3xf32> to vector<3xf32>
    %98 = vector.shape_cast %97 : vector<3xf32> to vector<1x3xf32>
    %99 = vector.extract_strided_slice %98 {offsets = [0, 0], sizes = [1, 1], strides = [1, 1]} : vector<1x3xf32> to vector<1x1xf32>
    %100 = vector.extract_strided_slice %98 {offsets = [0, 1], sizes = [1, 1], strides = [1, 1]} : vector<1x3xf32> to vector<1x1xf32>
    %101 = vector.extract_strided_slice %98 {offsets = [0, 2], sizes = [1, 1], strides = [1, 1]} : vector<1x3xf32> to vector<1x1xf32>
    %c0_53 = arith.constant 0 : index
    %c0_54 = arith.constant 0 : index
    %102 = vector.load %arg17[%c0_53, %c0_54] : memref<64x3xf32, #tpu.memory_space<vmem>>, vector<64x3xf32>
    %c0_55 = arith.constant 0 : index
    %c0_56 = arith.constant 0 : index
    %103 = vector.load %arg18[%c0_55, %c0_56] : memref<64x1xf32, #tpu.memory_space<vmem>>, vector<64x1xf32>
    %104 = vector.extract_strided_slice %102 {offsets = [0, 0], sizes = [64, 1], strides = [1, 1]} : vector<64x3xf32> to vector<64x1xf32>
    %105 = vector.extract_strided_slice %1 {offsets = [0, 0], sizes = [1, 128], strides = [1, 1]} : vector<3x128xf32> to vector<1x128xf32>
    %106 = vector.broadcast %104 : vector<64x1xf32> to vector<64x128xf32>
    %107 = vector.broadcast %105 : vector<1x128xf32> to vector<64x128xf32>
    %108 = arith.mulf %106, %107 : vector<64x128xf32>
    %109 = vector.extract_strided_slice %102 {offsets = [0, 1], sizes = [64, 1], strides = [1, 1]} : vector<64x3xf32> to vector<64x1xf32>
    %110 = vector.extract_strided_slice %1 {offsets = [1, 0], sizes = [1, 128], strides = [1, 1]} : vector<3x128xf32> to vector<1x128xf32>
    %111 = vector.broadcast %109 : vector<64x1xf32> to vector<64x128xf32>
    %112 = vector.broadcast %110 : vector<1x128xf32> to vector<64x128xf32>
    %113 = arith.mulf %111, %112 : vector<64x128xf32>
    %114 = arith.addf %108, %113 : vector<64x128xf32>
    %115 = vector.extract_strided_slice %102 {offsets = [0, 2], sizes = [64, 1], strides = [1, 1]} : vector<64x3xf32> to vector<64x1xf32>
    %116 = vector.extract_strided_slice %1 {offsets = [2, 0], sizes = [1, 128], strides = [1, 1]} : vector<3x128xf32> to vector<1x128xf32>
    %117 = vector.broadcast %115 : vector<64x1xf32> to vector<64x128xf32>
    %118 = vector.broadcast %116 : vector<1x128xf32> to vector<64x128xf32>
    %119 = arith.mulf %117, %118 : vector<64x128xf32>
    %120 = arith.addf %114, %119 : vector<64x128xf32>
    %121 = vector.broadcast %103 : vector<64x1xf32> to vector<64x128xf32>
    %122 = arith.addf %120, %121 : vector<64x128xf32>
    %cst_57 = arith.constant 0.000000e+00 : f32
    %123 = vector.broadcast %cst_57 : f32 to vector<64x128xf32>
    %124 = arith.maximumf %122, %123 : vector<64x128xf32>
    %125 = vector.extract_strided_slice %102 {offsets = [0, 0], sizes = [64, 1], strides = [1, 1]} : vector<64x3xf32> to vector<64x1xf32>
    %126 = vector.broadcast %99 : vector<1x1xf32> to vector<64x1xf32>
    %127 = arith.mulf %126, %125 : vector<64x1xf32>
    %128 = vector.extract_strided_slice %102 {offsets = [0, 1], sizes = [64, 1], strides = [1, 1]} : vector<64x3xf32> to vector<64x1xf32>
    %129 = vector.broadcast %100 : vector<1x1xf32> to vector<64x1xf32>
    %130 = arith.mulf %129, %128 : vector<64x1xf32>
    %131 = arith.addf %127, %130 : vector<64x1xf32>
    %132 = vector.extract_strided_slice %102 {offsets = [0, 1], sizes = [64, 1], strides = [1, 1]} : vector<64x3xf32> to vector<64x1xf32>
    %133 = vector.broadcast %99 : vector<1x1xf32> to vector<64x1xf32>
    %134 = arith.mulf %133, %132 : vector<64x1xf32>
    %135 = vector.extract_strided_slice %102 {offsets = [0, 0], sizes = [64, 1], strides = [1, 1]} : vector<64x3xf32> to vector<64x1xf32>
    %136 = vector.broadcast %100 : vector<1x1xf32> to vector<64x1xf32>
    %137 = arith.mulf %136, %135 : vector<64x1xf32>
    %138 = arith.subf %134, %137 : vector<64x1xf32>
    %139 = vector.extract_strided_slice %3 {offsets = [0, 0], sizes = [1, 128], strides = [1, 1]} : vector<3x128xf32> to vector<1x128xf32>
    %140 = vector.broadcast %131 : vector<64x1xf32> to vector<64x128xf32>
    %141 = vector.broadcast %139 : vector<1x128xf32> to vector<64x128xf32>
    %142 = arith.mulf %140, %141 : vector<64x128xf32>
    %143 = vector.extract_strided_slice %3 {offsets = [1, 0], sizes = [1, 128], strides = [1, 1]} : vector<3x128xf32> to vector<1x128xf32>
    %144 = vector.broadcast %138 : vector<64x1xf32> to vector<64x128xf32>
    %145 = vector.broadcast %143 : vector<1x128xf32> to vector<64x128xf32>
    %146 = arith.mulf %144, %145 : vector<64x128xf32>
    %147 = arith.addf %142, %146 : vector<64x128xf32>
    %148 = vector.extract_strided_slice %102 {offsets = [0, 2], sizes = [64, 1], strides = [1, 1]} : vector<64x3xf32> to vector<64x1xf32>
    %149 = vector.extract_strided_slice %3 {offsets = [2, 0], sizes = [1, 128], strides = [1, 1]} : vector<3x128xf32> to vector<1x128xf32>
    %150 = vector.broadcast %148 : vector<64x1xf32> to vector<64x128xf32>
    %151 = vector.broadcast %149 : vector<1x128xf32> to vector<64x128xf32>
    %152 = arith.mulf %150, %151 : vector<64x128xf32>
    %153 = arith.addf %147, %152 : vector<64x128xf32>
    %154 = vector.broadcast %103 : vector<64x1xf32> to vector<64x128xf32>
    %155 = arith.addf %153, %154 : vector<64x128xf32>
    %cst_58 = arith.constant 0.000000e+00 : f32
    %156 = vector.broadcast %cst_58 : f32 to vector<64x128xf32>
    %157 = arith.maximumf %155, %156 : vector<64x128xf32>
    %158 = tpu.concatenate %124, %157 in 1 : vector<64x128xf32>, vector<64x128xf32> -> vector<64x256xf32>
    %c0_59 = arith.constant 0 : index
    %c0_60 = arith.constant 0 : index
    %159 = vector.load %arg19[%c0_59, %c0_60] : memref<128x64xbf16, #tpu.memory_space<vmem>>, vector<128x64xbf16>
    %160 = arith.truncf %158 : vector<64x256xf32> to vector<64x256xbf16>
    %cst_61 = arith.constant dense<0.000000e+00> : vector<128x256xf32>
    %161 = tpu.matmul %159, %160, %cst_61 {dimension_numbers = #tpu.dot_dimension_numbers<[1], [0], [0], [1], [0, 0, 1, 1], [], []>} : vector<128x64xbf16>, vector<64x256xbf16>, vector<128x256xf32> -> vector<128x256xf32>
    %c0_62 = arith.constant 0 : index
    %c0_63 = arith.constant 0 : index
    %162 = vector.load %arg20[%c0_62, %c0_63] : memref<128x1xf32, #tpu.memory_space<vmem>>, vector<128x1xf32>
    %163 = vector.broadcast %162 : vector<128x1xf32> to vector<128x256xf32>
    %164 = arith.addf %161, %163 : vector<128x256xf32>
    %cst_64 = arith.constant 0.000000e+00 : f32
    %165 = vector.broadcast %cst_64 : f32 to vector<128x256xf32>
    %166 = arith.maximumf %164, %165 : vector<128x256xf32>
    %c0_65 = arith.constant 0 : index
    %c0_66 = arith.constant 0 : index
    %167 = vector.load %arg21[%c0_65, %c0_66] : memref<256x128xbf16, #tpu.memory_space<vmem>>, vector<256x128xbf16>
    %168 = arith.truncf %166 : vector<128x256xf32> to vector<128x256xbf16>
    %cst_67 = arith.constant dense<0.000000e+00> : vector<256x256xf32>
    %169 = tpu.matmul %167, %168, %cst_67 {dimension_numbers = #tpu.dot_dimension_numbers<[1], [0], [0], [1], [0, 0, 1, 1], [], []>} : vector<256x128xbf16>, vector<128x256xbf16>, vector<256x256xf32> -> vector<256x256xf32>
    %c0_68 = arith.constant 0 : index
    %c0_69 = arith.constant 0 : index
    %170 = vector.load %arg22[%c0_68, %c0_69] : memref<256x1xf32, #tpu.memory_space<vmem>>, vector<256x1xf32>
    %171 = vector.broadcast %170 : vector<256x1xf32> to vector<256x256xf32>
    %172 = arith.addf %169, %171 : vector<256x256xf32>
    %cst_70 = arith.constant 0.000000e+00 : f32
    %173 = vector.broadcast %cst_70 : f32 to vector<256x256xf32>
    %174 = arith.maximumf %172, %173 : vector<256x256xf32>
    %175 = vector.extract_strided_slice %174 {offsets = [0, 0], sizes = [256, 128], strides = [1, 1]} : vector<256x256xf32> to vector<256x128xf32>
    %cst_71 = arith.constant dense<0xFF800000> : vector<256xf32>
    %176 = vector.multi_reduction <maximumf>, %175, %cst_71 [1] : vector<256x128xf32> to vector<256xf32>
    %177 = vector.shape_cast %176 : vector<256xf32> to vector<256x1xf32>
    %178 = arith.truncf %177 : vector<256x1xf32> to vector<256x1xbf16>
    %179 = vector.extract_strided_slice %174 {offsets = [0, 128], sizes = [256, 128], strides = [1, 1]} : vector<256x256xf32> to vector<256x128xf32>
    %cst_72 = arith.constant dense<0xFF800000> : vector<256xf32>
    %180 = vector.multi_reduction <maximumf>, %179, %cst_72 [1] : vector<256x128xf32> to vector<256xf32>
    %181 = vector.shape_cast %180 : vector<256xf32> to vector<256x1xf32>
    %182 = arith.truncf %181 : vector<256x1xf32> to vector<256x1xbf16>
    %c0_73 = arith.constant 0 : index
    %c0_74 = arith.constant 0 : index
    %183 = vector.load %arg23[%c0_73, %c0_74] : memref<64x256xbf16, #tpu.memory_space<vmem>>, vector<64x256xbf16>
    %cst_75 = arith.constant dense<0.000000e+00> : vector<64x1xf32>
    %184 = tpu.matmul %183, %178, %cst_75 {dimension_numbers = #tpu.dot_dimension_numbers<[1], [0], [0], [1], [0, 0, 1, 1], [], []>} : vector<64x256xbf16>, vector<256x1xbf16>, vector<64x1xf32> -> vector<64x1xf32>
    %c0_76 = arith.constant 0 : index
    %c0_77 = arith.constant 0 : index
    %185 = vector.load %arg24[%c0_76, %c0_77] : memref<64x1xf32, #tpu.memory_space<vmem>>, vector<64x1xf32>
    %186 = arith.addf %184, %185 : vector<64x1xf32>
    %cst_78 = arith.constant 0.000000e+00 : f32
    %187 = vector.broadcast %cst_78 : f32 to vector<64x1xf32>
    %188 = arith.maximumf %186, %187 : vector<64x1xf32>
    %c0_79 = arith.constant 0 : index
    %c0_80 = arith.constant 0 : index
    %189 = vector.load %arg25[%c0_79, %c0_80] : memref<64x256xbf16, #tpu.memory_space<vmem>>, vector<64x256xbf16>
    %cst_81 = arith.constant dense<0.000000e+00> : vector<64x1xf32>
    %190 = tpu.matmul %189, %182, %cst_81 {dimension_numbers = #tpu.dot_dimension_numbers<[1], [0], [0], [1], [0, 0, 1, 1], [], []>} : vector<64x256xbf16>, vector<256x1xbf16>, vector<64x1xf32> -> vector<64x1xf32>
    %c0_82 = arith.constant 0 : index
    %c0_83 = arith.constant 0 : index
    %191 = vector.load %arg26[%c0_82, %c0_83] : memref<64x1xf32, #tpu.memory_space<vmem>>, vector<64x1xf32>
    %192 = arith.addf %190, %191 : vector<64x1xf32>
    %cst_84 = arith.constant 0.000000e+00 : f32
    %193 = vector.broadcast %cst_84 : f32 to vector<64x1xf32>
    %194 = arith.maximumf %192, %193 : vector<64x1xf32>
    %c0_85 = arith.constant 0 : index
    %c0_86 = arith.constant 0 : index
    %195 = vector.load %arg27[%c0_85, %c0_86] : memref<128x256xbf16, #tpu.memory_space<vmem>>, vector<128x256xbf16>
    %cst_87 = arith.constant dense<0.000000e+00> : vector<128x1xf32>
    %196 = tpu.matmul %195, %178, %cst_87 {dimension_numbers = #tpu.dot_dimension_numbers<[1], [0], [0], [1], [0, 0, 1, 1], [], []>} : vector<128x256xbf16>, vector<256x1xbf16>, vector<128x1xf32> -> vector<128x1xf32>
    %c0_88 = arith.constant 0 : index
    %c0_89 = arith.constant 0 : index
    %197 = vector.load %arg28[%c0_88, %c0_89] : memref<128x256xbf16, #tpu.memory_space<vmem>>, vector<128x256xbf16>
    %cst_90 = arith.constant dense<0.000000e+00> : vector<128x1xf32>
    %198 = tpu.matmul %197, %182, %cst_90 {dimension_numbers = #tpu.dot_dimension_numbers<[1], [0], [0], [1], [0, 0, 1, 1], [], []>} : vector<128x256xbf16>, vector<256x1xbf16>, vector<128x1xf32> -> vector<128x1xf32>
    %199 = arith.addf %196, %198 : vector<128x1xf32>
    %c0_91 = arith.constant 0 : index
    %c0_92 = arith.constant 0 : index
    %200 = vector.load %arg29[%c0_91, %c0_92] : memref<128x1xf32, #tpu.memory_space<vmem>>, vector<128x1xf32>
    %201 = vector.broadcast %101 : vector<1x1xf32> to vector<128x1xf32>
    %202 = arith.mulf %200, %201 : vector<128x1xf32>
    %203 = arith.addf %199, %202 : vector<128x1xf32>
    %c0_93 = arith.constant 0 : index
    %c0_94 = arith.constant 0 : index
    %204 = vector.load %arg30[%c0_93, %c0_94] : memref<128x1xf32, #tpu.memory_space<vmem>>, vector<128x1xf32>
    %205 = arith.addf %203, %204 : vector<128x1xf32>
    %cst_95 = arith.constant 0.000000e+00 : f32
    %206 = vector.broadcast %cst_95 : f32 to vector<128x1xf32>
    %207 = arith.maximumf %205, %206 : vector<128x1xf32>
    %c0_96 = arith.constant 0 : index
    %c0_97 = arith.constant 0 : index
    %208 = vector.load %arg31[%c0_96, %c0_97] : memref<128x128xbf16, #tpu.memory_space<vmem>>, vector<128x128xbf16>
    %209 = arith.truncf %207 : vector<128x1xf32> to vector<128x1xbf16>
    %cst_98 = arith.constant dense<0.000000e+00> : vector<128x1xf32>
    %210 = tpu.matmul %208, %209, %cst_98 {dimension_numbers = #tpu.dot_dimension_numbers<[1], [0], [0], [1], [0, 0, 1, 1], [], []>} : vector<128x128xbf16>, vector<128x1xbf16>, vector<128x1xf32> -> vector<128x1xf32>
    %c0_99 = arith.constant 0 : index
    %c0_100 = arith.constant 0 : index
    %211 = vector.load %arg32[%c0_99, %c0_100] : memref<128x64xbf16, #tpu.memory_space<vmem>>, vector<128x64xbf16>
    %212 = arith.truncf %188 : vector<64x1xf32> to vector<64x1xbf16>
    %cst_101 = arith.constant dense<0.000000e+00> : vector<128x1xf32>
    %213 = tpu.matmul %211, %212, %cst_101 {dimension_numbers = #tpu.dot_dimension_numbers<[1], [0], [0], [1], [0, 0, 1, 1], [], []>} : vector<128x64xbf16>, vector<64x1xbf16>, vector<128x1xf32> -> vector<128x1xf32>
    %214 = arith.addf %210, %213 : vector<128x1xf32>
    %c0_102 = arith.constant 0 : index
    %c0_103 = arith.constant 0 : index
    %215 = vector.load %arg33[%c0_102, %c0_103] : memref<128x64xbf16, #tpu.memory_space<vmem>>, vector<128x64xbf16>
    %216 = arith.truncf %194 : vector<64x1xf32> to vector<64x1xbf16>
    %cst_104 = arith.constant dense<0.000000e+00> : vector<128x1xf32>
    %217 = tpu.matmul %215, %216, %cst_104 {dimension_numbers = #tpu.dot_dimension_numbers<[1], [0], [0], [1], [0, 0, 1, 1], [], []>} : vector<128x64xbf16>, vector<64x1xbf16>, vector<128x1xf32> -> vector<128x1xf32>
    %218 = arith.addf %214, %217 : vector<128x1xf32>
    %c0_105 = arith.constant 0 : index
    %c0_106 = arith.constant 0 : index
    %219 = vector.load %arg34[%c0_105, %c0_106] : memref<128x1xf32, #tpu.memory_space<vmem>>, vector<128x1xf32>
    %220 = arith.addf %218, %219 : vector<128x1xf32>
    %c0_107 = arith.constant 0 : index
    %c0_108 = arith.constant 0 : index
    %c0_109 = arith.constant 0 : index
    %221 = vector.load %arg36[%c0_107, %c0_108, %c0_109] : memref<1x128x1xf32, #tpu.memory_space<vmem>>, vector<1x128x1xf32>
    %222 = vector.shape_cast %221 : vector<1x128x1xf32> to vector<128x1xf32>
    %223 = vector.shape_cast %220 : vector<128x1xf32> to vector<1x128x1xf32>
    tpu.vector_store %arg36[%c0_107, %c0_108, %c0_109], %223 {strides = array<i32>} : memref<1x128x1xf32, #tpu.memory_space<vmem>>, vector<1x128x1xf32>,
    return
  }
  func.func @transform_0(%arg0: i32) -> (i32, i32, i32) {
    %c0_i32 = arith.constant 0 : i32
    %c0_i32_0 = arith.constant 0 : i32
    %c0_i32_1 = arith.constant 0 : i32
    return %arg0, %c0_i32, %c0_i32_0 : i32, i32, i32
  }
  func.func @transform_1(%arg0: i32) -> (i32, i32, i32) {
    %c0_i32 = arith.constant 0 : i32
    %c0_i32_0 = arith.constant 0 : i32
    %c0_i32_1 = arith.constant 0 : i32
    return %arg0, %c0_i32, %c0_i32_0 : i32, i32, i32
  }
  func.func @transform_2(%arg0: i32) -> (i32, i32) {
    %c0_i32 = arith.constant 0 : i32
    %c0_i32_0 = arith.constant 0 : i32
    %c0_i32_1 = arith.constant 0 : i32
    return %c0_i32, %c0_i32_0 : i32, i32
  }
  func.func @transform_3(%arg0: i32) -> (i32, i32) {
    %c0_i32 = arith.constant 0 : i32
    %c0_i32_0 = arith.constant 0 : i32
    %c0_i32_1 = arith.constant 0 : i32
    return %c0_i32, %c0_i32_0 : i32, i32
  }
  func.func @transform_4(%arg0: i32) -> (i32, i32) {
    %c0_i32 = arith.constant 0 : i32
    %c0_i32_0 = arith.constant 0 : i32
    %c0_i32_1 = arith.constant 0 : i32
    return %c0_i32, %c0_i32_0 : i32, i32
  }
  func.func @transform_5(%arg0: i32) -> (i32, i32) {
    %c0_i32 = arith.constant 0 : i32
    %c0_i32_0 = arith.constant 0 : i32
    %c0_i32_1 = arith.constant 0 : i32
    return %c0_i32, %c0_i32_0 : i32, i32
  }
  func.func @transform_6(%arg0: i32) -> (i32, i32) {
    %c0_i32 = arith.constant 0 : i32
    %c0_i32_0 = arith.constant 0 : i32
    %c0_i32_1 = arith.constant 0 : i32
    return %c0_i32, %c0_i32_0 : i32, i32
  }
  func.func @transform_7(%arg0: i32) -> (i32, i32) {
    %c0_i32 = arith.constant 0 : i32
    %c0_i32_0 = arith.constant 0 : i32
    %c0_i32_1 = arith.constant 0 : i32
    return %c0_i32, %c0_i32_0 : i32, i32
  }
  func.func @transform_8(%arg0: i32) -> (i32, i32) {
    %c0_i32 = arith.constant 0 : i32
    %c0_i32_0 = arith.constant 0 : i32
    %c0_i32_1 = arith.constant 0 : i32
    return %c0_i32, %c0_i32_0 : i32, i32
  }
  func.func @transform_9(%arg0: i32) -> (i32, i32) {
    %c0_i32 = arith.constant 0 : i32
    %c0_i32_0 = arith.constant 0 : i32
    %c0_i32_1 = arith.constant 0 : i32
    return %c0_i32, %c0_i32_0 : i32, i32
  }
  func.func @transform_10(%arg0: i32) -> (i32, i32) {
    %c0_i32 = arith.constant 0 : i32
    %c0_i32_0 = arith.constant 0 : i32
    %c0_i32_1 = arith.constant 0 : i32
    return %c0_i32, %c0_i32_0 : i32, i32
  }
  func.func @transform_11(%arg0: i32) -> (i32, i32) {
    %c0_i32 = arith.constant 0 : i32
    %c0_i32_0 = arith.constant 0 : i32
    %c0_i32_1 = arith.constant 0 : i32
    return %c0_i32, %c0_i32_0 : i32, i32
  }
  func.func @transform_12(%arg0: i32) -> (i32, i32) {
    %c0_i32 = arith.constant 0 : i32
    %c0_i32_0 = arith.constant 0 : i32
    %c0_i32_1 = arith.constant 0 : i32
    return %c0_i32, %c0_i32_0 : i32, i32
  }
  func.func @transform_13(%arg0: i32) -> (i32, i32) {
    %c0_i32 = arith.constant 0 : i32
    %c0_i32_0 = arith.constant 0 : i32
    %c0_i32_1 = arith.constant 0 : i32
    return %c0_i32, %c0_i32_0 : i32, i32
  }
  func.func @transform_14(%arg0: i32) -> (i32, i32) {
    %c0_i32 = arith.constant 0 : i32
    %c0_i32_0 = arith.constant 0 : i32
    %c0_i32_1 = arith.constant 0 : i32
    return %c0_i32, %c0_i32_0 : i32, i32
  }
  func.func @transform_15(%arg0: i32) -> (i32, i32) {
    %c0_i32 = arith.constant 0 : i32
    %c0_i32_0 = arith.constant 0 : i32
    %c0_i32_1 = arith.constant 0 : i32
    return %c0_i32, %c0_i32_0 : i32, i32
  }
  func.func @transform_16(%arg0: i32) -> (i32, i32) {
    %c0_i32 = arith.constant 0 : i32
    %c0_i32_0 = arith.constant 0 : i32
    %c0_i32_1 = arith.constant 0 : i32
    return %c0_i32, %c0_i32_0 : i32, i32
  }
  func.func @transform_17(%arg0: i32) -> (i32, i32) {
    %c0_i32 = arith.constant 0 : i32
    %c0_i32_0 = arith.constant 0 : i32
    %c0_i32_1 = arith.constant 0 : i32
    return %c0_i32, %c0_i32_0 : i32, i32
  }
  func.func @transform_18(%arg0: i32) -> (i32, i32) {
    %c0_i32 = arith.constant 0 : i32
    %c0_i32_0 = arith.constant 0 : i32
    %c0_i32_1 = arith.constant 0 : i32
    return %c0_i32, %c0_i32_0 : i32, i32
  }
  func.func @transform_19(%arg0: i32) -> (i32, i32) {
    %c0_i32 = arith.constant 0 : i32
    %c0_i32_0 = arith.constant 0 : i32
    %c0_i32_1 = arith.constant 0 : i32
    return %c0_i32, %c0_i32_0 : i32, i32
  }
  func.func @transform_20(%arg0: i32) -> (i32, i32) {
    %c0_i32 = arith.constant 0 : i32
    %c0_i32_0 = arith.constant 0 : i32
    %c0_i32_1 = arith.constant 0 : i32
    return %c0_i32, %c0_i32_0 : i32, i32
  }
  func.func @transform_21(%arg0: i32) -> (i32, i32) {
    %c0_i32 = arith.constant 0 : i32
    %c0_i32_0 = arith.constant 0 : i32
    %c0_i32_1 = arith.constant 0 : i32
    return %c0_i32, %c0_i32_0 : i32, i32
  }
  func.func @transform_22(%arg0: i32) -> (i32, i32) {
    %c0_i32 = arith.constant 0 : i32
    %c0_i32_0 = arith.constant 0 : i32
    %c0_i32_1 = arith.constant 0 : i32
    return %c0_i32, %c0_i32_0 : i32, i32
  }
  func.func @transform_23(%arg0: i32) -> (i32, i32) {
    %c0_i32 = arith.constant 0 : i32
    %c0_i32_0 = arith.constant 0 : i32
    %c0_i32_1 = arith.constant 0 : i32
    return %c0_i32, %c0_i32_0 : i32, i32
  }
  func.func @transform_24(%arg0: i32) -> (i32, i32) {
    %c0_i32 = arith.constant 0 : i32
    %c0_i32_0 = arith.constant 0 : i32
    %c0_i32_1 = arith.constant 0 : i32
    return %c0_i32, %c0_i32_0 : i32, i32
  }
  func.func @transform_25(%arg0: i32) -> (i32, i32) {
    %c0_i32 = arith.constant 0 : i32
    %c0_i32_0 = arith.constant 0 : i32
    %c0_i32_1 = arith.constant 0 : i32
    return %c0_i32, %c0_i32_0 : i32, i32
  }
  func.func @transform_26(%arg0: i32) -> (i32, i32) {
    %c0_i32 = arith.constant 0 : i32
    %c0_i32_0 = arith.constant 0 : i32
    %c0_i32_1 = arith.constant 0 : i32
    return %c0_i32, %c0_i32_0 : i32, i32
  }
  func.func @transform_27(%arg0: i32) -> (i32, i32) {
    %c0_i32 = arith.constant 0 : i32
    %c0_i32_0 = arith.constant 0 : i32
    %c0_i32_1 = arith.constant 0 : i32
    return %c0_i32, %c0_i32_0 : i32, i32
  }
  func.func @transform_28(%arg0: i32) -> (i32, i32) {
    %c0_i32 = arith.constant 0 : i32
    %c0_i32_0 = arith.constant 0 : i32
    %c0_i32_1 = arith.constant 0 : i32
    return %c0_i32, %c0_i32_0 : i32, i32
  }
  func.func @transform_29(%arg0: i32) -> (i32, i32) {
    %c0_i32 = arith.constant 0 : i32
    %c0_i32_0 = arith.constant 0 : i32
    %c0_i32_1 = arith.constant 0 : i32
    return %c0_i32, %c0_i32_0 : i32, i32
  }
  func.func @transform_30(%arg0: i32) -> (i32, i32) {
    %c0_i32 = arith.constant 0 : i32
    %c0_i32_0 = arith.constant 0 : i32
    %c0_i32_1 = arith.constant 0 : i32
    return %c0_i32, %c0_i32_0 : i32, i32
  }
  func.func @transform_31(%arg0: i32) -> (i32, i32) {
    %c0_i32 = arith.constant 0 : i32
    %c0_i32_0 = arith.constant 0 : i32
    %c0_i32_1 = arith.constant 0 : i32
    return %c0_i32, %c0_i32_0 : i32, i32
  }
  func.func @transform_32(%arg0: i32) -> (i32, i32) {
    %c0_i32 = arith.constant 0 : i32
    %c0_i32_0 = arith.constant 0 : i32
    %c0_i32_1 = arith.constant 0 : i32
    return %c0_i32, %c0_i32_0 : i32, i32
  }
  func.func @transform_33(%arg0: i32) -> (i32, i32) {
    %c0_i32 = arith.constant 0 : i32
    %c0_i32_0 = arith.constant 0 : i32
    %c0_i32_1 = arith.constant 0 : i32
    return %c0_i32, %c0_i32_0 : i32, i32
  }
  func.func @transform_34(%arg0: i32) -> (i32, i32, i32) {
    %c0_i32 = arith.constant 0 : i32
    %c0_i32_0 = arith.constant 0 : i32
    %c0_i32_1 = arith.constant 0 : i32
    return %arg0, %c0_i32, %c0_i32_0 : i32, i32, i32
  }
  func.func @transform_35(%arg0: i32) -> (i32, i32, i32) {
    %c0_i32 = arith.constant 0 : i32
    %c0_i32_0 = arith.constant 0 : i32
    %c0_i32_1 = arith.constant 0 : i32
    return %arg0, %c0_i32, %c0_i32_0 : i32, i32, i32
  }
}

</mosaic_0001>

<bundles_post_ra>
// kernel: pointnetv1_forward.1
= control target key start
LH: loop header
LB: loop body
LE: loop exit
PB: predicated region body
PF: predicated region fallthrough
CT: control target
= control target key end

     0   :  { %s7793_s6 = smov 1   ;;  %s7794_s10 = smov 2   ;;  %s10090_s0 = inlined_call_operand.smem [shape: u32[36], index: -1, kind: input, shape index: {}] }
   0x1   :  { %s7843_s5 = sld [smem:[%s10090_s0]]   ;;  %s7795_s14 = smov 3  }
   0x2   :  { %s7848_s9 = sld [smem:[%s10090_s0 + %s7793_s6]]   ;;  %s7796_s18 = smov 4  }
   0x3   :  { %s7853_s13 = sld [smem:[%s10090_s0 + %s7794_s10]]   ;;  %s7797_s22 = smov 5  }
   0x4   :  { %s7858_s17 = sld [smem:[%s10090_s0 + %s7795_s14]]   ;;  %s7798_s26 = smov 6  }
   0x5   :  { %s7863_s21 = sld [smem:[%s10090_s0 + %s7796_s18]]   ;;  %s7799_s30 = smov 7  }
   0x6   :  { %s7868_s25 = sld [smem:[%s10090_s0 + %s7797_s22]]   ;;  %s7800_s4 = smov 8  }
   0x7   :  { %10146 = sst [smem:[#allocation2_spill]] %s7843_s5  ;;  %s7801_s10 = smov 9  }
   0x8   :  { %s7873_s29 = sld [smem:[%s10090_s0 + %s7798_s26]]   ;;  %s7802_s15 = smov 10  }
   0x9   :  { %s7878_s3 = sld [smem:[%s10090_s0 + %s7799_s30]]   ;;  %s7803_s20 = smov 11  }
   0xa   :  { %s7883_s8 = sld [smem:[%s10090_s0 + %s7800_s4]]   ;;  %s7804_s26 = smov 12  }
   0xb   :  { %s7888_s14 = sld [smem:[%s10090_s0 + %s7801_s10]]   ;;  %s7805_s1 = smov 13  }
   0xc   :  { %s7893_s19 = sld [smem:[%s10090_s0 + %s7802_s15]]   ;;  %s7806_s7 = smov 14  }
   0xd   :  { %s7898_s24 = sld [smem:[%s10090_s0 + %s7803_s20]]   ;;  %s7807_s15 = smov 15  }
   0xe   :  { %s7903_s30 = sld [smem:[%s10090_s0 + %s7804_s26]]   ;;  %s7808_s22 = smov 16  }
   0xf   :  { %10147 = sst [smem:[#allocation3_spill]] %s7878_s3  ;;  %s7809_s28 = smov 17  }
  0x10   :  { %s7908_s6 = sld [smem:[%s10090_s0 + %s7805_s1]]  }
  0x11   :  { %s7913_s12 = sld [smem:[%s10090_s0 + %s7806_s7]]   ;;  %s7810_s7 = smov 18  }
  0x12   :  { %s7918_s20 = sld [smem:[%s10090_s0 + %s7807_s15]]   ;;  %s7811_s15 = smov 19  }
  0x13   :  { %s7923_s27 = sld [smem:[%s10090_s0 + %s7808_s22]]   ;;  %s7812_s22 = smov 20  }
  0x14   :  { %s7928_s4 = sld [smem:[%s10090_s0 + %s7809_s28]]   ;;  %s7813_s28 = smov 21  }
  0x17   :  { %10148 = sst [smem:[#allocation4_spill]] %s7913_s12 }
  0x18   :  { %10149 = sst [smem:[#allocation5_spill]] %s7918_s20 }
  0x19   :  { %10150 = sst [smem:[#allocation6_spill]] %s7923_s27 }
  0x1a   :  { %10151 = sst [smem:[#allocation7_spill]] %s7928_s4 }
  0x1b   :  { %s7933_s12 = sld [smem:[%s10090_s0 + %s7810_s7]]   ;;  %s7814_s7 = smov 22  }
  0x1c   :  { %s7938_s20 = sld [smem:[%s10090_s0 + %s7811_s15]]   ;;  %s7815_s15 = smov 23  }
  0x1d   :  { %s7943_s27 = sld [smem:[%s10090_s0 + %s7812_s22]]   ;;  %s7816_s22 = smov 24  }
  0x1e   :  { %s7948_s4 = sld [smem:[%s10090_s0 + %s7813_s28]]   ;;  %s7817_s28 = smov 25  }
  0x21   :  { %10152 = sst [smem:[#allocation8_spill]] %s7933_s12 }
  0x22   :  { %10153 = sst [smem:[#allocation9_spill]] %s7938_s20 }
  0x23   :  { %10154 = sst [smem:[#allocation10_spill]] %s7943_s27 }
  0x24   :  { %10155 = sst [smem:[#allocation11_spill]] %s7948_s4 }
  0x25   :  { %s7953_s12 = sld [smem:[%s10090_s0 + %s7814_s7]]   ;;  %s7818_s7 = smov 26  }
  0x26   :  { %s7958_s20 = sld [smem:[%s10090_s0 + %s7815_s15]]   ;;  %s7819_s15 = smov 27  }
  0x27   :  { %s7963_s27 = sld [smem:[%s10090_s0 + %s7816_s22]]   ;;  %s7820_s22 = smov 28  }
  0x28   :  { %s7968_s4 = sld [smem:[%s10090_s0 + %s7817_s28]]   ;;  %s7821_s28 = smov 29  }
  0x2b   :  { %10156 = sst [smem:[#allocation12_spill]] %s7953_s12 }
  0x2c   :  { %10157 = sst [smem:[#allocation13_spill]] %s7958_s20 }
  0x2d   :  { %10158 = sst [smem:[#allocation14_spill]] %s7963_s27 }
  0x2e   :  { %10159 = sst [smem:[#allocation15_spill]] %s7968_s4 }
  0x2f   :  { %s7973_s12 = sld [smem:[%s10090_s0 + %s7818_s7]]   ;;  %s7822_s7 = smov 30  }
  0x30   :  { %s7978_s20 = sld [smem:[%s10090_s0 + %s7819_s15]]   ;;  %s7823_s15 = smov 31  }
  0x31   :  { %s7983_s27 = sld [smem:[%s10090_s0 + %s7820_s22]]   ;;  %s7824_s22 = smov 32  }
  0x32   :  { %s7988_s4 = sld [smem:[%s10090_s0 + %s7821_s28]]   ;;  %s7825_s28 = smov 33  }
  0x35   :  { %10160 = sst [smem:[#allocation16_spill]] %s7973_s12 }
  0x36   :  { %10161 = sst [smem:[#allocation17_spill]] %s7978_s20 }
  0x37   :  { %10162 = sst [smem:[#allocation18_spill]] %s7983_s27 }
  0x38   :  { %10163 = sst [smem:[#allocation19_spill]] %s7988_s4 }
  0x39   :  { %s7993_s12 = sld [smem:[%s10090_s0 + %s7822_s7]]   ;;  %s7826_s7 = smov 34  }
  0x3a   :  { %s7998_s20 = sld [smem:[%s10090_s0 + %s7823_s15]]   ;;  %s7827_s15 = smov 35  }
  0x3b   :  { %s8003_s27 = sld [smem:[%s10090_s0 + %s7824_s22]]   ;;  %s8020_s22 = smov 0  }
  0x3c   :  { %s8008_s4 = sld [smem:[%s10090_s0 + %s7825_s28]]  }
  0x3f   :  { %10164 = sst [smem:[#allocation20_spill]] %s7993_s12 }
  0x40   :  { %10165 = sst [smem:[#allocation21_spill]] %s7998_s20 }
  0x41   :  { %s8013_s12 = sld [smem:[%s10090_s0 + %s7826_s7]]  }
  0x42   :  { %s8018_s20 = sld [smem:[%s10090_s0 + %s7827_s15]]  }
  0x43 LB: > { %s10166_s3 = sld [smem:[#allocation3_spill]]  ;;  %s6678_s23 = sadd.s32 4294967295, %s7791_s22   ;;  %s7791_s22 = sphi %s8020_s22, %s82_s22  }
  0x44   : > { %p6682_p0 = scmp.ge.s32.totalorder %s7791_s22, 1  ;;  %p984_p1 = scmp.lt.s32.totalorder %s7791_s22, 3 }
  0x46   : > { %p985_p2 = pnand %p6682_p0, %p984_p1 }
  0x48   : > { %988 = sbr.rel (%p985_p2) target bundleno = 3744 (0xea0), region = 156 }
  0x4d   : > { %v1107_v0 = vld [vmem:[%s7853_s13 + $0x30] sm:$0xff]  ;;  %v10109_v1 = vmov 2   ;;  %v10111_v2 = vmov 1   ;;  %v1108_v3 = vld [vmem:[%s7853_s13 + $0x38] sm:$0xff]  ;;  %v1105_v4 = vld [vmem:[%s7853_s13 + $0x20] sm:$0xff]  ;;  %v10113_v5 = vmov 0   ;;  %v1149_v59 = vlaneseq }
  0x4e   : > { %7513 = vset.pattern.permute.xlu0 %v10109_v1  ;;  %7512 = vset.pattern.permute.xlu1 %v10111_v2  ;;  %v1104_v6 = vld [vmem:[%s7853_s13 + $0x18] sm:$0xff]  ;;  %v1103_v7 = vld [vmem:[%s7853_s13 + $0x10] sm:$0xff]  ;;  %v1102_v8 = vld [vmem:[%s7853_s13 + $0x8] sm:$0xff]  ;;  %p1080_p3 = scmp.lt.s32.totalorder %s6678_s23, 1  ;;  %s10167_s5 = sld [smem:[#allocation2_spill]]  ;;  %vm1557_vm0 = vcmask 523264  }
  0x4f   : > { %1270 = vperm.xlu0 %7513, %v1107_v0   ;;  %1198 = vperm.xlu1 %7512, %v1107_v0   ;;  %v1106_v9 = vld [vmem:[%s7853_s13 + $0x28] sm:$0xff]  ;;  %v1323_v10 = vld [vmem:[%s7858_s17 + $0x30] sm:$0xff]  ;;  %v1324_v11 = vld [vmem:[%s7858_s17 + $0x38] sm:$0xff]  ;;  %v8110_v63 = vshrl.u32 %v1149_v59, 7  ;;  %s10213_s1 = sld [smem:[#allocation4_spill]]  ;;  %vm3232_vm1 = vcmask 7168  }
  0x50   : > { %1614 = vmatprep.mubr.bf16.mxu0 %v10113_v5  ;;  %1654 = vmatprep.mubr.bf16.mxu1 %v10113_v5  ;;  %v1101_v12 = vld [vmem:[%s7853_s13] sm:$0xff]  ;;  %v1319_v13 = vld [vmem:[%s7858_s17 + $0x10] sm:$0xff]  ;;  %v1318_v14 = vld [vmem:[%s7858_s17 + $0x8] sm:$0xff]  ;;  %s10266_s23 = smov (!%p1080_p3, %s6678_s23), 1  ;;  %s10215_s10 = sld [smem:[#allocation6_spill]] }
  0x51   : > { %v1436_v15 = vld [vmem:[%s7868_s25 + $0x78] sm:$0xff]  ;;  %v1434_v16 = vld [vmem:[%s7868_s25 + $0x68] sm:$0xff]  ;;  %v1321_v17 = vld [vmem:[%s7858_s17 + $0x20] sm:$0xff]  ;;  %s6683_s0 = sshll.u32 %s10266_s23, 2  ;;  %10168 = vst [vmem:[#allocation22_spill] sm:$0xff] %v8110_v63  ;;  %s10137_s2 = sshll.u32 %s10266_s23, 7 }
  0x52   : > { %v1432_v18 = vld [vmem:[%s7868_s25 + $0x58] sm:$0xff]  ;;  %v1322_v19 = vld [vmem:[%s7858_s17 + $0x28] sm:$0xff]  ;;  %v1317_v28 = vld [vmem:[%s7858_s17] sm:$0xff]  ;;  %s1087_s28 = scalar_lea.vmem %s7848_s9, %s6683_s0  ;;  %s8718_s7 = scalar_lea.vmem %s8013_s12, %s10137_s2 }
  0x53   : > { %1202 = vperm.xlu1 %7512, %v1108_v3   ;;  %1262 = vperm.xlu0 %7513, %v1105_v4   ;;  %v1430_v20 = vld [vmem:[%s7868_s25 + $0x48] sm:$0xff]  ;;  %v1428_v21 = vld [vmem:[%s7868_s25 + $0x38] sm:$0xff]  ;;  %v1435_v30 = vld [vmem:[%s7868_s25 + $0x70] sm:$0xff]  ;;  %s7832_s11 = smov 1   ;;  %s7833_s15 = smov 127  }
  0x54   : > { %v1426_v22 = vld [vmem:[%s7868_s25 + $0x28] sm:$0xff]  ;;  %v1424_v23 = vld [vmem:[%s7868_s25 + $0x18] sm:$0xff]  ;;  %v1433_v32 = vld [vmem:[%s7868_s25 + $0x60] sm:$0xff]  ;;  %s1083_s26 = scalar_lea.vmem %s10167_s5, %s6683_s0  ;;  %s10217_s16 = sld [smem:[#allocation7_spill]] }
  0x55   : > { %v1422_v24 = vld [vmem:[%s7868_s25 + $0x8] sm:$0xff]  ;;  %v1806_v25 = vld [vmem:[%s10166_s3 + $0xf8] sm:$0xff]  ;;  %v1431_v34 = vld [vmem:[%s7868_s25 + $0x50] sm:$0xff]  ;;  %s10219_s18 = sld [smem:[#allocation5_spill]]  ;;  %s7834_s2 = smov 126  }
  0x56   : > { %v1320_v26 = vld [vmem:[%s7858_s17 + $0x18] sm:$0xff]  ;;  %v1804_v29 = vld [vmem:[%s10166_s3 + $0xe8] sm:$0xff]  ;;  %v1429_v36 = vld [vmem:[%s7868_s25 + $0x40] sm:$0xff]  ;;  %s10221_s0 = sld [smem:[#allocation9_spill]] }
  0x57   : > { %7514 = vset.pattern.permute.xlu1 %v10109_v1  ;;  %1258 = vperm.xlu0 %7513, %v1104_v6   ;;  %v1790_v27 = vld [vmem:[%s10166_s3 + $0x78] sm:$0xff]  ;;  %v1788_v31 = vld [vmem:[%s10166_s3 + $0x68] sm:$0xff]  ;;  %v1427_v38 = vld [vmem:[%s7868_s25 + $0x30] sm:$0xff]  ;;  %s10263_s5 = sld [smem:[#allocation19_spill]] }
  0x58   : > { %1274 = vperm.xlu1 %7514, %v1108_v3   ;;  %v1802_v33 = vld [vmem:[%s10166_s3 + $0xd8] sm:$0xff]  ;;  %v1800_v37 = vld [vmem:[%s10166_s3 + $0xc8] sm:$0xff]  ;;  %v1425_v40 = vld [vmem:[%s7868_s25 + $0x20] sm:$0xff] }
  0x59   : > { %v1786_v35 = vld [vmem:[%s10166_s3 + $0x58] sm:$0xff]  ;;  %v1784_v39 = vld [vmem:[%s10166_s3 + $0x48] sm:$0xff]  ;;  %v1423_v42 = vld [vmem:[%s7868_s25 + $0x10] sm:$0xff] }
  0x5a   : > { %v1798_v41 = vld [vmem:[%s10166_s3 + $0xb8] sm:$0xff]  ;;  %v1421_v44 = vld [vmem:[%s7868_s25] sm:$0xff]  ;;  %v1796_v45 = vld [vmem:[%s10166_s3 + $0xa8] sm:$0xff] }
  0x5b   : > { %7521 = vset.pattern.permute.xlu0 %v10111_v2  ;;  %v1782_v43 = vld [vmem:[%s10166_s3 + $0x38] sm:$0xff]  ;;  %v1805_v46 = vld [vmem:[%s10166_s3 + $0xf0] sm:$0xff]  ;;  %v1780_v49 = vld [vmem:[%s10166_s3 + $0x28] sm:$0xff] }
  0x5c   : > { %7515 = vset.pattern.permute.xlu1 %v10113_v5  ;;  %1182 = vperm.xlu0 %7521, %v1103_v7   ;;  %v1789_v50 = vld [vmem:[%s10166_s3 + $0x70] sm:$0xff]  ;;  %v1794_v53 = vld [vmem:[%s10166_s3 + $0x98] sm:$0xff]  ;;  %v1803_v54 = vld [vmem:[%s10166_s3 + $0xe0] sm:$0xff] }
  0x5d   : > { %1131 = vperm.xlu1 %7515, %v1105_v4   ;;  %v1778_v56 = vld [vmem:[%s10166_s3 + $0x18] sm:$0xff]  ;;  %v1787_v58 = vld [vmem:[%s10166_s3 + $0x60] sm:$0xff]  ;;  %v1792_v60 = vld [vmem:[%s10166_s3 + $0x88] sm:$0xff] }
  0x5e   : > { %v1801_v62 = vld [vmem:[%s10166_s3 + $0xd0] sm:$0xff] }
  0x60   : > { %1178 = vperm.xlu0 %7521, %v1102_v8  }
  0x61   : > { %7516 = vset.pattern.permute.xlu1 %v10111_v2 }
  0x62   : > { %1190 = vperm.xlu1 %7516, %v1105_v4  }
  0x64   : > { %7524 = vset.pattern.permute.xlu0 %v10113_v5 }
  0x65   : > { %1141 = vperm.xlu0 %7524, %v1107_v0  }
  0x66   : > { %1194 = vperm.xlu1 %7516, %v1106_v9  }
  0x69   : > { %1146 = vperm.xlu0 %7524, %v1108_v3   ;;  %v1776_v3 = vld [vmem:[%s10166_s3 + $0x8] sm:$0xff] }
  0x6a   : > { %7517 = vset.pattern.permute.xlu1 %v10109_v1 }
  0x6b   : > { %1266 = vperm.xlu1 %7517, %v1106_v9  }
  0x6d   : > { %1136 = vperm.xlu0 %7524, %v1106_v9   ;;  %v1099_v9 = vld [vmem:[%s1083_s26] sm:$0x7]  ;;  %s10222_s26 = sld [smem:[#allocation11_spill]] }
  0x6f   : > { %7518 = vset.pattern.permute.xlu1 %v10113_v5 }
  0x70   : > { %1357 = vperm.xlu1 %7518, %v1323_v10   ;;  %v1100_v10 = vld [vmem:[%s1087_s28] sm:$0x7]  ;;  %s10229_s28 = sld [smem:[#allocation8_spill]] }
  0x71   : > { %1362 = vperm.xlu0 %7524, %v1324_v11  }
  0x74   : > { %1121 = vperm.xlu1 %7518, %v1103_v7  }
  0x75   : > { %1111 = vperm.xlu0 %7524, %v1101_v12  }
  0x78   : > { %1126 = vperm.xlu1 %7518, %v1104_v6  }
  0x79   : > { %1337 = vperm.xlu0 %7524, %v1319_v13   ;;  %v1799_v13 = vld [vmem:[%s10166_s3 + $0xc0] sm:$0xff] }
  0x7c   : > { %7519 = vset.pattern.permute.xlu1 %v10111_v2 }
  0x7d   : > { %1186 = vperm.xlu1 %7519, %v1104_v6   ;;  %1332 = vperm.xlu0 %7524, %v1318_v14   ;;  %v1785_v6 = vld [vmem:[%s10166_s3 + $0x50] sm:$0xff] }
  0x81   : > { %7520 = vset.pattern.permute.xlu1 %v10109_v1  ;;  %1514 = vperm.xlu0 %7524, %v1436_v15  }
  0x82   : > { %1254 = vperm.xlu1 %7520, %v1103_v7   ;;  %v1207_v7 = vsub.s32 1, %v8110_v63 }
  0x84   : > { %v8126_v14 = vrot.slane %v1099_v9, %v1207_v7  ;;  %v8128_v15 = vrot.slane %v1100_v10, %v1207_v7 }
  0x85   : > { %1504 = vperm.xlu0 %7524, %v1434_v16  }
  0x86   : > { %7522 = vset.pattern.permute.xlu1 %v10113_v5  ;;  %10169 = vst [vmem:[#allocation23_spill] sm:$0xff] %v8126_v14  ;;  %10170 = vst [vmem:[#allocation24_spill] sm:$0xff] %v8128_v15 }
  0x87   : > { %1347 = vperm.xlu1 %7522, %v1321_v17  }
  0x89   : > { %1494 = vperm.xlu0 %7524, %v1432_v18  }
  0x8b   : > { %1352 = vperm.xlu1 %7522, %v1322_v19  }
  0x8d   : > { %1484 = vperm.xlu0 %7524, %v1430_v20  }
  0x8f   : > { %1116 = vperm.xlu1 %7522, %v1102_v8  }
  0x91   : > { %1474 = vperm.xlu0 %7524, %v1428_v21  }
  0x93   : > { %7523 = vset.pattern.permute.xlu1 %v10111_v2 }
  0x94   : > { %1174 = vperm.xlu1 %7523, %v1101_v12  }
  0x95   : > { %1464 = vperm.xlu0 %7524, %v1426_v22   ;;  %v1783_v22 = vld [vmem:[%s10166_s3 + $0x40] sm:$0xff] }
  0x98   : > { %7525 = vset.pattern.permute.xlu1 %v10109_v1 }
  0x99   : > { %1454 = vperm.xlu0 %7524, %v1424_v23   ;;  %1246 = vperm.xlu1 %7525, %v1101_v12   ;;  %v1279_v12 = vsub.s32 2, %v8110_v63 }
  0x9d   : > { %1444 = vperm.xlu0 %7524, %v1422_v24   ;;  %1250 = vperm.xlu1 %7525, %v1102_v8   ;;  %v1151_v8 = vsub.s32 0, %v8110_v63 }
  0x9f   : > { %v8130_v16 = vrot.slane %v1099_v9, %v1151_v8  ;;  %v8132_v17 = vrot.slane %v1100_v10, %v1151_v8  ;;  %v1779_v8 = vld [vmem:[%s10166_s3 + $0x20] sm:$0xff] }
  0xa1   : > { %1964 = vperm.xlu0 %7524, %v1806_v25   ;;  %7526 = vset.pattern.permute.xlu1 %v10113_v5  ;;  %10171 = vst [vmem:[#allocation25_spill] sm:$0xff] %v8130_v16  ;;  %10172 = vst [vmem:[#allocation26_spill] sm:$0xff] %v8132_v17  ;;  %v8141_v25 = vrot.slane %v1099_v9, %v1279_v12  ;;  %v1793_v9 = vld [vmem:[%s10166_s3 + $0x90] sm:$0xff] }
  0xa2   : > { %1342 = vperm.xlu1 %7526, %v1320_v26   ;;  %v8143_v26 = vrot.slane %v1100_v10, %v1279_v12 }
  0xa3   : > { %10173 = vst [vmem:[#allocation27_spill] sm:$0xff] %v8141_v25 }
  0xa4   : > { %10174 = vst [vmem:[#allocation28_spill] sm:$0xff] %v8143_v26 }
  0xa5   : > { %1884 = vperm.xlu0 %7524, %v1790_v27  }
  0xa6   : > { %1327 = vperm.xlu1 %7526, %v1317_v28  }
  0xa9   : > { %1954 = vperm.xlu0 %7524, %v1804_v29  }
  0xaa   : > { %1509 = vperm.xlu1 %7526, %v1435_v30  }
  0xad   : > { %1874 = vperm.xlu0 %7524, %v1788_v31  }
  0xae   : > { %1499 = vperm.xlu1 %7526, %v1433_v32  }
  0xb1   : > { %1944 = vperm.xlu0 %7524, %v1802_v33  }
  0xb2   : > { %1489 = vperm.xlu1 %7526, %v1431_v34  }
  0xb5   : > { %1864 = vperm.xlu0 %7524, %v1786_v35  }
  0xb6   : > { %1479 = vperm.xlu1 %7526, %v1429_v36  }
  0xb9   : > { %1934 = vperm.xlu0 %7524, %v1800_v37  }
  0xba   : > { %1469 = vperm.xlu1 %7526, %v1427_v38  }
  0xbd   : > { %1854 = vperm.xlu0 %7524, %v1784_v39   ;;  %v1797_v39 = vld [vmem:[%s10166_s3 + $0xb0] sm:$0xff] }
  0xbe   : > { %1459 = vperm.xlu1 %7526, %v1425_v40  }
  0xc1   : > { %1924 = vperm.xlu0 %7524, %v1798_v41  }
  0xc2   : > { %1449 = vperm.xlu1 %7526, %v1423_v42  }
  0xc5   : > { %1844 = vperm.xlu0 %7524, %v1782_v43  }
  0xc6   : > { %1439 = vperm.xlu1 %7526, %v1421_v44  }
  0xc9   : > { %1914 = vperm.xlu0 %7524, %v1796_v45  }
  0xca   : > { %v1199_v47 = vpop.permute.xlu1 %1198  ;;  %1959 = vperm.xlu1 %7526, %v1805_v46   ;;  %v1271_v48 = vpop.permute.xlu0 %1270 }
  0xcb   : > { %v1225_v23 = vmul.f32 %v8126_v14, %v1199_v47  ;;  %v1226_v24 = vmul.f32 %v8128_v15, %v1199_v47  ;;  %v1297_v32 = vmul.f32 %v8141_v25, %v1271_v48  ;;  %v1298_v33 = vmul.f32 %v8143_v26, %v1271_v48  ;;  %v1781_v48 = vld [vmem:[%s10166_s3 + $0x30] sm:$0xff] }
  0xcd   : > { %1834 = vperm.xlu0 %7524, %v1780_v49  }
  0xce   : > { %v1203_v51 = vpop.permute.xlu1 %1202  ;;  %1879 = vperm.xlu1 %7526, %v1789_v50   ;;  %v8091_v52 = vpop.permute.xlu0 %1262 }
  0xcf   : > { %v1227_v28 = vmul.f32 %v8126_v14, %v1203_v51  ;;  %v1228_v29 = vmul.f32 %v8128_v15, %v1203_v51 }
  0xd1   : > { %1904 = vperm.xlu0 %7524, %v1794_v53  }
  0xd2   : > { %1949 = vperm.xlu1 %7526, %v1803_v54   ;;  %v8097_v55 = vpop.permute.xlu0 %1258 }
  0xd3   : > { %v1275_v57 = vpop.permute.xlu1 %1274 }
  0xd4   : > { %v1299_v41 = vmul.f32 %v8141_v25, %v1275_v57  ;;  %v1300_v42 = vmul.f32 %v8143_v26, %v1275_v57  ;;  %v1795_v57 = vld [vmem:[%s10166_s3 + $0xa0] sm:$0xff] }
  0xd5   : > { %1824 = vperm.xlu0 %7524, %v1778_v56  }
  0xd6   : > { %1869 = vperm.xlu1 %7526, %v1787_v58  }
  0xd7   : > { %v8107_v61 = vpop.permute.xlu0 %1182 }
  0xd8   : > { %v8112_v0 = vpop.permute.xlu1 %1131 }
  0xd9   : > { %1894 = vperm.xlu0 %7524, %v1792_v60  }
  0xda   : > { %1939 = vperm.xlu1 %7526, %v1801_v62  }
  0xdb   : > { %v8117_v4 = vpop.permute.xlu0 %1178 }
  0xdd   : > { %v8122_v11 = vpop.permute.xlu1 %1190  ;;  %1814 = vperm.xlu0 %7524, %v1776_v3  }
  0xde   : > { %1859 = vperm.xlu1 %7526, %v1785_v6   ;;  %v1221_v12 = vmul.f32 %v8126_v14, %v8122_v11 }
  0xe0   : > { %v1142_v18 = vpop.permute.xlu0 %1141 }
  0xe1   : > { %v8134_v19 = vpop.permute.xlu1 %1194  ;;  %v1169_v20 = vmul.f32 %v8130_v16, %v1142_v18  ;;  %v1170_v21 = vmul.f32 %v8132_v17, %v1142_v18  ;;  %v1777_v18 = vld [vmem:[%s10166_s3 + $0x10] sm:$0xff] }
  0xe2   : > { %1929 = vperm.xlu1 %7526, %v1799_v13   ;;  %v1222_v13 = vmul.f32 %v8128_v15, %v8122_v11 }
  0xe3   : > { %v1241_v34 = vadd.f32 %v1225_v23, %v1169_v20  ;;  %v1242_v35 = vadd.f32 %v1226_v24, %v1170_v21  ;;  %v1165_v20 = vmul.f32 %v8130_v16, %v8112_v0  ;;  %v1166_v21 = vmul.f32 %v8132_v17, %v8112_v0 }
  0xe4   : > { %v1147_v27 = vpop.permute.xlu0 %1146  ;;  %v1224_v0 = vmul.f32 %v8128_v15, %v8134_v19 }
  0xe5   : > { %v1171_v30 = vmul.f32 %v8130_v16, %v1147_v27  ;;  %v1172_v31 = vmul.f32 %v8132_v17, %v1147_v27  ;;  %v1313_v43 = vadd.f32 %v1297_v32, %v1241_v34  ;;  %v1314_v44 = vadd.f32 %v1298_v33, %v1242_v35 }
  0xe6   : > { %v1267_v36 = vpop.permute.xlu1 %1266  ;;  %1849 = vperm.xlu1 %7526, %v1783_v22   ;;  %v1293_v27 = vmul.f32 %v8141_v25, %v8091_v52  ;;  %v1237_v11 = vadd.f32 %v1221_v12, %v1165_v20 }
  0xe7   : > { %v1243_v37 = vadd.f32 %v1227_v28, %v1171_v30  ;;  %v1244_v38 = vadd.f32 %v1228_v29, %v1172_v31  ;;  %v1294_v28 = vmul.f32 %v8143_v26, %v8091_v52  ;;  %v1238_v29 = vadd.f32 %v1222_v13, %v1166_v21  ;;  %v1791_v31 = vld [vmem:[%s10166_s3 + $0x80] sm:$0xff] }
  0xe8   : > { %v1137_v40 = vpop.permute.xlu0 %1136  ;;  %v1223_v30 = vmul.f32 %v8126_v14, %v8134_v19  ;;  %v1295_v35 = vmul.f32 %v8141_v25, %v1267_v36  ;;  %v1291_v21 = vmul.f32 %v8141_v25, %v8097_v55 }
  0xe9   : > { %v1315_v46 = vadd.f32 %v1299_v41, %v1243_v37  ;;  %v1316_v47 = vadd.f32 %v1300_v42, %v1244_v38  ;;  %v1167_v22 = vmul.f32 %v8130_v16, %v1137_v40  ;;  %v1168_v23 = vmul.f32 %v8132_v17, %v1137_v40 }
  0xea   : > { %1919 = vperm.xlu1 %7526, %v1797_v39   ;;  %v1296_v37 = vmul.f32 %v8143_v26, %v1267_v36  ;;  %v1309_v38 = vadd.f32 %v1293_v27, %v1237_v11  ;;  %v1310_v52 = vadd.f32 %v1294_v28, %v1238_v29  ;;  %v1775_v39 = vld [vmem:[%s10166_s3] sm:$0xff]  ;;  %v1216_v27 = vmul.f32 %v8128_v15, %v8117_v4  ;;  %s10262_s3 = sld [smem:[#allocation18_spill]] }
  0xeb   : > { %v1358_v45 = vpop.permute.xlu1 %1357  ;;  %v1239_v32 = vadd.f32 %v1223_v30, %v1167_v22  ;;  %v1240_v33 = vadd.f32 %v1224_v0, %v1168_v23  ;;  %v1292_v22 = vmul.f32 %v8143_v26, %v8097_v55 }
  0xec   : > { %v1377_v49 = vadd.f32 %v1358_v45, %v1313_v43  ;;  %v1378_v50 = vadd.f32 %v1358_v45, %v1314_v44  ;;  %v1363_v51 = vpop.permute.xlu0 %1362 }
  0xed   : > { %v1379_v53 = vadd.f32 %v1363_v51, %v1315_v46  ;;  %v1380_v54 = vadd.f32 %v1363_v51, %v1316_v47  ;;  %v1311_v42 = vadd.f32 %v1295_v35, %v1239_v32  ;;  %v1312_v43 = vadd.f32 %v1296_v37, %v1240_v33 }
  0xee   : > { %1839 = vperm.xlu1 %7526, %v1781_v48   ;;  %v1394_v56 = vmax.f32 %v1378_v50, 0.0  ;;  %v1393_v58 = vmax.f32 %v1377_v49, 0.0 }
  0xef   : > { %v8155_v59 = vpop.permute.xlu1 %1121  ;;  %v1396_v60 = vmax.f32 %v1380_v54, 0.0  ;;  %v1395_v62 = vmax.f32 %v1379_v53, 0.0  ;;  %v1217_v54 = vmul.f32 %v8126_v14, %v8107_v61 }
  0xf1   : > { %v1420_v3 = vpack.c.bf16 %v1396_v60, %v1394_v56  ;;  %v1419_v6 = vpack.c.bf16 %v1395_v62, %v1393_v58  ;;  %v1218_v56 = vmul.f32 %v8128_v15, %v8107_v61  ;;  %v1161_v58 = vmul.f32 %v8130_v16, %v8155_v59  ;;  %v1112_v60 = vpop.permute.xlu0 %1111 }
  0xf2   : > { %1909 = vperm.xlu1 %7526, %v1795_v57   ;;  %v1162_v57 = vmul.f32 %v8132_v17, %v8155_v59  ;;  %v1157_v32 = vmul.f32 %v8130_v16, %v1112_v60  ;;  %v1158_v33 = vmul.f32 %v8132_v17, %v1112_v60 }
  0xf3   : > { %v8158_v7 = vpop.permute.xlu1 %1126  ;;  %1590 = vmatprep.subr.bf16.mxu0 %v1420_v3  ;;  %7454 = vmatprep.subr.bf16.mxu1 %v1420_v3  ;;  %v1233_v12 = vadd.f32 %v1217_v54, %v1161_v58 }
  0xf4   : > { %1591 = vmatpush1.bf16.msra.mxu0 %v1419_v6  ;;  %7458 = vmatpush1.bf16.msra.mxu1 %v1419_v6  ;;  %v1234_v13 = vadd.f32 %v1218_v56, %v1162_v57  ;;  %v1163_v61 = vmul.f32 %v8130_v16, %v8158_v7 }
  0xf5   : > { %v1338_v29 = vpop.permute.xlu0 %1337 }
  0xf6   : > { %1829 = vperm.xlu1 %7526, %v1779_v8  }
  0xf8   : > { %v1187_v10 = vpop.permute.xlu1 %1186 }
  0xf9   : > { %v1219_v6 = vmul.f32 %v8126_v14, %v1187_v10  ;;  %v1220_v8 = vmul.f32 %v8128_v15, %v1187_v10 }
  0xfa   : > { %1899 = vperm.xlu1 %7526, %v1793_v9  }
  0xfb   : > { %v1235_v28 = vadd.f32 %v1219_v6, %v1163_v61 }
  0xfd   : > { %v1255_v24 = vpop.permute.xlu1 %1254 }
  0xfe   : > { %1819 = vperm.xlu1 %7526, %v1777_v18   ;;  %v1289_v62 = vmul.f32 %v8141_v25, %v1255_v24  ;;  %v1290_v3 = vmul.f32 %v8143_v26, %v1255_v24  ;;  %v1164_v18 = vmul.f32 %v8132_v17, %v8158_v7  ;;  %v1215_v24 = vmul.f32 %v8126_v14, %v8117_v4 }
 0x100   : > { %v1305_v10 = vadd.f32 %v1289_v62, %v1233_v12  ;;  %v1306_v23 = vadd.f32 %v1290_v3, %v1234_v13  ;;  %v1236_v7 = vadd.f32 %v1220_v8, %v1164_v18  ;;  %v7581_v18 = vld [vmem:[%s7863_s21] sm:$0xff]  }
 0x102   : > { %v1348_v34 = vpop.permute.xlu1 %1347  ;;  %1889 = vperm.xlu1 %7526, %v1791_v31  }
 0x103   : > { %v1373_v40 = vadd.f32 %v1348_v34, %v1309_v38  ;;  %v1374_v41 = vadd.f32 %v1348_v34, %v1310_v52  ;;  %v1370_v38 = vadd.f32 %v1338_v29, %v1306_v23  ;;  %v1369_v52 = vadd.f32 %v1338_v29, %v1305_v10  ;;  %v7586_v10 = vld [vmem:[%s7863_s21 + $0x30] sm:$0xff]   ;;  %v7587_v23 = vld [vmem:[%s7863_s21 + $0x18] sm:$0xff]  }
 0x105   : > { %v1389_v46 = vmax.f32 %v1373_v40, 0.0  ;;  %v1390_v47 = vmax.f32 %v1374_v41, 0.0  ;;  %v1307_v41 = vadd.f32 %v1291_v21, %v1235_v28  ;;  %v7584_v21 = vld [vmem:[%s7863_s21 + $0x28] sm:$0xff]  }
 0x106   : > { %v1353_v44 = vpop.permute.xlu1 %1352  ;;  %1809 = vperm.xlu1 %7526, %v1775_v39  }
 0x107   : > { %v1375_v45 = vadd.f32 %v1353_v44, %v1311_v42  ;;  %v1376_v19 = vadd.f32 %v1353_v44, %v1312_v43  ;;  %v1308_v42 = vadd.f32 %v1292_v22, %v1236_v7  ;;  %v7585_v22 = vld [vmem:[%s7863_s21 + $0x10] sm:$0xff]  }
 0x109   : > { %v1391_v48 = vmax.f32 %v1375_v45, 0.0  ;;  %v1392_v49 = vmax.f32 %v1376_v19, 0.0 }
 0x10a   : > { %v1117_v50 = vpop.permute.xlu1 %1116 }
 0x10b   : > { %v1418_v51 = vpack.c.bf16 %v1392_v49, %v1390_v47  ;;  %v1417_v53 = vpack.c.bf16 %v1391_v48, %v1389_v46  ;;  %v1159_v59 = vmul.f32 %v8130_v16, %v1117_v50  ;;  %v1160_v20 = vmul.f32 %v8132_v17, %v1117_v50  ;;  %v1333_v47 = vpop.permute.xlu0 %1332 }
 0x10c   : > { %v1386_v50 = vmax.f32 %v1370_v38, 0.0 }
 0x10d   : > { %1592 = vmatprep.subr.bf16.mxu0 %v1418_v51  ;;  %7455 = vmatprep.subr.bf16.mxu1 %v1418_v51  ;;  %v1231_v34 = vadd.f32 %v1215_v24, %v1159_v59  ;;  %v1232_v35 = vadd.f32 %v1216_v27, %v1160_v20  ;;  %v1385_v51 = vmax.f32 %v1369_v52, 0.0  ;;  %v7582_v59 = vld [vmem:[%s7863_s21 + $0x20] sm:$0xff]   ;;  %v7583_v20 = vld [vmem:[%s7863_s21 + $0x8] sm:$0xff]   ;;  %v7588_v24 = vld [vmem:[%s7863_s21 + $0x38] sm:$0xff]  }
 0x10e   : > { %1593 = vmatpush1.bf16.msra.mxu0 %v1417_v53  ;;  %7459 = vmatpush1.bf16.msra.mxu1 %v1417_v53 }
 0x10f   : > { %v1175_v36 = vpop.permute.xlu1 %1174 }
 0x110   : > { %v1213_v30 = vmul.f32 %v8126_v14, %v1175_v36  ;;  %v1214_v0 = vmul.f32 %v8128_v15, %v1175_v36 }
 0x112   : > { %v1229_v43 = vadd.f32 %v1213_v30, %v1157_v32  ;;  %v1230_v44 = vadd.f32 %v1214_v0, %v1158_v33  ;;  %v1515_v33 = vpop.permute.xlu0 %1514 }
 0x114   : > { %v1247_v9 = vpop.permute.xlu1 %1246 }
 0x115   : > { %v1285_v4 = vmul.f32 %v8141_v25, %v1247_v9  ;;  %v1286_v37 = vmul.f32 %v8143_v26, %v1247_v9 }
 0x117   : > { %v1301_v48 = vadd.f32 %v1285_v4, %v1229_v43  ;;  %v1302_v49 = vadd.f32 %v1286_v37, %v1230_v44 }
 0x118   : > { %v1251_v11 = vpop.permute.xlu1 %1250 }
 0x119   : > { %v1287_v31 = vmul.f32 %v8141_v25, %v1251_v11  ;;  %v1288_v55 = vmul.f32 %v8143_v26, %v1251_v11 }
 0x11b   : > { %v1303_v39 = vadd.f32 %v1287_v31, %v1231_v34  ;;  %v1304_v40 = vadd.f32 %v1288_v55, %v1232_v35 }
 0x11d   : > { %v1343_v45 = vpop.permute.xlu1 %1342  ;;  %v1368_v54 = vadd.f32 %v1333_v47, %v1304_v40  ;;  %v1367_v56 = vadd.f32 %v1333_v47, %v1303_v39  ;;  %v1505_v40 = vpop.permute.xlu0 %1504 }
 0x11e   : > { %v1371_v19 = vadd.f32 %v1343_v45, %v1307_v41  ;;  %v1372_v46 = vadd.f32 %v1343_v45, %v1308_v42 }
 0x11f   : > { %v1384_v9 = vmax.f32 %v1368_v54, 0.0  ;;  %v1383_v12 = vmax.f32 %v1367_v56, 0.0 }
 0x120   : > { %v1387_v53 = vmax.f32 %v1371_v19, 0.0  ;;  %v1388_v36 = vmax.f32 %v1372_v46, 0.0 }
 0x121   : > { %v1328_v58 = vpop.permute.xlu1 %1327  ;;  %v1495_v47 = vpop.permute.xlu0 %1494 }
 0x122   : > { %v1365_v57 = vadd.f32 %v1328_v58, %v1301_v48  ;;  %v1366_v60 = vadd.f32 %v1328_v58, %v1302_v49  ;;  %v1416_v62 = vpack.c.bf16 %v1388_v36, %v1386_v50  ;;  %v1415_v3 = vpack.c.bf16 %v1387_v53, %v1385_v51 }
 0x124   : > { %v1381_v6 = vmax.f32 %v1365_v57, 0.0  ;;  %v1382_v8 = vmax.f32 %v1366_v60, 0.0  ;;  %1594 = vmatprep.subr.bf16.mxu0 %v1416_v62  ;;  %7456 = vmatprep.subr.bf16.mxu1 %v1416_v62 }
 0x125   : > { %1595 = vmatpush1.bf16.msra.mxu0 %v1415_v3  ;;  %7460 = vmatpush1.bf16.msra.mxu1 %v1415_v3  ;;  %v1510_v4 = vpop.permute.xlu1 %1509  ;;  %v1485_v54 = vpop.permute.xlu0 %1484 }
 0x126   : > { %v1414_v13 = vpack.c.bf16 %v1384_v9, %v1382_v8  ;;  %v1413_v61 = vpack.c.bf16 %v1383_v12, %v1381_v6 }
 0x128   : > { %1596 = vmatprep.subr.bf16.mxu0 %v1414_v13  ;;  %7457 = vmatprep.subr.bf16.mxu1 %v1414_v13 }
 0x129   : > { %1597 = vmatpush1.bf16.msra.mxu0 %v1413_v61  ;;  %7461 = vmatpush1.bf16.msra.mxu1 %v1413_v61  ;;  %v1500_v43 = vpop.permute.xlu1 %1499 }
 0x12c   : > { %6697 = vmatmul.mubr.msk.bf16.vlgmr.msra.gmra.mxu0 %vm1557_vm0, %v7581_v18  ;;  %6701 = vmatmul.mubr.msk.bf16.vlgmr.msra.gmra.mxu1 %vm1557_vm0, %v7582_v59 }
 0x12d   : > { %1624 = vmatprep.mubr.bf16.mxu0 %v10113_v5  ;;  %1664 = vmatprep.mubr.bf16.mxu1 %v10113_v5  ;;  %v1490_v50 = vpop.permute.xlu1 %1489 }
 0x131   : > { %v1480_v58 = vpop.permute.xlu1 %1479 }
 0x134   : > { %6698 = vmatmul.mubr.msk.bf16.gmra.mxu0 %vm1557_vm0, %v7583_v20  ;;  %6702 = vmatmul.mubr.msk.bf16.gmra.mxu1 %vm1557_vm0, %v7584_v21 }
 0x135   : > { %1634 = vmatprep.mubr.bf16.mxu0 %v10113_v5  ;;  %1674 = vmatprep.mubr.bf16.mxu1 %v10113_v5 }
 0x13c   : > { %6699 = vmatmul.mubr.msk.bf16.gmra.mxu0 %vm1557_vm0, %v7585_v22  ;;  %6703 = vmatmul.mubr.msk.bf16.gmra.mxu1 %vm1557_vm0, %v7586_v10  ;;  %v1475_v22 = vpop.permute.xlu0 %1474 }
 0x13d   : > { %1644 = vmatprep.mubr.bf16.mxu0 %v10113_v5  ;;  %1684 = vmatprep.mubr.bf16.mxu1 %v10113_v5 }
 0x144   : > { %6700 = vmatmul.mubr.msk.bf16.gmra.mxu0 %vm1557_vm0, %v7587_v23  ;;  %6704 = vmatmul.mubr.msk.bf16.gmra.mxu1 %vm1557_vm0, %v7588_v24 }
 0x145   : > { %2095 = vmatprep.mubr.bf16.mxu1 %v10113_v5 }
 0x1ec   : > { %v8242_v27 = vpop.f32.mrf.mxu0  ;;  %v8244_v28 = vpop.f32.mrf.mxu1 }
 0x1ee   : > { %v8246_v7 = vpop.f32.mrf.mxu0  ;;  %v8248_v11 = vpop.f32.mrf.mxu1 }
 0x1f0   : > { %v8250_v29 = vpop.f32.mrf.mxu0  ;;  %v8252_v30 = vpop.f32.mrf.mxu1 }
 0x1f2   : > { %v8254_v0 = vpop.f32.mrf.mxu0  ;;  %v1662_v31 = vpop.f32.mrf.mxu1 }
 0x1f3   : > { %v1663_v5 = vadd.f32 %v1662_v31, %v1485_v54 }
 0x1f4   : > { %v8256_v55 = vpop.f32.mrf.mxu0  ;;  %v1666_v32 = vpop.f32.mrf.mxu1 }
 0x1f6   : > { %v8258_v34 = vpop.f32.mrf.mxu0  ;;  %v1668_v35 = vpop.f32.mrf.mxu1 }
 0x1f7   : > { %v1669_v1 = vadd.f32 %v1668_v35, %v1490_v50  ;;  %v1661_v35 = vadd.f32 %v8252_v30, %v1485_v54 }
 0x1f8   : > { %v8260_v37 = vpop.f32.mrf.mxu0  ;;  %v1670_v38 = vpop.f32.mrf.mxu1 }
 0x1fa   : > { %v8262_v52 = vpop.f32.mrf.mxu0  ;;  %v1672_v39 = vpop.f32.mrf.mxu1 }
 0x1fb   : > { %v1673_v18 = vadd.f32 %v1672_v39, %v1495_v47 }
 0x1fc   : > { %v8264_v41 = vpop.f32.mrf.mxu0  ;;  %v1676_v42 = vpop.f32.mrf.mxu1 }
 0x1fd   : > { %v1677_v10 = vadd.f32 %v1676_v42, %v1500_v43  ;;  %v1716_v42 = vmax.f32 %v1669_v1, 0.0 }
 0x1fe   : > { %v8266_v44 = vpop.f32.mrf.mxu0  ;;  %v1678_v45 = vpop.f32.mrf.mxu1 }
 0x1ff   : > { %v1679_v9 = vadd.f32 %v1678_v45, %v1500_v43  ;;  %v1718_v45 = vmax.f32 %v1673_v18, 0.0  ;;  %v1719_v39 = vmax.f32 %v1677_v10, 0.0  ;;  %v1465_v43 = vpop.permute.xlu0 %1464 }
 0x200   : > { %v8268_v19 = vpop.f32.mrf.mxu0  ;;  %v1680_v46 = vpop.f32.mrf.mxu1 }
 0x201   : > { %v1681_v13 = vadd.f32 %v1680_v46, %v1505_v40  ;;  %v1720_v2 = vmax.f32 %v1679_v9, 0.0  ;;  %v1713_v9 = vmax.f32 %v1661_v35, 0.0 }
 0x202   : > { %v1642_v48 = vpop.f32.mrf.mxu0  ;;  %v1682_v49 = vpop.f32.mrf.mxu1 }
 0x203   : > { %v1683_v57 = vadd.f32 %v1682_v49, %v1505_v40  ;;  %v1667_v40 = vadd.f32 %v1666_v32, %v1490_v50  ;;  %v1455_v30 = vpop.permute.xlu0 %1454 }
 0x204   : > { %v1686_v51 = vpop.f32.mrf.mxu1  ;;  %v8270_v53 = vpop.f32.mrf.mxu0 }
 0x205   : > { %v1687_v3 = vadd.f32 %v1686_v51, %v1510_v4  ;;  %v1722_v59 = vmax.f32 %v1683_v57, 0.0  ;;  %v1659_v57 = vadd.f32 %v8248_v11, %v1480_v58 }
 0x206   : > { %v1688_v36 = vpop.f32.mrf.mxu1  ;;  %v1648_v6 = vpop.f32.mrf.mxu0 }
 0x207   : > { %v1689_v60 = vadd.f32 %v1688_v36, %v1510_v4  ;;  %v1723_v23 = vmax.f32 %v1687_v3, 0.0  ;;  %v1470_v36 = vpop.permute.xlu1 %1469  ;;  %v1721_v4 = vmax.f32 %v1681_v13, 0.0  ;;  %v1770_v3 = vpack.c.bf16 %v1718_v45, %v1716_v42 }
 0x208   : > { %v1690_v56 = vpop.f32.mrf.mxu1  ;;  %v1650_v24 = vpop.f32.mrf.mxu0  ;;  %v1712_v32 = vmax.f32 %v1659_v57, 0.0  ;;  %v1649_v50 = vadd.f32 %v1648_v6, %v1470_v36  ;;  %v1641_v6 = vadd.f32 %v8268_v19, %v1465_v43 }
 0x209   : > { %v1691_v62 = vadd.f32 %v1690_v56, %v1515_v33  ;;  %v1724_v20 = vmax.f32 %v1689_v60, 0.0  ;;  %v1671_v56 = vadd.f32 %v1670_v38, %v1495_v47  ;;  %v1714_v38 = vmax.f32 %v1663_v5, 0.0 }
 0x20a   : > { %v1692_v8 = vpop.f32.mrf.mxu1  ;;  %v1652_v46 = vpop.f32.mrf.mxu0  ;;  %v1651_v1 = vadd.f32 %v1650_v24, %v1475_v22  ;;  %v1647_v5 = vadd.f32 %v8270_v53, %v1470_v36  ;;  %v1705_v36 = vmax.f32 %v1641_v6, 0.0 }
 0x20b   : > { %v1693_v12 = vadd.f32 %v1692_v8, %v1515_v33  ;;  %v1725_v61 = vmax.f32 %v1691_v62, 0.0  ;;  %v1772_v33 = vpack.c.bf16 %v1722_v59, %v1720_v2  ;;  %v1717_v60 = vmax.f32 %v1671_v56, 0.0  ;;  %v1460_v31 = vpop.permute.xlu1 %1459 }
 0x20c   : > { %v1771_v62 = vpack.c.bf16 %v1721_v4, %v1719_v39  ;;  %v1653_v47 = vadd.f32 %v1652_v46, %v1475_v22  ;;  %v1657_v8 = vadd.f32 %v8244_v28, %v1480_v58  ;;  %v1715_v2 = vmax.f32 %v1667_v40, 0.0 }
 0x20d   : > { %v1726_v21 = vmax.f32 %v1693_v12, 0.0  ;;  %v1773_v51 = vpack.c.bf16 %v1725_v61, %v1723_v23  ;;  %v1643_v12 = vadd.f32 %v1642_v48, %v1465_v43  ;;  %v1768_v61 = vpack.c.bf16 %v1714_v38, %v1712_v32  ;;  %v7590_v38 = vld [vmem:[%s7873_s29 + $0x8] sm:$0xff]   ;;  %v7596_v32 = vld [vmem:[%s7873_s29 + $0x38] sm:$0xff]  }
 0x20e   : > { %v1769_v11 = vpack.c.bf16 %v1717_v60, %v1715_v2  ;;  %v1710_v13 = vmax.f32 %v1653_v47, 0.0  ;;  %v1711_v54 = vmax.f32 %v1657_v8, 0.0  ;;  %v1639_v18 = vadd.f32 %v8266_v44, %v1460_v31  ;;  %v1445_v44 = vpop.permute.xlu0 %1444  ;;  %v7591_v47 = vld [vmem:[%s7873_s29 + $0x10] sm:$0xff]   ;;  %v7594_v8 = vld [vmem:[%s7873_s29 + $0x28] sm:$0xff]  }
 0x20f   : > { %v1774_v49 = vpack.c.bf16 %v1726_v21, %v1724_v20  ;;  %v1708_v59 = vmax.f32 %v1649_v50, 0.0  ;;  %v1450_v28 = vpop.permute.xlu1 %1449  ;;  %v1709_v20 = vmax.f32 %v1651_v1, 0.0  ;;  %v1633_v21 = vadd.f32 %v8262_v52, %v1455_v30  ;;  %v7595_v2 = vld [vmem:[%s7873_s29 + $0x30] sm:$0xff]   ;;  %v7597_v50 = vld [vmem:[%s7873_s29 + $0x40] sm:$0xff]   ;;  %v7600_v1 = vld [vmem:[%s7873_s29 + $0x58] sm:$0xff]  }
 0x210   : > { %v1767_v58 = vpack.c.bf16 %v1713_v9, %v1711_v54  ;;  %v1706_v22 = vmax.f32 %v1643_v12, 0.0  ;;  %v1637_v10 = vadd.f32 %v8264_v41, %v1460_v31  ;;  %v1707_v23 = vmax.f32 %v1647_v5, 0.0  ;;  %v7593_v31 = vld [vmem:[%s7873_s29 + $0x20] sm:$0xff]   ;;  %v7598_v9 = vld [vmem:[%s7873_s29 + $0x48] sm:$0xff]  }
 0x211   : > { %2063 = vmatprep.subr.bf16.mxu1 %v1774_v49  ;;  %v1766_v48 = vpack.c.bf16 %v1710_v13, %v1708_v59  ;;  %v1629_v53 = vadd.f32 %v8258_v34, %v1450_v28  ;;  %v1704_v24 = vmax.f32 %v1639_v18, 0.0  ;;  %v1631_v49 = vadd.f32 %v8260_v37, %v1455_v30  ;;  %v7601_v12 = vld [vmem:[%s7873_s29 + $0x60] sm:$0xff]   ;;  %v7602_v13 = vld [vmem:[%s7873_s29 + $0x68] sm:$0xff]   ;;  %v7604_v30 = vld [vmem:[%s7873_s29 + $0x78] sm:$0xff]  }
 0x212   : > { %2064 = vmatpush1.bf16.msra.mxu1 %v1773_v51  ;;  %v1765_v56 = vpack.c.bf16 %v1709_v20, %v1707_v23  ;;  %v1623_v19 = vadd.f32 %v8254_v0, %v1445_v44  ;;  %v1702_v4 = vmax.f32 %v1633_v21, 0.0  ;;  %v1627_v45 = vadd.f32 %v8256_v55, %v1450_v28  ;;  %v8320_v5 = vpop.permute.xlu0 %1964 }
 0x213   : > { %2065 = vmatprep.subr.bf16.mxu1 %v1772_v33  ;;  %v1764_v51 = vpack.c.bf16 %v1706_v22, %v1704_v24  ;;  %v1440_v52 = vpop.permute.xlu1 %1439  ;;  %v1703_v33 = vmax.f32 %v1637_v10, 0.0  ;;  %v1700_v40 = vmax.f32 %v1629_v53, 0.0  ;;  %v1621_v34 = vadd.f32 %v8250_v29, %v1445_v44 }
 0x214   : > { %v1619_v41 = vadd.f32 %v8246_v7, %v1440_v52  ;;  %v1701_v39 = vmax.f32 %v1631_v49, 0.0  ;;  %v1698_v46 = vmax.f32 %v1623_v19, 0.0  ;;  %v1617_v0 = vadd.f32 %v8242_v27, %v1440_v52 }
 0x215   : > { %v1763_v37 = vpack.c.bf16 %v1705_v36, %v1703_v33  ;;  %v1762_v57 = vpack.c.bf16 %v1702_v4, %v1700_v40  ;;  %v1699_v42 = vmax.f32 %v1627_v45, 0.0  ;;  %v1697_v55 = vmax.f32 %v1621_v34, 0.0 }
 0x216   : > { %2066 = vmatpush1.bf16.msra.mxu1 %v1771_v62  ;;  %v1696_v43 = vmax.f32 %v1619_v41, 0.0  ;;  %v1695_v60 = vmax.f32 %v1617_v0, 0.0  ;;  %v7589_v62 = vld [vmem:[%s7873_s29] sm:$0xff]   ;;  %v10175_v27 = vmov 0   ;;  %v8326_v28 = vpop.permute.xlu0 %1884 }
 0x217   : > { %2067 = vmatprep.subr.bf16.mxu1 %v1770_v3  ;;  %v1761_v35 = vpack.c.bf16 %v1701_v39, %v1699_v42  ;;  %v7592_v3 = vld [vmem:[%s7873_s29 + $0x18] sm:$0xff]   ;;  %v8318_v54 = vpop.permute.xlu1 %1959 }
 0x218   : > { %v1760_v7 = vpack.c.bf16 %v1698_v46, %v1696_v43  ;;  %v1759_v29 = vpack.c.bf16 %v1697_v55, %v1695_v60 }
 0x21a   : > { %2068 = vmatpush1.bf16.msra.mxu1 %v1769_v11  ;;  %v7599_v11 = vld [vmem:[%s7873_s29 + $0x50] sm:$0xff]   ;;  %v8336_v22 = vpop.permute.xlu0 %1954 }
 0x21b   : > { %2069 = vmatprep.subr.bf16.mxu1 %v1768_v61  ;;  %v7603_v61 = vld [vmem:[%s7873_s29 + $0x70] sm:$0xff]   ;;  %v8322_v18 = vpop.permute.xlu1 %1879 }
 0x21e   : > { %2070 = vmatpush1.bf16.msra.mxu1 %v1767_v58  ;;  %v8346_v24 = vpop.permute.xlu0 %1874 }
 0x21f   : > { %2071 = vmatprep.subr.bf16.mxu1 %v1766_v48  ;;  %v8330_v6 = vpop.permute.xlu1 %1949 }
 0x222   : > { %2072 = vmatpush1.bf16.msra.mxu1 %v1765_v56  ;;  %v8356_v19 = vpop.permute.xlu0 %1944 }
 0x223   : > { %2073 = vmatprep.subr.bf16.mxu1 %v1764_v51  ;;  %v8340_v10 = vpop.permute.xlu1 %1869 }
 0x226   : > { %2074 = vmatpush1.bf16.msra.mxu1 %v1763_v37  ;;  %v8366_v33 = vpop.permute.xlu0 %1864 }
 0x227   : > { %2075 = vmatprep.subr.bf16.mxu1 %v1762_v57  ;;  %v8350_v49 = vpop.permute.xlu1 %1939 }
 0x22a   : > { %2076 = vmatpush1.bf16.msra.mxu1 %v1761_v35  ;;  %v8376_v37 = vpop.permute.xlu0 %1934 }
 0x22b   : > { %2077 = vmatprep.subr.bf16.mxu1 %v1760_v7  ;;  %v8360_v51 = vpop.permute.xlu1 %1859 }
 0x22e   : > { %2078 = vmatpush1.bf16.msra.mxu1 %v1759_v29  ;;  %v8385_v35 = vpop.permute.xlu0 %1854 }
 0x22f   : > { %v8370_v40 = vpop.permute.xlu1 %1929 }
 0x231   : > { %2096 = vmatmul.mubr.bf16.vlgmr.msra.gmra.mxu1 %v7589_v62 }
 0x232   : > { %2105 = vmatprep.mubr.bf16.mxu1 %v10175_v27 }
 0x233   : > { %v8380_v57 = vpop.permute.xlu1 %1849 }
 0x239   : > { %2106 = vmatmul.mubr.bf16.gmra.mxu1 %v7590_v38 }
 0x23a   : > { %2115 = vmatprep.mubr.bf16.mxu1 %v10175_v27 }
 0x241   : > { %2116 = vmatmul.mubr.bf16.gmra.mxu1 %v7591_v47 }
 0x242   : > { %2125 = vmatprep.mubr.bf16.mxu1 %v10175_v27 }
 0x249   : > { %2126 = vmatmul.mubr.bf16.gmra.mxu1 %v7592_v3 }
 0x24a   : > { %2135 = vmatprep.mubr.bf16.mxu1 %v10175_v27 }
 0x251   : > { %2136 = vmatmul.mubr.bf16.gmra.mxu1 %v7593_v31 }
 0x252   : > { %2145 = vmatprep.mubr.bf16.mxu1 %v10175_v27 }
 0x259   : > { %2146 = vmatmul.mubr.bf16.gmra.mxu1 %v7594_v8 }
 0x25a   : > { %2155 = vmatprep.mubr.bf16.mxu1 %v10175_v27 }
 0x261   : > { %2156 = vmatmul.mubr.bf16.gmra.mxu1 %v7595_v2 }
 0x262   : > { %2165 = vmatprep.mubr.bf16.mxu1 %v10175_v27 }
 0x269   : > { %2166 = vmatmul.mubr.bf16.gmra.mxu1 %v7596_v32 }
 0x26a   : > { %2175 = vmatprep.mubr.bf16.mxu1 %v10175_v27 }
 0x271   : > { %2176 = vmatmul.mubr.bf16.gmra.mxu1 %v7597_v50 }
 0x272   : > { %2185 = vmatprep.mubr.bf16.mxu1 %v10175_v27 }
 0x279   : > { %2186 = vmatmul.mubr.bf16.gmra.mxu1 %v7598_v9 }
 0x27a   : > { %2195 = vmatprep.mubr.bf16.mxu1 %v10175_v27 }
 0x281   : > { %2196 = vmatmul.mubr.bf16.gmra.mxu1 %v7599_v11 }
 0x282   : > { %2205 = vmatprep.mubr.bf16.mxu1 %v10175_v27 }
 0x289   : > { %2206 = vmatmul.mubr.bf16.gmra.mxu1 %v7600_v1 }
 0x28a   : > { %2215 = vmatprep.mubr.bf16.mxu1 %v10175_v27 }
 0x291   : > { %2216 = vmatmul.mubr.bf16.gmra.mxu1 %v7601_v12 }
 0x292   : > { %2225 = vmatprep.mubr.bf16.mxu1 %v10175_v27 }
 0x299   : > { %2226 = vmatmul.mubr.bf16.gmra.mxu1 %v7602_v13 }
 0x29a   : > { %2235 = vmatprep.mubr.bf16.mxu1 %v10175_v27 }
 0x2a1   : > { %2236 = vmatmul.mubr.bf16.gmra.mxu1 %v7603_v61 }
 0x2a2   : > { %2245 = vmatprep.mubr.bf16.mxu1 %v10175_v27 }
 0x2a9   : > { %2246 = vmatmul.mubr.bf16.gmra.mxu1 %v7604_v30 }
 0x2f1   : > { %v8324_v59 = vpop.f32.mrf.mxu1 }
 0x2f2   : > { %10176 = vst [vmem:[#allocation29_spill] sm:$0xff] %v8324_v59 }
 0x2f3   : > { %v8328_v58 = vpop.f32.mrf.mxu1 }
 0x2f5   : > { %v8332_v20 = vpop.f32.mrf.mxu1 }
 0x2f6   : > { %10177 = vst [vmem:[#allocation30_spill] sm:$0xff] %v8332_v20 }
 0x2f7   : > { %v8334_v21 = vpop.f32.mrf.mxu1 }
 0x2f9   : > { %v8338_v48 = vpop.f32.mrf.mxu1 }
 0x2fa   : > { %10178 = vst [vmem:[#allocation31_spill] sm:$0xff] %v8338_v48 }
 0x2fb   : > { %v8342_v23 = vpop.f32.mrf.mxu1 }
 0x2fd   : > { %v8344_v53 = vpop.f32.mrf.mxu1 }
 0x2fe   : > { %10179 = vst [vmem:[#allocation32_spill] sm:$0xff] %v8344_v53 }
 0x2ff   : > { %v8348_v44 = vpop.f32.mrf.mxu1 }
 0x301   : > { %v8352_v36 = vpop.f32.mrf.mxu1 }
 0x302   : > { %10180 = vst [vmem:[#allocation33_spill] sm:$0xff] %v8352_v36 }
 0x303   : > { %v8354_v56 = vpop.f32.mrf.mxu1 }
 0x305   : > { %v8358_v4 = vpop.f32.mrf.mxu1 }
 0x306   : > { %10181 = vst [vmem:[#allocation34_spill] sm:$0xff] %v8358_v4 }
 0x307   : > { %v8362_v52 = vpop.f32.mrf.mxu1 }
 0x309   : > { %v8364_v45 = vpop.f32.mrf.mxu1 }
 0x30a   : > { %10182 = vst [vmem:[#allocation35_spill] sm:$0xff] %v8364_v45 }
 0x30b   : > { %v8368_v41 = vpop.f32.mrf.mxu1 }
 0x30d   : > { %v8372_v34 = vpop.f32.mrf.mxu1 }
 0x30e   : > { %10183 = vst [vmem:[#allocation36_spill] sm:$0xff] %v8372_v34 }
 0x30f   : > { %v8374_v39 = vpop.f32.mrf.mxu1 }
 0x311   : > { %v8378_v46 = vpop.f32.mrf.mxu1 }
 0x312   : > { %10184 = vst [vmem:[#allocation37_spill] sm:$0xff] %v8378_v46 }
 0x313   : > { %v2139_v0 = vpop.f32.mrf.mxu1 }
 0x314   : > { %v2140_v42 = vadd.f32 %v2139_v0, %v8380_v57 }
 0x315   : > { %v8383_v43 = vpop.f32.mrf.mxu1 }
 0x316   : > { %v2273_v55 = vmax.f32 %v2140_v42, 0.0 }
 0x317   : > { %v2143_v7 = vpop.f32.mrf.mxu1 }
 0x318   : > { %v2144_v60 = vadd.f32 %v2143_v7, %v8385_v35  ;;  %2416 = vmax.xlane.f32.xlu0 %v2273_v55 }
 0x319   : > { %v8388_v29 = vpop.f32.mrf.mxu1 }
 0x31a   : > { %v2275_v62 = vmax.f32 %v2144_v60, 0.0 }
 0x31b   : > { %v2149_v38 = vpop.f32.mrf.mxu1 }
 0x31c   : > { %v2150_v47 = vadd.f32 %v2149_v38, %v8360_v51  ;;  %2418 = vmax.xlane.f32.xlu1 %v2275_v62 }
 0x31d   : > { %v8391_v3 = vpop.f32.mrf.mxu1 }
 0x31e   : > { %v2277_v31 = vmax.f32 %v2150_v47, 0.0 }
 0x31f   : > { %v2153_v8 = vpop.f32.mrf.mxu1 }
 0x320   : > { %v2154_v2 = vadd.f32 %v2153_v8, %v8366_v33  ;;  %2420 = vmax.xlane.f32.xlu0 %v2277_v31 }
 0x321   : > { %v8394_v32 = vpop.f32.mrf.mxu1 }
 0x322   : > { %v2279_v50 = vmax.f32 %v2154_v2, 0.0 }
 0x323   : > { %v2159_v9 = vpop.f32.mrf.mxu1 }
 0x324   : > { %v2160_v11 = vadd.f32 %v2159_v9, %v8340_v10  ;;  %2422 = vmax.xlane.f32.xlu1 %v2279_v50 }
 0x325   : > { %v8397_v1 = vpop.f32.mrf.mxu1 }
 0x326   : > { %v2281_v12 = vmax.f32 %v2160_v11, 0.0 }
 0x327   : > { %v2163_v13 = vpop.f32.mrf.mxu1 }
 0x328   : > { %v2164_v61 = vadd.f32 %v2163_v13, %v8346_v24  ;;  %2424 = vmax.xlane.f32.xlu0 %v2281_v12 }
 0x329   : > { %v8400_v30 = vpop.f32.mrf.mxu1 }
 0x32a   : > { %v2283_v0 = vmax.f32 %v2164_v61, 0.0 }
 0x32b   : > { %v2169_v42 = vpop.f32.mrf.mxu1 }
 0x32c   : > { %v2170_v55 = vadd.f32 %v2169_v42, %v8322_v18  ;;  %2426 = vmax.xlane.f32.xlu1 %v2283_v0 }
 0x32d   : > { %v8403_v7 = vpop.f32.mrf.mxu1 }
 0x32e   : > { %v2285_v60 = vmax.f32 %v2170_v55, 0.0 }
 0x32f   : > { %v2173_v62 = vpop.f32.mrf.mxu1 }
 0x330   : > { %v2174_v38 = vadd.f32 %v2173_v62, %v8326_v28  ;;  %2428 = vmax.xlane.f32.xlu0 %v2285_v60 }
 0x331   : > { %v8406_v47 = vpop.f32.mrf.mxu1 }
 0x332   : > { %10185 = vst [vmem:[#allocation38_spill] sm:$0xff] %v8406_v47  ;;  %v2287_v31 = vmax.f32 %v2174_v38, 0.0 }
 0x333   : > { %v8408_v8 = vpop.f32.mrf.mxu1 }
 0x334   : > { %2430 = vmax.xlane.f32.xlu1 %v2287_v31 }
 0x335   : > { %v8410_v2 = vpop.f32.mrf.mxu1 }
 0x336   : > { %10186 = vst [vmem:[#allocation39_spill] sm:$0xff] %v8410_v2 }
 0x337   : > { %v8412_v50 = vpop.f32.mrf.mxu1 }
 0x339   : > { %v8414_v9 = vpop.f32.mrf.mxu1 }
 0x33a   : > { %10187 = vst [vmem:[#allocation40_spill] sm:$0xff] %v8414_v9  ;;  %v8443_v9 = vpop.permute.xlu0 %1924 }
 0x33b   : > { %v8416_v11 = vpop.f32.mrf.mxu1  ;;  %10193 = vst [vmem:[#allocation46_spill] sm:$0xff] %v8443_v9 }
 0x33d   : > { %v8418_v12 = vpop.f32.mrf.mxu1 }
 0x33e   : > { %10188 = vst [vmem:[#allocation41_spill] sm:$0xff] %v8418_v12 }
 0x33f   : > { %v8420_v13 = vpop.f32.mrf.mxu1 }
 0x341   : > { %v8422_v61 = vpop.f32.mrf.mxu1 }
 0x342   : > { %10189 = vst [vmem:[#allocation42_spill] sm:$0xff] %v8422_v61 }
 0x343   : > { %v8424_v0 = vpop.f32.mrf.mxu1 }
 0x345   : > { %v8426_v42 = vpop.f32.mrf.mxu1 }
 0x346   : > { %10190 = vst [vmem:[#allocation43_spill] sm:$0xff] %v8426_v42 }
 0x347   : > { %v2203_v55 = vpop.f32.mrf.mxu1 }
 0x349   : > { %v8428_v60 = vpop.f32.mrf.mxu1 }
 0x34a   : > { %10191 = vst [vmem:[#allocation44_spill] sm:$0xff] %v8428_v60 }
 0x34b   : > { %v2209_v62 = vpop.f32.mrf.mxu1 }
 0x34d   : > { %v8430_v38 = vpop.f32.mrf.mxu1 }
 0x34e   : > { %10192 = vst [vmem:[#allocation45_spill] sm:$0xff] %v8430_v38 }
 0x34f   : > { %v2213_v31 = vpop.f32.mrf.mxu1 }
 0x350   : > { %v2214_v45 = vadd.f32 %v2213_v31, %v8443_v9 }
 0x351   : > { %v8432_v26 = vpop.f32.mrf.mxu1 }
 0x352   : > { %v2303_v46 = vmax.f32 %v2214_v45, 0.0 }
 0x353   : > { %v2219_v15 = vpop.f32.mrf.mxu1 }
 0x354   : > { %v2220_v17 = vadd.f32 %v2219_v15, %v8370_v40 }
 0x355   : > { %v8435_v25 = vpop.f32.mrf.mxu1 }
 0x356   : > { %v2305_v16 = vmax.f32 %v2220_v17, 0.0 }
 0x357   : > { %v2223_v14 = vpop.f32.mrf.mxu1 }
 0x358   : > { %v2224_v63 = vadd.f32 %v2223_v14, %v8376_v37  ;;  %2448 = vmax.xlane.f32.xlu0 %v2305_v16  ;;  %v8448_v16 = vpop.permute.xlu1 %1919 }
 0x359   : > { %v8438_v27 = vpop.f32.mrf.mxu1  ;;  %v2210_v38 = vadd.f32 %v2209_v62, %v8448_v16 }
 0x35a   : > { %v2307_v59 = vmax.f32 %v2224_v63, 0.0 }
 0x35b   : > { %v2229_v47 = vpop.f32.mrf.mxu1 }
 0x35c   : > { %v2230_v20 = vadd.f32 %v2229_v47, %v8350_v49  ;;  %2450 = vmax.xlane.f32.xlu1 %v2307_v59  ;;  %v8451_v47 = vpop.permute.xlu0 %1844 }
 0x35d   : > { %v8441_v2 = vpop.f32.mrf.mxu1 }
 0x35e   : > { %v2309_v48 = vmax.f32 %v2230_v20, 0.0 }
 0x35f   : > { %v2233_v15 = vpop.f32.mrf.mxu1 }
 0x360   : > { %v2234_v53 = vadd.f32 %v2233_v15, %v8356_v19  ;;  %2452 = vmax.xlane.f32.xlu0 %v2309_v48  ;;  %v8456_v15 = vpop.permute.xlu1 %1839  ;;  %v8460_v4 = vpop.permute.xlu0 %1914 }
 0x361   : > { %v8446_v17 = vpop.f32.mrf.mxu1  ;;  %v2130_v31 = vadd.f32 %v8368_v41, %v8456_v15 }
 0x362   : > { %v2311_v14 = vmax.f32 %v2234_v53, 0.0 }
 0x363   : > { %v2239_v12 = vpop.f32.mrf.mxu1  ;;  %v2269_v45 = vmax.f32 %v2130_v31, 0.0 }
 0x364   : > { %v2240_v63 = vadd.f32 %v2239_v12, %v8330_v6  ;;  %2454 = vmax.xlane.f32.xlu1 %v2311_v14 }
 0x365   : > { %v8453_v59 = vpop.f32.mrf.mxu1 }
 0x366   : > { %v2313_v20 = vmax.f32 %v2240_v63, 0.0  ;;  %v8464_v63 = vpop.permute.xlu1 %1909 }
 0x367   : > { %v2243_v36 = vpop.f32.mrf.mxu1 }
 0x368   : > { %v2244_v61 = vadd.f32 %v2243_v36, %v8336_v22  ;;  %2456 = vmax.xlane.f32.xlu0 %v2313_v20  ;;  %v8467_v20 = vpop.permute.xlu0 %1834 }
 0x369   : > { %v8458_v48 = vpop.f32.mrf.mxu1 }
 0x36a   : > { %v2315_v53 = vmax.f32 %v2244_v61, 0.0  ;;  %v2134_v61 = vadd.f32 %v8374_v39, %v8451_v47  ;;  %v2124_v39 = vadd.f32 %v8362_v52, %v8467_v20 }
 0x36b   : > { %v2249_v42 = vpop.f32.mrf.mxu1 }
 0x36c   : > { %v2250_v12 = vadd.f32 %v2249_v42, %v8318_v54  ;;  %2458 = vmax.xlane.f32.xlu1 %v2315_v53  ;;  %v8472_v53 = vpop.permute.xlu1 %1829  ;;  %v8477_v9 = vpop.permute.xlu0 %1904 }
 0x36d   : > { %v2251_v14 = vpop.f32.mrf.mxu1 }
 0x36e   : > { %v2317_v60 = vmax.f32 %v2250_v12, 0.0  ;;  %v2271_v12 = vmax.f32 %v2134_v61, 0.0  ;;  %v2194_v61 = vadd.f32 %v8420_v13, %v8477_v9 }
 0x36f   : > { %v2253_v34 = vpop.f32.mrf.mxu1 }
 0x370   : > { %v2254_v36 = vadd.f32 %v2253_v34, %v8320_v5  ;;  %2460 = vmax.xlane.f32.xlu1 %v2317_v60  ;;  %v2204_v34 = vadd.f32 %v2203_v55, %v8460_v4  ;;  %v2301_v60 = vmax.f32 %v2210_v38, 0.0  ;;  %v8485_v41 = vpop.permute.xlu0 %1824  ;;  %v2120_v55 = vadd.f32 %v8354_v56, %v8472_v53 }
 0x371   : > { %v2267_v38 = vmax.f32 %v2124_v39, 0.0 }
 0x372   : > { %v2319_v42 = vmax.f32 %v2254_v36, 0.0  ;;  %v2299_v62 = vmax.f32 %v2204_v34, 0.0  ;;  %v8483_v36 = vpop.permute.xlu1 %1899  ;;  %v2265_v31 = vmax.f32 %v2120_v55, 0.0  ;;  %v2295_v34 = vmax.f32 %v2194_v61, 0.0 }
 0x374   : > { %2446 = vmax.xlane.f32.xlu1 %v2303_v46  ;;  %2462 = vmax.xlane.f32.xlu0 %v2319_v42  ;;  %v2200_v46 = vadd.f32 %v8424_v0, %v8464_v63  ;;  %v2114_v0 = vadd.f32 %v8348_v44, %v8485_v41 }
 0x376   : > { %v2297_v42 = vmax.f32 %v2200_v46, 0.0  ;;  %v8491_v52 = vpop.permute.xlu1 %1819  ;;  %v2263_v13 = vmax.f32 %v2114_v0, 0.0  ;;  %v2252_v0 = vadd.f32 %v2251_v14, %v8320_v5  ;;  %v7607_v14 = vld [vmem:[%s7888_s14 + $0x4] ss:$8 sps:$4 sm:$0xff]  }
 0x377   : > { %v2110_v56 = vadd.f32 %v8342_v23, %v8491_v52  ;;  %2624 = vmatprep.mubr.bf16.mxu0 %v7607_v14 }
 0x378   : > { %2444 = vmax.xlane.f32.xlu0 %v2301_v60  ;;  %2414 = vmax.xlane.f32.xlu1 %v2271_v12  ;;  %v2190_v12 = vadd.f32 %v8416_v11, %v8483_v36  ;;  %v8497_v60 = vpop.permute.xlu0 %1894 }
 0x379   : > { %v2184_v39 = vadd.f32 %v8412_v50, %v8497_v60 }
 0x37a   : > { %v8503_v46 = vpop.permute.xlu1 %1889 }
 0x37b   : > { %v2180_v55 = vadd.f32 %v8408_v8, %v8503_v46  ;;  %v2248_v8 = vadd.f32 %v8458_v48, %v8318_v54  ;;  %v2238_v54 = vadd.f32 %v8446_v17, %v8330_v6  ;;  %v2228_v6 = vadd.f32 %v8438_v27, %v8350_v49 }
 0x37c   : > { %2442 = vmax.xlane.f32.xlu1 %v2299_v62  ;;  %2412 = vmax.xlane.f32.xlu0 %v2269_v45  ;;  %v2293_v45 = vmax.f32 %v2190_v12, 0.0  ;;  %v8505_v44 = vpop.permute.xlu0 %1814  ;;  %v2261_v62 = vmax.f32 %v2110_v56, 0.0  ;;  %v2318_v12 = vmax.f32 %v2252_v0, 0.0  ;;  %v2242_v56 = vadd.f32 %v8453_v59, %v8336_v22  ;;  %v10201_v0 = vld [vmem:[#allocation34_spill] sm:$0xff] }
 0x37d   : > { %v2104_v11 = vadd.f32 %v8334_v21, %v8505_v44  ;;  %v2172_v21 = vadd.f32 %v8403_v7, %v8326_v28  ;;  %v2316_v5 = vmax.f32 %v2248_v8, 0.0  ;;  %v2162_v28 = vadd.f32 %v8397_v1, %v8346_v24 }
 0x37e   : > { %v8511_v23 = vpop.permute.xlu1 %1809  ;;  %v2314_v48 = vmax.f32 %v2242_v56, 0.0  ;;  %v2232_v22 = vadd.f32 %v8441_v2, %v8356_v19  ;;  %v2312_v59 = vmax.f32 %v2238_v54, 0.0  ;;  %v2152_v24 = vadd.f32 %v8391_v3, %v8366_v33 }
 0x37f   : > { %v2100_v50 = vadd.f32 %v8328_v58, %v8511_v23  ;;  %v2259_v61 = vmax.f32 %v2104_v11, 0.0  ;;  %v2286_v58 = vmax.f32 %v2172_v21, 0.0  ;;  %v2222_v19 = vadd.f32 %v8435_v25, %v8376_v37  ;;  %v10197_v11 = vld [vmem:[#allocation36_spill] sm:$0xff]  ;;  %v10202_v21 = vld [vmem:[#allocation42_spill] sm:$0xff] }
 0x380   : > { %2440 = vmax.xlane.f32.xlu0 %v2297_v42  ;;  %2410 = vmax.xlane.f32.xlu1 %v2267_v38  ;;  %v2291_v38 = vmax.f32 %v2184_v39, 0.0  ;;  %v2289_v42 = vmax.f32 %v2180_v55, 0.0  ;;  %v2310_v17 = vmax.f32 %v2232_v22, 0.0  ;;  %v2308_v2 = vmax.f32 %v2228_v6, 0.0  ;;  %v10195_v39 = vld [vmem:[#allocation46_spill] sm:$0xff]  ;;  %v10199_v55 = vld [vmem:[#allocation35_spill] sm:$0xff] }
 0x381   : > { %v2142_v33 = vadd.f32 %v8383_v43, %v8385_v35  ;;  %v2218_v27 = vadd.f32 %v8432_v26, %v8370_v40  ;;  %v2306_v49 = vmax.f32 %v2222_v19, 0.0  ;;  %v2132_v43 = vadd.f32 %v10197_v11, %v8451_v47  ;;  %v10211_v6 = vld [vmem:[#allocation29_spill] sm:$0xff] }
 0x382   : > { %v2122_v47 = vadd.f32 %v10201_v0, %v8467_v20 }
 0x383   : > { %v2304_v37 = vmax.f32 %v2218_v27, 0.0 }
 0x384   : > { %2438 = vmax.xlane.f32.xlu1 %v2295_v34  ;;  %2408 = vmax.xlane.f32.xlu0 %v2265_v31  ;;  %v2257_v31 = vmax.f32 %v2100_v50, 0.0  ;;  %v2168_v34 = vadd.f32 %v8400_v30, %v8322_v18  ;;  %v2158_v18 = vadd.f32 %v8394_v32, %v8340_v10  ;;  %v2282_v30 = vmax.f32 %v2162_v28, 0.0  ;;  %v10200_v50 = vld [vmem:[#allocation43_spill] sm:$0xff] }
 0x385   : > { %v2148_v10 = vadd.f32 %v8388_v29, %v8360_v51  ;;  %v2278_v32 = vmax.f32 %v2152_v24, 0.0  ;;  %v2274_v29 = vmax.f32 %v2142_v33, 0.0  ;;  %v10210_v24 = vld [vmem:[#allocation38_spill] sm:$0xff] }
 0x386   : > { %v2284_v7 = vmax.f32 %v2168_v34, 0.0  ;;  %v2280_v1 = vmax.f32 %v2158_v18, 0.0  ;;  %v2266_v34 = vmax.f32 %v2122_v47, 0.0 }
 0x387   : > { %v2276_v3 = vmax.f32 %v2148_v10, 0.0 }
 0x388   : > { %2436 = vmax.xlane.f32.xlu0 %v2293_v45  ;;  %2406 = vmax.xlane.f32.xlu1 %v2263_v13  ;;  %v10194_v13 = vld [vmem:[#allocation37_spill] sm:$0xff] }
 0x389   : > { %v2138_v51 = vadd.f32 %v10194_v13, %v8380_v57  ;;  %v10196_v45 = vld [vmem:[#allocation45_spill] sm:$0xff]  ;;  %v2128_v57 = vadd.f32 %v10199_v55, %v8456_v15 }
 0x38a   : > { %v2212_v25 = vadd.f32 %v10196_v45, %v10195_v39 }
 0x38b   : > { %v2272_v35 = vmax.f32 %v2138_v51, 0.0 }
 0x38c   : > { %2434 = vmax.xlane.f32.xlu1 %v2291_v38  ;;  %2404 = vmax.xlane.f32.xlu0 %v2261_v62  ;;  %v10198_v62 = vld [vmem:[#allocation44_spill] sm:$0xff]  ;;  %v2302_v40 = vmax.f32 %v2212_v25, 0.0  ;;  %v2270_v38 = vmax.f32 %v2132_v43, 0.0 }
 0x38d   : > { %v2208_v26 = vadd.f32 %v10198_v62, %v8448_v16  ;;  %v2198_v16 = vadd.f32 %v10202_v21, %v8464_v63 }
 0x38f   : > { %v2296_v56 = vmax.f32 %v2198_v16, 0.0 }
 0x390   : > { %2432 = vmax.xlane.f32.xlu0 %v2289_v42  ;;  %2402 = vmax.xlane.f32.xlu1 %v2259_v61  ;;  %v2202_v61 = vadd.f32 %v10200_v50, %v8460_v4  ;;  %v2300_v42 = vmax.f32 %v2208_v26, 0.0 }
 0x392   : > { %v2298_v8 = vmax.f32 %v2202_v61, 0.0 }
 0x394   : > { %2382 = vmax.xlane.f32.xlu1 %v2318_v12  ;;  %2400 = vmax.xlane.f32.xlu0 %v2257_v31  ;;  %v2268_v31 = vmax.f32 %v2128_v57, 0.0  ;;  %v10203_v12 = vld [vmem:[#allocation33_spill] sm:$0xff] }
 0x395   : > { %v2118_v15 = vadd.f32 %v10203_v12, %v8472_v53 }
 0x397   : > { %v2264_v28 = vmax.f32 %v2118_v15, 0.0 }
 0x398   : > { %2350 = vmax.xlane.f32.xlu1 %v2286_v58  ;;  %2380 = vmax.xlane.f32.xlu0 %v2316_v5  ;;  %v10204_v58 = vld [vmem:[#allocation41_spill] sm:$0xff]  ;;  %v10205_v5 = vld [vmem:[#allocation32_spill] sm:$0xff] }
 0x399   : > { %v2192_v4 = vadd.f32 %v10204_v58, %v8477_v9  ;;  %v2112_v20 = vadd.f32 %v10205_v5, %v8485_v41 }
 0x39b   : > { %v2294_v54 = vmax.f32 %v2192_v4, 0.0  ;;  %v2262_v18 = vmax.f32 %v2112_v20, 0.0 }
 0x39c   : > { %2378 = vmax.xlane.f32.xlu1 %v2314_v48  ;;  %2348 = vmax.xlane.f32.xlu0 %v2284_v7  ;;  %v10206_v7 = vld [vmem:[#allocation40_spill] sm:$0xff]  ;;  %v10207_v48 = vld [vmem:[#allocation31_spill] sm:$0xff] }
 0x39d   : > { %v2188_v63 = vadd.f32 %v10206_v7, %v8483_v36  ;;  %v2108_v53 = vadd.f32 %v10207_v48, %v8491_v52  ;;  %v2178_v36 = vadd.f32 %v10210_v24, %v8503_v46  ;;  %v2098_v52 = vadd.f32 %v10211_v6, %v8511_v23 }
 0x39f   : > { %v2292_v22 = vmax.f32 %v2188_v63, 0.0  ;;  %v2260_v14 = vmax.f32 %v2108_v53, 0.0  ;;  %v2288_v10 = vmax.f32 %v2178_v36, 0.0  ;;  %v7610_v36 = vld [vmem:[%s7888_s14 + $0x10] ss:$8 sps:$4 sm:$0xff]  }
 0x3a0   : > { %2346 = vmax.xlane.f32.xlu1 %v2282_v30  ;;  %2376 = vmax.xlane.f32.xlu0 %v2312_v59  ;;  %v10208_v30 = vld [vmem:[#allocation39_spill] sm:$0xff]  ;;  %v10209_v59 = vld [vmem:[#allocation30_spill] sm:$0xff] }
 0x3a1   : > { %v2182_v9 = vadd.f32 %v10208_v30, %v8497_v60  ;;  %v2102_v41 = vadd.f32 %v10209_v59, %v8505_v44  ;;  %v2256_v60 = vmax.f32 %v2098_v52, 0.0  ;;  %v2417_v19 = vpop.xlane.xlu0 %2416  ;;  %v7608_v30 = vld [vmem:[%s7888_s14 + $0x14] ss:$8 sps:$4 sm:$0xff]  }
 0x3a4   : > { %2374 = vmax.xlane.f32.xlu1 %v2310_v17  ;;  %2344 = vmax.xlane.f32.xlu0 %v2280_v1  ;;  %v2290_v1 = vmax.f32 %v2182_v9, 0.0  ;;  %v2258_v17 = vmax.f32 %v2102_v41, 0.0 }
 0x3a8   : > { %2342 = vmax.xlane.f32.xlu1 %v2278_v32  ;;  %2372 = vmax.xlane.f32.xlu0 %v2308_v2  ;;  %v2419_v32 = vpop.xlane.xlu1 %2418 }
 0x3a9   : > { %v2421_v44 = vpop.xlane.xlu0 %2420  ;;  %v2468_v47 = vpack.c.bf16 %v2419_v32, %v2417_v19  ;;  %v7613_v19 = vld [vmem:[%s7888_s14 + $0x20] ss:$8 sps:$4 sm:$0xff]  }
 0x3ac   : > { %2370 = vmax.xlane.f32.xlu1 %v2306_v49  ;;  %2340 = vmax.xlane.f32.xlu0 %v2276_v3 }
 0x3ad   : > { %v2423_v2 = vpop.xlane.xlu1 %2422 }
 0x3ae   : > { %v2469_v50 = vpack.c.bf16 %v2423_v2, %v2421_v44  ;;  %v7614_v2 = vld [vmem:[%s7888_s14 + $0x34] ss:$8 sps:$4 sm:$0xff]  }
 0x3b0   : > { %2338 = vmax.xlane.f32.xlu1 %v2274_v29  ;;  %2368 = vmax.xlane.f32.xlu0 %v2304_v37 }
 0x3b1   : > { %v2425_v3 = vpop.xlane.xlu0 %2424 }
 0x3b4   : > { %2366 = vmax.xlane.f32.xlu1 %v2302_v40  ;;  %2336 = vmax.xlane.f32.xlu0 %v2272_v35 }
 0x3b5   : > { %v2427_v33 = vpop.xlane.xlu1 %2426 }
 0x3b6   : > { %v2470_v40 = vpack.c.bf16 %v2427_v33, %v2425_v3 }
 0x3b8   : > { %2334 = vmax.xlane.f32.xlu1 %v2270_v38  ;;  %2364 = vmax.xlane.f32.xlu0 %v2300_v42 }
 0x3b9   : > { %v2429_v46 = vpop.xlane.xlu0 %2428 }
 0x3bc   : > { %2362 = vmax.xlane.f32.xlu1 %v2298_v8  ;;  %2332 = vmax.xlane.f32.xlu0 %v2268_v31 }
 0x3bd   : > { %v2431_v27 = vpop.xlane.xlu1 %2430 }
 0x3be   : > { %v2471_v43 = vpack.c.bf16 %v2431_v27, %v2429_v46 }
 0x3c0   : > { %2330 = vmax.xlane.f32.xlu1 %v2266_v34  ;;  %2360 = vmax.xlane.f32.xlu0 %v2296_v56 }
 0x3c4   : > { %2358 = vmax.xlane.f32.xlu1 %v2294_v54  ;;  %2328 = vmax.xlane.f32.xlu0 %v2264_v28 }
 0x3c8   : > { %2326 = vmax.xlane.f32.xlu1 %v2262_v18  ;;  %2356 = vmax.xlane.f32.xlu0 %v2292_v22  ;;  %v7605_v18 = vld [vmem:[%s7888_s14] ss:$8 sps:$4 sm:$0xff]  }
 0x3cc   : > { %2354 = vmax.xlane.f32.xlu1 %v2290_v1  ;;  %2324 = vmax.xlane.f32.xlu0 %v2260_v14  ;;  %v7611_v1 = vld [vmem:[%s7888_s14 + $0x24] ss:$8 sps:$4 sm:$0xff]  }
 0x3d0   : > { %2322 = vmax.xlane.f32.xlu1 %v2258_v17  ;;  %2352 = vmax.xlane.f32.xlu0 %v2288_v10 }
 0x3d4   : > { %2320 = vmax.xlane.f32.xlu0 %v2256_v60 }
 0x3e1   : > { %v2449_v13 = vpop.xlane.xlu0 %2448 }
 0x3e5   : > { %v2451_v49 = vpop.xlane.xlu1 %2450 }
 0x3e6   : > { %v2476_v61 = vpack.c.bf16 %v2451_v49, %v2449_v13  ;;  %v7616_v13 = vld [vmem:[%s7888_s14 + $0x30] ss:$8 sps:$4 sm:$0xff]  }
 0x3e9   : > { %v2453_v29 = vpop.xlane.xlu0 %2452 }
 0x3ed   : > { %v2455_v51 = vpop.xlane.xlu1 %2454 }
 0x3ee   : > { %v2477_v55 = vpack.c.bf16 %v2455_v51, %v2453_v29  ;;  %v7617_v51 = vld [vmem:[%s7888_s14 + $0x44] ss:$8 sps:$4 sm:$0xff]  }
 0x3f1   : > { %v2457_v23 = vpop.xlane.xlu0 %2456 }
 0x3f5   : > { %v2459_v39 = vpop.xlane.xlu1 %2458 }
 0x3f6   : > { %v2478_v35 = vpack.c.bf16 %v2459_v39, %v2457_v23 }
 0x3f9   : > { %v2461_v45 = vpop.xlane.xlu1 %2460 }
 0x3fd   : > { %v2447_v25 = vpop.xlane.xlu1 %2446  ;;  %v2463_v37 = vpop.xlane.xlu0 %2462 }
 0x3fe   : > { %v2479_v11 = vpack.c.bf16 %v2463_v37, %v2461_v45 }
 0x400   : > { %6926 = vmatprep.subr.bf16.mxu0 %v2479_v11  ;;  %v7619_v11 = vld [vmem:[%s7888_s14 + $0x40] ss:$8 sps:$4 sm:$0xff]  }
 0x401   : > { %6927 = vmatpush3.bf16.msra.mxu0 %v2471_v43  ;;  %v2445_v62 = vpop.xlane.xlu0 %2444  ;;  %v2415_v26 = vpop.xlane.xlu1 %2414  ;;  %v7620_v43 = vld [vmem:[%s7888_s14 + $0x54] ss:$8 sps:$4 sm:$0xff]  }
 0x402   : > { %6928 = vmatprep.subr.bf16.mxu0 %v2478_v35  ;;  %v2475_v31 = vpack.c.bf16 %v2447_v25, %v2445_v62 }
 0x405   : > { %6929 = vmatpush3.bf16.msra.mxu0 %v2470_v40  ;;  %v2443_v57 = vpop.xlane.xlu1 %2442  ;;  %v2413_v38 = vpop.xlane.xlu0 %2412 }
 0x406   : > { %6930 = vmatprep.subr.bf16.mxu0 %v2477_v55  ;;  %v2467_v8 = vpack.c.bf16 %v2415_v26, %v2413_v38  ;;  %v7622_v38 = vld [vmem:[%s7888_s14 + $0x50] ss:$8 sps:$4 sm:$0xff]  }
 0x409   : > { %6931 = vmatpush3.bf16.msra.mxu0 %v2469_v50  ;;  %v2441_v42 = vpop.xlane.xlu0 %2440  ;;  %v2411_v0 = vpop.xlane.xlu1 %2410  ;;  %v7623_v50 = vld [vmem:[%s7888_s14 + $0x64] ss:$8 sps:$4 sm:$0xff]  }
 0x40a   : > { %6932 = vmatprep.subr.bf16.mxu0 %v2476_v61  ;;  %v2474_v12 = vpack.c.bf16 %v2443_v57, %v2441_v42 }
 0x40d   : > { %6933 = vmatpush3.bf16.msra.mxu0 %v2468_v47  ;;  %v2439_v21 = vpop.xlane.xlu1 %2438  ;;  %v2409_v16 = vpop.xlane.xlu0 %2408 }
 0x40e   : > { %6934 = vmatprep.subr.bf16.mxu0 %v2475_v31  ;;  %v2466_v58 = vpack.c.bf16 %v2411_v0, %v2409_v16  ;;  %v7625_v16 = vld [vmem:[%s7888_s14 + $0x60] ss:$8 sps:$4 sm:$0xff]  }
 0x411   : > { %6935 = vmatpush3.bf16.msra.mxu0 %v2467_v8  ;;  %v2437_v15 = vpop.xlane.xlu0 %2436  ;;  %v2407_v34 = vpop.xlane.xlu1 %2406  ;;  %v7626_v8 = vld [vmem:[%s7888_s14 + $0x74] ss:$8 sps:$4 sm:$0xff]  }
 0x412   : > { %6936 = vmatprep.subr.bf16.mxu0 %v2474_v12  ;;  %v2473_v4 = vpack.c.bf16 %v2439_v21, %v2437_v15 }
 0x415   : > { %6937 = vmatpush3.bf16.msra.mxu0 %v2466_v58  ;;  %v2435_v56 = vpop.xlane.xlu1 %2434  ;;  %v2405_v5 = vpop.xlane.xlu0 %2404 }
 0x416   : > { %v2465_v20 = vpack.c.bf16 %v2407_v34, %v2405_v5  ;;  %6938 = vmatprep.subr.bf16.mxu0 %v2473_v4  ;;  %v7628_v5 = vld [vmem:[%s7888_s14 + $0x70] ss:$8 sps:$4 sm:$0xff]  }
 0x419   : > { %6939 = vmatpush3.bf16.msra.mxu0 %v2465_v20  ;;  %v2433_v28 = vpop.xlane.xlu0 %2432  ;;  %v2403_v7 = vpop.xlane.xlu1 %2402  ;;  %v7631_v20 = vld [vmem:[%s7883_s8 + $0x4] ss:$8 sps:$4 sm:$0xff]  }
 0x41a   : > { %v2472_v63 = vpack.c.bf16 %v2435_v56, %v2433_v28 }
 0x41c   : > { %6940 = vmatprep.subr.bf16.mxu0 %v2472_v63 }
 0x41d   : > { %v2383_v54 = vpop.xlane.xlu1 %2382  ;;  %v2401_v48 = vpop.xlane.xlu0 %2400 }
 0x41e   : > { %v2464_v53 = vpack.c.bf16 %v2403_v7, %v2401_v48 }
 0x420   : > { %6941 = vmatpush3.bf16.msra.mxu0 %v2464_v53  ;;  %v7629_v53 = vld [vmem:[%s7883_s8] ss:$8 sps:$4 sm:$0xff]  }
 0x421   : > { %v2351_v9 = vpop.xlane.xlu1 %2350  ;;  %v2381_v22 = vpop.xlane.xlu0 %2380 }
 0x422   : > { %v2399_v59 = vpack.c.bf16 %v2383_v54, %v2381_v22  ;;  %v7637_v22 = vld [vmem:[%s7883_s8 + $0x20] ss:$8 sps:$4 sm:$0xff]  }
 0x423   : > { %2625 = vmatmul.mubr.bf16.vlgmr.msra.gmra.mxu0 %v7605_v18  ;;  %v7632_v18 = vld [vmem:[%s7883_s8 + $0x14] ss:$8 sps:$4 sm:$0xff]  }
 0x424   : > { %6990 = vmatprep.subr.bf16.mxu0 %v2399_v59  ;;  %2632 = vmatprep.mubr.bf16.mxu0 %v7608_v30  ;;  %v7634_v30 = vld [vmem:[%s7883_s8 + $0x10] ss:$8 sps:$4 sm:$0xff]   ;;  %v7638_v59 = vld [vmem:[%s7883_s8 + $0x34] ss:$8 sps:$4 sm:$0xff]  }
 0x425   : > { %v2379_v41 = vpop.xlane.xlu1 %2378  ;;  %v2349_v14 = vpop.xlane.xlu0 %2348 }
 0x426   : > { %v2391_v24 = vpack.c.bf16 %v2351_v9, %v2349_v14  ;;  %v7635_v9 = vld [vmem:[%s7883_s8 + $0x24] ss:$8 sps:$4 sm:$0xff]  }
 0x427   : > { %v7641_v14 = vld [vmem:[%s7883_s8 + $0x44] ss:$8 sps:$4 sm:$0xff]  }
 0x428   : > { %6991 = vmatpush3.bf16.msra.mxu0 %v2391_v24  ;;  %v7643_v24 = vld [vmem:[%s7883_s8 + $0x40] ss:$8 sps:$4 sm:$0xff]  }
 0x429   : > { %v2347_v6 = vpop.xlane.xlu1 %2346  ;;  %v2377_v52 = vpop.xlane.xlu0 %2376 }
 0x42a   : > { %v2398_v17 = vpack.c.bf16 %v2379_v41, %v2377_v52  ;;  %v7640_v41 = vld [vmem:[%s7883_s8 + $0x30] ss:$8 sps:$4 sm:$0xff]   ;;  %v7649_v52 = vld [vmem:[%s7883_s8 + $0x60] ss:$8 sps:$4 sm:$0xff]  }
 0x42b   : > { %2633 = vmatmul.mubr.bf16.gmra.mxu0 %v7610_v36  ;;  %v7644_v36 = vld [vmem:[%s7883_s8 + $0x54] ss:$8 sps:$4 sm:$0xff]  }
 0x42c   : > { %6992 = vmatprep.subr.bf16.mxu0 %v2398_v17  ;;  %2640 = vmatprep.mubr.bf16.mxu0 %v7611_v1  ;;  %v7646_v1 = vld [vmem:[%s7883_s8 + $0x50] ss:$8 sps:$4 sm:$0xff]   ;;  %v7650_v17 = vld [vmem:[%s7883_s8 + $0x74] ss:$8 sps:$4 sm:$0xff]  }
 0x42d   : > { %v2375_v10 = vpop.xlane.xlu1 %2374  ;;  %v2345_v60 = vpop.xlane.xlu0 %2344 }
 0x42e   : > { %v2390_v32 = vpack.c.bf16 %v2347_v6, %v2345_v60  ;;  %v7647_v6 = vld [vmem:[%s7883_s8 + $0x64] ss:$8 sps:$4 sm:$0xff]   ;;  %v10212_v60 = vmov 0  }
 0x430   : > { %6993 = vmatpush3.bf16.msra.mxu0 %v2390_v32 }
 0x431   : > { %v2343_v44 = vpop.xlane.xlu1 %2342  ;;  %v2373_v33 = vpop.xlane.xlu0 %2372 }
 0x432   : > { %v2397_v3 = vpack.c.bf16 %v2375_v10, %v2373_v33  ;;  %v7652_v10 = vld [vmem:[%s7883_s8 + $0x70] ss:$8 sps:$4 sm:$0xff]  }
 0x433   : > { %2641 = vmatmul.mubr.bf16.gmra.mxu0 %v7613_v19 }
 0x434   : > { %6994 = vmatprep.subr.bf16.mxu0 %v2397_v3  ;;  %2648 = vmatprep.mubr.bf16.mxu0 %v7614_v2 }
 0x435   : > { %v2371_v27 = vpop.xlane.xlu1 %2370  ;;  %v2341_v46 = vpop.xlane.xlu0 %2340 }
 0x436   : > { %v2389_v49 = vpack.c.bf16 %v2343_v44, %v2341_v46 }
 0x438   : > { %6995 = vmatpush3.bf16.msra.mxu0 %v2389_v49 }
 0x439   : > { %v2339_v29 = vpop.xlane.xlu1 %2338  ;;  %v2369_v39 = vpop.xlane.xlu0 %2368 }
 0x43a   : > { %v2396_v23 = vpack.c.bf16 %v2371_v27, %v2369_v39 }
 0x43b   : > { %2649 = vmatmul.mubr.bf16.gmra.mxu0 %v7616_v13 }
 0x43c   : > { %6996 = vmatprep.subr.bf16.mxu0 %v2396_v23  ;;  %2656 = vmatprep.mubr.bf16.mxu0 %v7617_v51 }
 0x43d   : > { %v2367_v45 = vpop.xlane.xlu1 %2366  ;;  %v2337_v25 = vpop.xlane.xlu0 %2336 }
 0x43e   : > { %v2388_v37 = vpack.c.bf16 %v2339_v29, %v2337_v25 }
 0x440   : > { %6997 = vmatpush3.bf16.msra.mxu0 %v2388_v37 }
 0x441   : > { %v2335_v35 = vpop.xlane.xlu1 %2334  ;;  %v2365_v62 = vpop.xlane.xlu0 %2364 }
 0x442   : > { %v2395_v26 = vpack.c.bf16 %v2367_v45, %v2365_v62 }
 0x443   : > { %2657 = vmatmul.mubr.bf16.gmra.mxu0 %v7619_v11 }
 0x444   : > { %6998 = vmatprep.subr.bf16.mxu0 %v2395_v26  ;;  %2664 = vmatprep.mubr.bf16.mxu0 %v7620_v43 }
 0x445   : > { %v2363_v40 = vpop.xlane.xlu1 %2362  ;;  %v2333_v55 = vpop.xlane.xlu0 %2332 }
 0x446   : > { %v2387_v57 = vpack.c.bf16 %v2335_v35, %v2333_v55 }
 0x448   : > { %6999 = vmatpush3.bf16.msra.mxu0 %v2387_v57 }
 0x449   : > { %v2331_v61 = vpop.xlane.xlu1 %2330  ;;  %v2361_v42 = vpop.xlane.xlu0 %2360 }
 0x44a   : > { %v2394_v0 = vpack.c.bf16 %v2363_v40, %v2361_v42 }
 0x44b   : > { %2665 = vmatmul.mubr.bf16.gmra.mxu0 %v7622_v38  ;;  %v7653_v38 = vld [vmem:[%s7898_s24] sm:$0xff]  }
 0x44c   : > { %7000 = vmatprep.subr.bf16.mxu0 %v2394_v0  ;;  %2672 = vmatprep.mubr.bf16.mxu0 %v7623_v50 }
 0x44d   : > { %v2359_v47 = vpop.xlane.xlu1 %2358  ;;  %v2329_v31 = vpop.xlane.xlu0 %2328  ;;  %7342 = vmatprep.mubr.bf16.mxu1 %v7653_v38  ;;  %v2870_v38 = vld [vmem:[%s7893_s19 + $0x20] sm:$0xff] }
 0x44e   : > { %v2386_v21 = vpack.c.bf16 %v2331_v61, %v2329_v31 }
 0x450   : > { %7001 = vmatpush3.bf16.msra.mxu0 %v2386_v21 }
 0x451   : > { %v2327_v12 = vpop.xlane.xlu1 %2326  ;;  %v2357_v15 = vpop.xlane.xlu0 %2356 }
 0x452   : > { %v2393_v34 = vpack.c.bf16 %v2359_v47, %v2357_v15 }
 0x453   : > { %2673 = vmatmul.mubr.bf16.gmra.mxu0 %v7625_v16 }
 0x454   : > { %7002 = vmatprep.subr.bf16.mxu0 %v2393_v34  ;;  %2680 = vmatprep.mubr.bf16.mxu0 %v7626_v8 }
 0x455   : > { %v2325_v58 = vpop.xlane.xlu0 %2324  ;;  %v2355_v56 = vpop.xlane.xlu1 %2354 }
 0x456   : > { %v2385_v4 = vpack.c.bf16 %v2327_v12, %v2325_v58 }
 0x458   : > { %7003 = vmatpush3.bf16.msra.mxu0 %v2385_v4 }
 0x459   : > { %v2353_v28 = vpop.xlane.xlu0 %2352  ;;  %v2323_v63 = vpop.xlane.xlu1 %2322 }
 0x45a   : > { %v2392_v7 = vpack.c.bf16 %v2355_v56, %v2353_v28 }
 0x45b   : > { %2681 = vmatmul.mubr.bf16.gmra.mxu0 %v7628_v5 }
 0x45c   : > { %7004 = vmatprep.subr.bf16.mxu0 %v2392_v7  ;;  %2801 = vmatprep.mubr.bf16.mxu0 %v7631_v20 }
 0x45d   : > { %v2321_v54 = vpop.xlane.xlu0 %2320 }
 0x45e   : > { %v2384_v48 = vpack.c.bf16 %v2323_v63, %v2321_v54  ;;  %v2866_v54 = vld [vmem:[%s7893_s19] sm:$0xff] }
 0x460   : > { %7005 = vmatpush3.bf16.msra.mxu0 %v2384_v48 }
 0x463   : > { %2802 = vmatmul.mubr.bf16.vlgmr.msra.gmra.mxu0 %v7629_v53 }
 0x464   : > { %2809 = vmatprep.mubr.bf16.mxu0 %v7632_v18 }
 0x46b   : > { %2810 = vmatmul.mubr.bf16.gmra.mxu0 %v7634_v30  ;;  %v2867_v30 = vld [vmem:[%s7893_s19 + $0x8] sm:$0xff] }
 0x46c   : > { %2817 = vmatprep.mubr.bf16.mxu0 %v7635_v9 }
 0x473   : > { %2818 = vmatmul.mubr.bf16.gmra.mxu0 %v7637_v22 }
 0x474   : > { %2825 = vmatprep.mubr.bf16.mxu0 %v7638_v59 }
 0x47b   : > { %2826 = vmatmul.mubr.bf16.gmra.mxu0 %v7640_v41 }
 0x47c   : > { %2833 = vmatprep.mubr.bf16.mxu0 %v7641_v14 }
 0x483   : > { %2834 = vmatmul.mubr.bf16.gmra.mxu0 %v7643_v24 }
 0x484   : > { %2841 = vmatprep.mubr.bf16.mxu0 %v7644_v36 }
 0x48b   : > { %2842 = vmatmul.mubr.bf16.gmra.mxu0 %v7646_v1 }
 0x48c   : > { %2849 = vmatprep.mubr.bf16.mxu0 %v7647_v6 }
 0x493   : > { %2850 = vmatmul.mubr.bf16.gmra.mxu0 %v7649_v52 }
 0x494   : > { %2857 = vmatprep.mubr.bf16.mxu0 %v7650_v17  ;;  %v2868_v17 = vld [vmem:[%s7893_s19 + $0x10] sm:$0xff] }
 0x49b   : > { %2858 = vmatmul.mubr.bf16.gmra.mxu0 %v7652_v10 }
 0x49c   : > { %4338 = vmatprep.mubr.bf16.mxu0 %v10212_v60 }
 0x4e3   : > { %v6942_v32 = vpop.f32.mrf.mxu0 }
 0x4e5   : > { %v6943_v19 = vpop.f32.mrf.mxu0 }
 0x4e6   : > { %v6944_v2 = vadd.f32 %v6943_v19, %v6942_v32 }
 0x4e7   : > { %v6945_v44 = vpop.f32.mrf.mxu0 }
 0x4e9   : > { %v6946_v33 = vpop.f32.mrf.mxu0 }
 0x4ea   : > { %v6947_v53 = vadd.f32 %v6946_v33, %v6945_v44  ;;  %v2869_v44 = vld [vmem:[%s7893_s19 + $0x18] sm:$0xff] }
 0x4eb   : > { %v6948_v3 = vpop.f32.mrf.mxu0 }
 0x4ed   : > { %v6949_v27 = vpop.f32.mrf.mxu0 }
 0x4ee   : > { %v6950_v46 = vadd.f32 %v6949_v27, %v6948_v3 }
 0x4ef   : > { %v6951_v49 = vpop.f32.mrf.mxu0 }
 0x4f1   : > { %v6952_v13 = vpop.f32.mrf.mxu0 }
 0x4f2   : > { %v6953_v32 = vadd.f32 %v6952_v13, %v6951_v49 }
 0x4f3   : > { %v6954_v51 = vpop.f32.mrf.mxu0 }
 0x4f5   : > { %v6955_v29 = vpop.f32.mrf.mxu0 }
 0x4f6   : > { %v8611_v39 = vadd.f32 %v6955_v29, %v6954_v51 }
 0x4f7   : > { %v8613_v23 = vpop.f32.mrf.mxu0 }
 0x4f9   : > { %v8615_v45 = vpop.f32.mrf.mxu0 }
 0x4fa   : > { %v6959_v49 = vadd.f32 %v8615_v45, %v8613_v23 }
 0x4fb   : > { %v6960_v25 = vpop.f32.mrf.mxu0 }
 0x4fd   : > { %v6961_v37 = vpop.f32.mrf.mxu0 }
 0x4fe   : > { %v8617_v11 = vadd.f32 %v6961_v37, %v6960_v25 }
 0x4ff   : > { %v8619_v43 = vpop.f32.mrf.mxu0 }
 0x501   : > { %v8621_v35 = vpop.f32.mrf.mxu0 }
 0x502   : > { %v6965_v23 = vadd.f32 %v8621_v35, %v8619_v43 }
 0x503   : > { %v6966_v62 = vpop.f32.mrf.mxu0 }
 0x505   : > { %v6967_v26 = vpop.f32.mrf.mxu0 }
 0x506   : > { %v8623_v40 = vadd.f32 %v6967_v26, %v6966_v62 }
 0x507   : > { %v8625_v55 = vpop.f32.mrf.mxu0 }
 0x509   : > { %v8627_v57 = vpop.f32.mrf.mxu0 }
 0x50a   : > { %v6971_v43 = vadd.f32 %v8627_v57, %v8625_v55 }
 0x50b   : > { %v6972_v50 = vpop.f32.mrf.mxu0 }
 0x50d   : > { %v6973_v61 = vpop.f32.mrf.mxu0 }
 0x50e   : > { %v8630_v42 = vadd.f32 %v6973_v61, %v6972_v50 }
 0x50f   : > { %v8632_v0 = vpop.f32.mrf.mxu0 }
 0x511   : > { %v8634_v47 = vpop.f32.mrf.mxu0 }
 0x512   : > { %v6977_v55 = vadd.f32 %v8634_v47, %v8632_v0 }
 0x513   : > { %v6978_v31 = vpop.f32.mrf.mxu0 }
 0x515   : > { %v6979_v21 = vpop.f32.mrf.mxu0 }
 0x516   : > { %v8636_v16 = vadd.f32 %v6979_v21, %v6978_v31  ;;  %v2871_v31 = vld [vmem:[%s7893_s19 + $0x28] sm:$0xff] }
 0x517   : > { %v8638_v8 = vpop.f32.mrf.mxu0 }
 0x519   : > { %v8640_v12 = vpop.f32.mrf.mxu0 }
 0x51a   : > { %v6983_v0 = vadd.f32 %v8640_v12, %v8638_v8 }
 0x51b   : > { %v6984_v15 = vpop.f32.mrf.mxu0 }
 0x51d   : > { %v6985_v34 = vpop.f32.mrf.mxu0 }
 0x51e   : > { %v8642_v58 = vadd.f32 %v6985_v34, %v6984_v15 }
 0x51f   : > { %v8644_v4 = vpop.f32.mrf.mxu0 }
 0x521   : > { %v8646_v56 = vpop.f32.mrf.mxu0 }
 0x522   : > { %v6989_v8 = vadd.f32 %v8646_v56, %v8644_v4  ;;  %v7655_v4 = vld [vmem:[%s7898_s24 + $0x10] sm:$0xff]   ;;  %v7656_v56 = vld [vmem:[%s7898_s24 + $0x18] sm:$0xff]  }
 0x523   : > { %v7006_v5 = vpop.f32.mrf.mxu0 }
 0x525   : > { %v7007_v20 = vpop.f32.mrf.mxu0 }
 0x526   : > { %v7008_v28 = vadd.f32 %v7007_v20, %v7006_v5 }
 0x527   : > { %v7009_v7 = vpop.f32.mrf.mxu0 }
 0x528   : > { %v2804_v63 = vadd.f32 %v7008_v28, %v6944_v2 }
 0x529   : > { %v7010_v48 = vpop.f32.mrf.mxu0 }
 0x52a   : > { %v7011_v18 = vadd.f32 %v7010_v48, %v7009_v7  ;;  %v2882_v22 = vadd.f32 %v2866_v54, %v2804_v63  ;;  %v2872_v48 = vld [vmem:[%s7893_s19 + $0x30] sm:$0xff] }
 0x52b   : > { %v7012_v9 = vpop.f32.mrf.mxu0 }
 0x52c   : > { %v2807_v59 = vadd.f32 %v7011_v18, %v6947_v53  ;;  %v2898_v1 = vmax.f32 %v2882_v22, 0.0 }
 0x52d   : > { %v7013_v41 = vpop.f32.mrf.mxu0 }
 0x52e   : > { %v2883_v14 = vadd.f32 %v2867_v30, %v2807_v59  ;;  %v7014_v24 = vadd.f32 %v7013_v41, %v7012_v9  ;;  %v2873_v30 = vld [vmem:[%s7893_s19 + $0x38] sm:$0xff] }
 0x52f   : > { %v7015_v36 = vpop.f32.mrf.mxu0 }
 0x530   : > { %v2812_v6 = vadd.f32 %v7014_v24, %v6950_v46  ;;  %v2899_v52 = vmax.f32 %v2883_v14, 0.0 }
 0x531   : > { %v7016_v10 = vpop.f32.mrf.mxu0 }
 0x532   : > { %v7017_v19 = vadd.f32 %v7016_v10, %v7015_v36  ;;  %v8651_v2 = vpack.c.bf16 %v2899_v52, %v2898_v1  ;;  %v2884_v3 = vadd.f32 %v2868_v17, %v2812_v6  ;;  %v2874_v52 = vld [vmem:[%s7893_s19 + $0x40] sm:$0xff] }
 0x533   : > { %v7018_v33 = vpop.f32.mrf.mxu0 }
 0x534   : > { %v2815_v27 = vadd.f32 %v7017_v19, %v6953_v32  ;;  %v2900_v62 = vmax.f32 %v2884_v3, 0.0  ;;  %v2875_v32 = vld [vmem:[%s7893_s19 + $0x48] sm:$0xff] }
 0x535   : > { %v7019_v51 = vpop.f32.mrf.mxu0 }
 0x536   : > { %v2885_v29 = vadd.f32 %v2869_v44, %v2815_v27  ;;  %v7020_v25 = vadd.f32 %v7019_v51, %v7018_v33 }
 0x537   : > { %v7021_v37 = vpop.f32.mrf.mxu0 }
 0x538   : > { %v2820_v46 = vadd.f32 %v7020_v25, %v8611_v39  ;;  %v2901_v26 = vmax.f32 %v2885_v29, 0.0 }
 0x539   : > { %v7022_v50 = vpop.f32.mrf.mxu0 }
 0x53a   : > { %v7023_v13 = vadd.f32 %v7022_v50, %v7021_v37  ;;  %v8658_v61 = vpack.c.bf16 %v2901_v26, %v2900_v62  ;;  %v2886_v15 = vadd.f32 %v2870_v38, %v2820_v46  ;;  %v2876_v62 = vld [vmem:[%s7893_s19 + $0x50] sm:$0xff]  ;;  %v2877_v38 = vld [vmem:[%s7893_s19 + $0x58] sm:$0xff] }
 0x53b   : > { %v7024_v21 = vpop.f32.mrf.mxu0 }
 0x53c   : > { %v2823_v34 = vadd.f32 %v7023_v13, %v6959_v49  ;;  %v2902_v39 = vmax.f32 %v2886_v15, 0.0 }
 0x53d   : > { %v7025_v5 = vpop.f32.mrf.mxu0 }
 0x53e   : > { %v2887_v20 = vadd.f32 %v2871_v31, %v2823_v34  ;;  %v7026_v28 = vadd.f32 %v7025_v5, %v7024_v21 }
 0x53f   : > { %v7027_v7 = vpop.f32.mrf.mxu0 }
 0x540   : > { %v2828_v63 = vadd.f32 %v7026_v28, %v8617_v11  ;;  %v2903_v54 = vmax.f32 %v2887_v20, 0.0  ;;  %v2878_v28 = vld [vmem:[%s7893_s19 + $0x60] sm:$0xff] }
 0x541   : > { %v7028_v53 = vpop.f32.mrf.mxu0 }
 0x542   : > { %v7029_v45 = vadd.f32 %v7028_v53, %v7027_v7  ;;  %v8665_v18 = vpack.c.bf16 %v2903_v54, %v2902_v39  ;;  %v2888_v22 = vadd.f32 %v2872_v48, %v2828_v63  ;;  %v2879_v63 = vld [vmem:[%s7893_s19 + $0x68] sm:$0xff] }
 0x543   : > { %v7030_v9 = vpop.f32.mrf.mxu0 }
 0x544   : > { %v2831_v59 = vadd.f32 %v7029_v45, %v6965_v23  ;;  %v2904_v11 = vmax.f32 %v2888_v22, 0.0 }
 0x545   : > { %v7031_v41 = vpop.f32.mrf.mxu0 }
 0x546   : > { %v2889_v14 = vadd.f32 %v2873_v30, %v2831_v59  ;;  %v7032_v24 = vadd.f32 %v7031_v41, %v7030_v9  ;;  %v2880_v41 = vld [vmem:[%s7893_s19 + $0x70] sm:$0xff] }
 0x547   : > { %v7033_v36 = vpop.f32.mrf.mxu0 }
 0x548   : > { %v2836_v1 = vadd.f32 %v7032_v24, %v8623_v40  ;;  %v2905_v6 = vmax.f32 %v2889_v14, 0.0 }
 0x549   : > { %v7034_v17 = vpop.f32.mrf.mxu0 }
 0x54a   : > { %v7035_v35 = vadd.f32 %v7034_v17, %v7033_v36  ;;  %v8672_v10 = vpack.c.bf16 %v2905_v6, %v2904_v11  ;;  %v2890_v44 = vadd.f32 %v2874_v52, %v2836_v1  ;;  %v2881_v36 = vld [vmem:[%s7893_s19 + $0x78] sm:$0xff] }
 0x54b   : > { %v7036_v19 = vpop.f32.mrf.mxu0 }
 0x54c   : > { %v2839_v33 = vadd.f32 %v7035_v35, %v6971_v43  ;;  %v2906_v40 = vmax.f32 %v2890_v44, 0.0 }
 0x54d   : > { %v7037_v3 = vpop.f32.mrf.mxu0 }
 0x54e   : > { %v2891_v27 = vadd.f32 %v2875_v32, %v2839_v33  ;;  %v7038_v51 = vadd.f32 %v7037_v3, %v7036_v19  ;;  %v2936_v19 = vld [vmem:[%s7903_s30 + $0x30] sm:$0xff]  ;;  %v2934_v33 = vld [vmem:[%s7903_s30 + $0x20] sm:$0xff]  ;;  %v2937_v3 = vld [vmem:[%s7903_s30 + $0x38] sm:$0xff] }
 0x54f   : > { %v7039_v29 = vpop.f32.mrf.mxu0 }
 0x550   : > { %v2844_v25 = vadd.f32 %v7038_v51, %v8630_v42  ;;  %v2907_v37 = vmax.f32 %v2891_v27, 0.0  ;;  %v2933_v51 = vld [vmem:[%s7903_s30 + $0x18] sm:$0xff] }
 0x551   : > { %v7040_v46 = vpop.f32.mrf.mxu0 }
 0x552   : > { %v7041_v57 = vadd.f32 %v7040_v46, %v7039_v29  ;;  %v2926_v26 = vpack.c.bf16 %v2907_v37, %v2906_v40  ;;  %v2892_v49 = vadd.f32 %v2876_v62, %v2844_v25  ;;  %v2935_v40 = vld [vmem:[%s7903_s30 + $0x28] sm:$0xff]  ;;  %v2932_v62 = vld [vmem:[%s7903_s30 + $0x10] sm:$0xff] }
 0x553   : > { %v7042_v50 = vpop.f32.mrf.mxu0 }
 0x554   : > { %v2847_v13 = vadd.f32 %v7041_v57, %v6977_v55  ;;  %v2908_v5 = vmax.f32 %v2892_v49, 0.0 }
 0x555   : > { %v7043_v31 = vpop.f32.mrf.mxu0 }
 0x556   : > { %v2893_v21 = vadd.f32 %v2877_v38, %v2847_v13  ;;  %v7044_v15 = vadd.f32 %v7043_v31, %v7042_v50  ;;  %v2931_v50 = vld [vmem:[%s7903_s30 + $0x8] sm:$0xff] }
 0x557   : > { %v7045_v34 = vpop.f32.mrf.mxu0 }
 0x558   : > { %v2852_v42 = vadd.f32 %v7044_v15, %v8636_v16  ;;  %v2909_v20 = vmax.f32 %v2893_v21, 0.0  ;;  %v2930_v15 = vld [vmem:[%s7903_s30] sm:$0xff] }
 0x559   : > { %v7046_v7 = vpop.f32.mrf.mxu0 }
 0x55a   : > { %v7047_v47 = vadd.f32 %v7046_v7, %v7045_v34  ;;  %v2927_v39 = vpack.c.bf16 %v2909_v20, %v2908_v5  ;;  %v2894_v48 = vadd.f32 %v2878_v28, %v2852_v42 }
 0x55b   : > { %v7048_v54 = vpop.f32.mrf.mxu0 }
 0x55c   : > { %v2855_v53 = vadd.f32 %v7047_v47, %v6983_v0  ;;  %v2910_v22 = vmax.f32 %v2894_v48, 0.0 }
 0x55d   : > { %v7049_v23 = vpop.f32.mrf.mxu0 }
 0x55e   : > { %v2895_v45 = vadd.f32 %v2879_v63, %v2855_v53  ;;  %v7050_v30 = vadd.f32 %v7049_v23, %v7048_v54  ;;  %v7658_v63 = vld [vmem:[%s7908_s6 + $0x8] sm:$0xff]   ;;  %v3057_v54 = vld [vmem:[%s10213_s1 + $0x10] sm:$0xff]  ;;  %v3055_v53 = vld [vmem:[%s10213_s1] sm:$0xff] }
 0x55f   : > { %v7051_v9 = vpop.f32.mrf.mxu0 }
 0x560   : > { %v2860_v16 = vadd.f32 %v7050_v30, %v8642_v58  ;;  %v2911_v59 = vmax.f32 %v2895_v45, 0.0  ;;  %v7654_v58 = vld [vmem:[%s7898_s24 + $0x8] sm:$0xff]   ;;  %v10214_v45 = vld [vmem:[#allocation22_spill] sm:$0xff] }
 0x561   : > { %v7052_v14 = vpop.f32.mrf.mxu0  ;;  %v8722_v30 = vadd.s32 16, %v10214_v45 }
 0x562   : > { %v7053_v12 = vadd.f32 %v7052_v14, %v7051_v9  ;;  %v2928_v24 = vpack.c.bf16 %v2911_v59, %v2910_v22  ;;  %v2896_v11 = vadd.f32 %v2880_v41, %v2860_v16  ;;  %v3058_v22 = vld [vmem:[%s10213_s1 + $0x18] sm:$0xff]  ;;  %v3056_v41 = vld [vmem:[%s10213_s1 + $0x8] sm:$0xff] }
 0x563   : > { %vm3284_vm2 = vcmp.lt.s32.totalorder %v8722_v30, 18 }
 0x564   : > { %v2863_v1 = vadd.f32 %v7053_v12, %v6989_v8  ;;  %v2912_v52 = vmax.f32 %v2896_v11, 0.0 }
 0x566   : > { %v2897_v6 = vadd.f32 %v2881_v36, %v2863_v1 }
 0x568   : > { %v2913_v17 = vmax.f32 %v2897_v6, 0.0 }
 0x56a   : > { %v2929_v43 = vpack.c.bf16 %v2913_v17, %v2912_v52 }
 0x56c   : > { %7326 = vmatprep.subr.bf16.mxu1 %v2929_v43 }
 0x56d   : > { %7327 = vmatpush3.bf16.msra.mxu1 %v2929_v43 }
 0x56e   : > { %7328 = vmatprep.subr.bf16.mxu1 %v2928_v24 }
 0x571   : > { %7329 = vmatpush3.bf16.msra.mxu1 %v2928_v24 }
 0x572   : > { %7330 = vmatprep.subr.bf16.mxu1 %v2927_v39 }
 0x575   : > { %7331 = vmatpush3.bf16.msra.mxu1 %v2927_v39 }
 0x576   : > { %7332 = vmatprep.subr.bf16.mxu1 %v2926_v26 }
 0x579   : > { %7333 = vmatpush3.bf16.msra.mxu1 %v2926_v26 }
 0x57a   : > { %7334 = vmatprep.subr.bf16.mxu1 %v8672_v10 }
 0x57d   : > { %7335 = vmatpush3.bf16.msra.mxu1 %v8672_v10 }
 0x57e   : > { %7336 = vmatprep.subr.bf16.mxu1 %v8665_v18 }
 0x581   : > { %7337 = vmatpush3.bf16.msra.mxu1 %v8665_v18  ;;  %v7657_v18 = vld [vmem:[%s7908_s6] sm:$0xff]  }
 0x582   : > { %7338 = vmatprep.subr.bf16.mxu1 %v8658_v61 }
 0x585   : > { %7339 = vmatpush3.bf16.msra.mxu1 %v8658_v61 }
 0x586   : > { %7340 = vmatprep.subr.bf16.mxu1 %v8651_v2 }
 0x589   : > { %7341 = vmatpush3.bf16.msra.mxu1 %v8651_v2 }
 0x58c   : > { %7343 = vmatmul.mubr.bf16.vlgmr.msra.gmra.mxu1 %v7654_v58  ;;  %v8739_v58 = vadd.s32 8, %v10214_v45 }
 0x58d   : > { %7346 = vmatprep.mubr.bf16.mxu1 %v7655_v4  ;;  %v8742_v4 = vadd.s32 32, %v10214_v45 }
 0x594   : > { %7347 = vmatmul.mubr.bf16.gmra.mxu1 %v7656_v56  ;;  %v8745_v56 = vadd.s32 40, %v10214_v45 }
 0x595   : > { %7358 = vmatprep.mubr.msk.bf16.mxu1 %vm1557_vm0, %v7657_v18 }
 0x64c   : > { %v7344_v35 = vpop.f32.mrf.mxu1 }
 0x64d   : > { %v3005_v49 = vadd.f32 %v7344_v35, %v2932_v62  ;;  %v8748_v35 = vadd.s32 48, %v10214_v45 }
 0x64e   : > { %v2996_v61 = vpop.f32.mrf.mxu1 }
 0x64f   : > { %v3029_v20 = vmax.f32 %v3005_v49, 0.0  ;;  %v2997_v28 = vadd.f32 %v2996_v61, %v2930_v15  ;;  %v8751_v61 = vadd.s32 64, %v10214_v45  ;;  %v8785_v49 = vadd.s32 112, %v10214_v45 }
 0x650   : > { %v7345_v10 = vpop.f32.mrf.mxu1 }
 0x651   : > { %v3008_v55 = vadd.f32 %v7345_v10, %v2933_v51  ;;  %v3027_v47 = vmax.f32 %v2997_v28, 0.0  ;;  %v8754_v10 = vadd.s32 72, %v10214_v45  ;;  %v8771_v51 = vadd.s32 80, %v10214_v45 }
 0x652   : > { %v2999_v32 = vpop.f32.mrf.mxu1 }
 0x653   : > { %v3030_v34 = vmax.f32 %v3008_v55, 0.0  ;;  %v3000_v5 = vadd.f32 %v2999_v32, %v2931_v50  ;;  %v8757_v32 = vadd.s32 96, %v10214_v45  ;;  %v3274_v55 = vcvt.s32.f32 %v8751_v61 }
 0x654   : > { %v7348_v44 = vpop.f32.mrf.mxu1  ;;  %v3276_v15 = vcvt.s32.f32 %v8771_v51 }
 0x655   : > { %v3021_v27 = vadd.f32 %v7348_v44, %v2936_v19  ;;  %v3052_v7 = vpack.c.bf16 %v3030_v34, %v3029_v20  ;;  %v3028_v0 = vmax.f32 %v3000_v5, 0.0  ;;  %v3268_v19 = vcvt.s32.f32 %v8722_v30 }
 0x656   : > { %v3012_v2 = vpop.f32.mrf.mxu1  ;;  %v8761_v44 = vadd.s32 104, %v10214_v45 }
 0x657   : > { %v3013_v25 = vadd.f32 %v3012_v2, %v2934_v33  ;;  %v3033_v57 = vmax.f32 %v3021_v27, 0.0  ;;  %v3051_v39 = vpack.c.bf16 %v3028_v0, %v3027_v47  ;;  %v3266_v2 = vcvt.s32.f32 %v10214_v45 }
 0x658   : > { %v7349_v29 = vpop.f32.mrf.mxu1  ;;  %v8768_v27 = vadd.s32 56, %v10214_v45  ;;  %v3280_v47 = vcvt.s32.f32 %v8785_v49  ;;  %v8910_v49 = vld [vmem:[%s10215_s10 + $0x18] sm:$0xff] }
 0x659   : > { %v3024_v37 = vadd.f32 %v7349_v29, %v2937_v3  ;;  %v3031_v13 = vmax.f32 %v3013_v25, 0.0  ;;  %v8765_v3 = vadd.s32 24, %v10214_v45  ;;  %v8774_v29 = vadd.s32 88, %v10214_v45 }
 0x65a   : > { %v3015_v46 = vpop.f32.mrf.mxu1  ;;  %v3270_v25 = vcvt.s32.f32 %v8742_v4 }
 0x65b   : > { %v3034_v26 = vmax.f32 %v3024_v37, 0.0  ;;  %v3016_v38 = vadd.f32 %v3015_v46, %v2935_v40  ;;  %v3267_v40 = vcvt.s32.f32 %v8739_v58  ;;  %v3271_v37 = vcvt.s32.f32 %v8745_v56 }
 0x65c   : > { %v3272_v46 = vcvt.s32.f32 %v8748_v35  ;;  %v3277_v34 = vcvt.s32.f32 %v8774_v29 }
 0x65d   : > { %v3054_v31 = vpack.c.bf16 %v3034_v26, %v3033_v57  ;;  %v3032_v21 = vmax.f32 %v3016_v38, 0.0  ;;  %v3275_v57 = vcvt.s32.f32 %v8754_v10  ;;  %v3278_v26 = vcvt.s32.f32 %v8757_v32 }
 0x65e   : > { %v3279_v38 = vcvt.s32.f32 %v8761_v44 }
 0x65f   : > { %7350 = vmatprep.subr.bf16.mxu1 %v3054_v31  ;;  %v3053_v42 = vpack.c.bf16 %v3032_v21, %v3031_v13  ;;  %v8788_v13 = vadd.s32 120, %v10214_v45  ;;  %v3273_v21 = vcvt.s32.f32 %v8768_v27 }
 0x660   : > { %7351 = vmatpush3.bf16.msra.mxu1 %v3054_v31  ;;  %v3269_v31 = vcvt.s32.f32 %v8765_v3 }
 0x661   : > { %7352 = vmatprep.subr.bf16.mxu1 %v3053_v42 }
 0x664   : > { %7353 = vmatpush3.bf16.msra.mxu1 %v3053_v42 }
 0x665   : > { %7354 = vmatprep.subr.bf16.mxu1 %v3052_v7 }
 0x668   : > { %7355 = vmatpush3.bf16.msra.mxu1 %v3052_v7 }
 0x669   : > { %7356 = vmatprep.subr.bf16.mxu1 %v3051_v39 }
 0x66c   : > { %7357 = vmatpush3.bf16.msra.mxu1 %v3051_v39  ;;  %v3281_v39 = vcvt.s32.f32 %v8788_v13  ;;  %v8915_v13 = vld [vmem:[%s10215_s10] sm:$0xff] }
 0x66f   : > { %7359 = vmatmul.mubr.msk.bf16.vlgmr.msra.gmra.mxu1 %vm1557_vm0, %v7658_v63 }
 0x72f   : > { %v7360_v48 = vpop.f32.mrf.mxu1 }
 0x730   : > { %v3178_v23 = vadd.f32 %v7360_v48, %v3057_v54 }
 0x731   : > { %v3169_v9 = vpop.f32.mrf.mxu1 }
 0x732   : > { %3235 = vst.msk [vmem:[%s8718_s7 + $0x10] sm:$0xff] %vm3232_vm1, %v3178_v23  ;;  %v3170_v16 = vadd.f32 %v3169_v9, %v3055_v53  ;;  %v3300_v24 = vsel %vm3284_vm2, %v3178_v23, -inf }
 0x733   : > { %v7361_v59 = vpop.f32.mrf.mxu1  ;;  %v3316_v6 = vsel %vm3232_vm1, %v3300_v24, -inf }
 0x734   : > { %3233 = vst.msk [vmem:[%s8718_s7] sm:$0xff] %vm3232_vm1, %v3170_v16  ;;  %v3181_v14 = vadd.f32 %v7361_v59, %v3058_v22  ;;  %v3314_v36 = vsel %vm3232_vm1, %v3170_v16, -inf }
 0x735   : > { %v3172_v8 = vpop.f32.mrf.mxu1 }
 0x736   : > { %3236 = vst.msk [vmem:[%s8718_s7 + $0x18] sm:$0xff] %vm3232_vm1, %v3181_v14  ;;  %v3173_v12 = vadd.f32 %v3172_v8, %v3056_v41 }
 0x738   : > { %3234 = vst.msk [vmem:[%s8718_s7 + $0x8] sm:$0xff] %vm3232_vm1, %v3173_v12  ;;  %v3315_v11 = vsel %vm3232_vm1, %v3173_v12, -inf }
 0x739   : > { %v3342_v1 = vmax.f32 %v3314_v36, %v3315_v11 }
 0x73b   : > { %v3344_v52 = vmax.f32 %v3342_v1, %v3316_v6 }
 0x73d   : > { %v3345_v17 = vrot.slane %v3344_v52, 4 }
 0x73f   : > { %v3346_v43 = vmax.f32 %v3344_v52, %v3345_v17 }
 0x741   : > { %v3347_v18 = vrot.slane %v3346_v43, 2 }
 0x743   : > { %v3348_v33 = vmax.f32 %v3346_v43, %v3347_v18 }
 0x745   : > { %v3349_v62 = vrot.slane %v3348_v33, 1 }
 0x747   : > { %v3350_v50 = vmax.f32 %v3348_v33, %v3349_v62 }
 0x749   : > { %vm3351_vm3 = vcmp.eq.f32.partialorder %v3170_v16, %v3350_v50  ;;  %vm3352_vm4 = vcmp.eq.f32.partialorder %v3173_v12, %v3350_v50  ;;  %vm3353_vm5 = vcmp.eq.f32.partialorder %v3300_v24, %v3350_v50  ;;  %vm6773_vm6 = vcmp.eq.f32.partialorder %v3350_v50, -inf }
 0x74a   : > { %v3367_v5 = vsel %vm3351_vm3, %v3266_v2, 128.0  ;;  %v3368_v42 = vsel %vm3352_vm4, %v3267_v40, 128.0  ;;  %v3369_v20 = vsel %vm3353_vm5, %v3268_v19, 128.0  ;;  %v3371_v28 = vsel %vm6773_vm6, %v3270_v25, 128.0 }
 0x74b   : > { %v3372_v7 = vsel %vm6773_vm6, %v3271_v37, 128.0  ;;  %v3373_v0 = vsel %vm6773_vm6, %v3272_v46, 128.0  ;;  %v3375_v63 = vsel %vm6773_vm6, %v3274_v55, 128.0  ;;  %v3376_v54 = vsel %vm6773_vm6, %v3275_v57, 128.0 }
 0x74c   : > { %v3383_v48 = vsel %vm3232_vm1, %v3367_v5, inf  ;;  %v3384_v53 = vsel %vm3232_vm1, %v3368_v42, inf  ;;  %v3385_v23 = vsel %vm3232_vm1, %v3369_v20, inf  ;;  %v3387_v9 = vsel %vm3232_vm1, %v3371_v28, inf }
 0x74d   : > { %v3389_v22 = vsel %vm3232_vm1, %v3372_v7, inf  ;;  %v3391_v16 = vsel %vm3232_vm1, %v3373_v0, inf  ;;  %v3379_v59 = vsel %vm6773_vm6, %v3278_v26, 128.0  ;;  %v3380_v41 = vsel %vm6773_vm6, %v3279_v38, 128.0 }
 0x74e   : > { %v3388_v14 = vmin.f32 %v3383_v48, %v3387_v9  ;;  %v3390_v8 = vmin.f32 %v3384_v53, %v3389_v22  ;;  %v3392_v12 = vmin.f32 %v3385_v23, %v3391_v16  ;;  %v3395_v24 = vsel %vm3232_vm1, %v3375_v63, inf }
 0x74f   : > { %v3397_v36 = vsel %vm3232_vm1, %v3376_v54, inf  ;;  %v3370_v11 = vsel %vm6773_vm6, %v3269_v31, 128.0  ;;  %v3374_v52 = vsel %vm6773_vm6, %v3273_v21, 128.0  ;;  %v3377_v17 = vsel %vm6773_vm6, %v3276_v15, 128.0 }
 0x750   : > { %v3396_v1 = vmin.f32 %v3388_v14, %v3395_v24  ;;  %v3398_v6 = vmin.f32 %v3390_v8, %v3397_v36  ;;  %v3403_v43 = vsel %vm3232_vm1, %v3379_v59, inf  ;;  %v3378_v18 = vsel %vm6773_vm6, %v3277_v34, 128.0 }
 0x751   : > { %v3381_v33 = vsel %vm6773_vm6, %v3280_v47, 128.0  ;;  %v3386_v62 = vsel %vm3232_vm1, %v3370_v11, inf  ;;  %v3405_v5 = vsel %vm3232_vm1, %v3380_v41, inf  ;;  %v3382_v42 = vsel %vm6773_vm6, %v3281_v39, 128.0 }
 0x752   : > { %v3393_v20 = vsel %vm3232_vm1, %v3374_v52, inf  ;;  %v3399_v28 = vsel %vm3232_vm1, %v3377_v17, inf  ;;  %v3404_v7 = vmin.f32 %v3396_v1, %v3403_v43  ;;  %v3406_v0 = vmin.f32 %v3398_v6, %v3405_v5 }
 0x753   : > { %v3394_v63 = vmin.f32 %v3386_v62, %v3393_v20  ;;  %v3400_v54 = vmin.f32 %v3392_v12, %v3399_v28  ;;  %v3401_v48 = vsel %vm3232_vm1, %v3378_v18, inf  ;;  %v3407_v53 = vsel %vm3232_vm1, %v3381_v33, inf  ;;  %v3469_v62 = vld [vmem:[%s10219_s18 + $0x8] sm:$0xff] }
 0x754   : > { %v3409_v22 = vsel %vm3232_vm1, %v3382_v42, inf  ;;  %v3411_v16 = vmin.f32 %v3404_v7, %v3406_v0  ;;  %v7831_v12 = vmov 0.0   ;;  %v3471_v0 = vld [vmem:[%s10219_s18 + $0x18] sm:$0xff] }
 0x755   : > { %v3402_v23 = vmin.f32 %v3394_v63, %v3401_v48  ;;  %v3408_v9 = vmin.f32 %v3400_v54, %v3407_v53 }
 0x757   : > { %v3410_v59 = vmin.f32 %v3402_v23, %v3409_v22 }
 0x759   : > { %v3412_v50 = vmin.f32 %v3408_v9, %v3410_v59  ;;  %v3472_v59 = vld [vmem:[%s10219_s18 + $0x20] sm:$0xff] }
 0x75b   : > { %v3413_v41 = vmin.f32 %v3411_v16, %v3412_v50 }
 0x75d   : > { %v3414_v14 = vrot.slane %v3413_v41, 4 }
 0x75f   : > { %v3415_v8 = vmin.f32 %v3413_v41, %v3414_v14  ;;  %v3473_v41 = vld [vmem:[%s10219_s18 + $0x28] sm:$0xff] }
 0x761   : > { %v3416_v24 = vrot.slane %v3415_v8, 2 }
 0x763   : > { %v3417_v36 = vmin.f32 %v3415_v8, %v3416_v24 }
 0x765   : > { %v3418_v11 = vrot.slane %v3417_v36, 1 }
 0x767   : > { %v3419_v1 = vmin.f32 %v3417_v36, %v3418_v11 }
 0x769   : > { %vm3422_vm7 = vcmp.eq.f32.partialorder %v3268_v19, %v3419_v1  ;;  %vm3423_vm8 = vcmp.eq.f32.partialorder %v3269_v31, %v3419_v1  ;;  %vm3420_vm9 = vcmp.eq.f32.partialorder %v3266_v2, %v3419_v1  ;;  %vm3421_vm10 = vcmp.eq.f32.partialorder %v3267_v40, %v3419_v1  ;;  %v8918_v31 = vld [vmem:[%s10215_s10 + $0x8] sm:$0xff] }
 0x76a   : > { %v6788_v6 = vsel %vm3422_vm7, 1.0, %v7831_v12  ;;  %v6789_v52 = vsel %vm3423_vm8, 1.0, %v7831_v12  ;;  %v6786_v17 = vsel %vm3420_vm9, 1.0, %v7831_v12  ;;  %v6787_v43 = vsel %vm3421_vm10, 1.0, %v7831_v12 }
 0x76b   : > { %v7532_v18 = vpack.i.bf16 %v6789_v52, %v6788_v6  ;;  %v7527_v33 = vpack.i.bf16 %v6787_v43, %v6786_v17  ;;  %vm3424_vm11 = vcmp.eq.f32.partialorder %v3270_v25, %v3419_v1  ;;  %vm3425_vm12 = vcmp.eq.f32.partialorder %v3271_v37, %v3419_v1  ;;  %v8890_v37 = vld [vmem:[%s10215_s10 + $0x30] sm:$0xff] }
 0x76c   : > { %v6790_v30 = vsel %vm3424_vm11, 1.0, %v7831_v12  ;;  %v6791_v19 = vsel %vm3425_vm12, 1.0, %v7831_v12  ;;  %vm3426_vm13 = vcmp.eq.f32.partialorder %v3272_v46, %v3419_v1  ;;  %vm3427_vm14 = vcmp.eq.f32.partialorder %v3273_v21, %v3419_v1  ;;  %v8893_v46 = vld [vmem:[%s10215_s10 + $0x38] sm:$0xff] }
 0x76d   : > { %7533 = vperm.xlu1 %7526, %v7532_v18   ;;  %7528 = vperm.xlu0 %7524, %v7527_v33   ;;  %v6792_v45 = vsel %vm3426_vm13, 1.0, %v7831_v12  ;;  %v6793_v58 = vsel %vm3427_vm14, 1.0, %v7831_v12  ;;  %vm3428_vm15 = vcmp.eq.f32.partialorder %v3274_v55, %v3419_v1  ;;  %vm3429_vm2 = vcmp.eq.f32.partialorder %v3275_v57, %v3419_v1  ;;  %v8898_v55 = vld [vmem:[%s10215_s10 + $0x20] sm:$0xff]  ;;  %v8901_v57 = vld [vmem:[%s10215_s10 + $0x28] sm:$0xff]  ;;  %v3475_v33 = vld [vmem:[%s10219_s18 + $0x38] sm:$0xff] }
 0x76e   : > { %vm3430_vm3 = vcmp.eq.f32.partialorder %v3276_v15, %v3419_v1  ;;  %v7537_v4 = vpack.i.bf16 %v6791_v19, %v6790_v30  ;;  %v7542_v56 = vpack.i.bf16 %v6793_v58, %v6792_v45  ;;  %v6794_v35 = vsel %vm3428_vm15, 1.0, %v7831_v12  ;;  %v3633_v15 = vld [vmem:[%s10217_s16 + $0x38] sm:$0xff] }
 0x76f   : > { %vm3431_vm4 = vcmp.eq.f32.partialorder %v3277_v34, %v3419_v1  ;;  %v6795_v2 = vsel %vm3429_vm2, 1.0, %v7831_v12  ;;  %v6796_v3 = vsel %vm3430_vm3, 1.0, %v7831_v12  ;;  %vm3432_vm5 = vcmp.eq.f32.partialorder %v3278_v26, %v3419_v1  ;;  %v3470_v34 = vld [vmem:[%s10219_s18 + $0x10] sm:$0xff] }
 0x770   : > { %v6797_v27 = vsel %vm3431_vm4, 1.0, %v7831_v12  ;;  %vm3433_vm6 = vcmp.eq.f32.partialorder %v3279_v38, %v3419_v1  ;;  %vm3434_vm7 = vcmp.eq.f32.partialorder %v3280_v47, %v3419_v1  ;;  %vm3435_vm8 = vcmp.eq.f32.partialorder %v3281_v39, %v3419_v1  ;;  %v8907_v38 = vld [vmem:[%s10215_s10 + $0x10] sm:$0xff]  ;;  %v3468_v39 = vld [vmem:[%s10219_s18] sm:$0xff] }
 0x771   : > { %7538 = vperm.xlu1 %7526, %v7537_v4   ;;  %7543 = vperm.xlu0 %7524, %v7542_v56   ;;  %v7547_v61 = vpack.i.bf16 %v6795_v2, %v6794_v35  ;;  %v7552_v10 = vpack.i.bf16 %v6797_v27, %v6796_v3  ;;  %v6798_v51 = vsel %vm3432_vm5, 1.0, %v7831_v12  ;;  %v6799_v32 = vsel %vm3433_vm6, 1.0, %v7831_v12  ;;  %v3476_v4 = vld [vmem:[%s10219_s18 + $0x40] sm:$0xff] }
 0x772   : > { %v6800_v29 = vsel %vm3434_vm7, 1.0, %v7831_v12  ;;  %v6801_v40 = vsel %vm3435_vm8, 1.0, %v7831_v12  ;;  %v7557_v44 = vpack.i.bf16 %v6799_v32, %v6798_v51  ;;  %v10216_v26 = vmov 1   ;;  %v3474_v12 = vld [vmem:[%s10219_s18 + $0x30] sm:$0xff] }
 0x773   : > { %v7562_v25 = vpack.i.bf16 %v6801_v40, %v6800_v29  ;;  %v10218_v21 = vmov 2   ;;  %vm3580_vm9 = vcmask 23552   ;;  %v3478_v40 = vld [vmem:[%s10219_s18 + $0x50] sm:$0xff] }
 0x775   : > { %7548 = vperm.xlu1 %7526, %v7547_v61   ;;  %7553 = vperm.xlu0 %7524, %v7552_v10   ;;  %v3477_v61 = vld [vmem:[%s10219_s18 + $0x48] sm:$0xff] }
 0x779   : > { %7558 = vperm.xlu1 %7526, %v7557_v44   ;;  %7563 = vperm.xlu0 %7524, %v7562_v25  }
 0x77d   : > { %3926 = vrot.lane.b32.xlu1 %v8890_v37, %s7832_s11  ;;  %3928 = vrot.lane.b32.xlu0 %v8893_v46, %s7832_s11 }
 0x77e   : > { %7568 = vset.pattern.permute.xlu0 %v10216_v26 }
 0x781   : > { %3922 = vrot.lane.b32.xlu1 %v8898_v55, %s7832_s11  ;;  %3924 = vrot.lane.b32.xlu0 %v8901_v57, %s7832_s11 }
 0x785   : > { %3918 = vrot.lane.b32.xlu1 %v8907_v38, %s7832_s11  ;;  %3920 = vrot.lane.b32.xlu0 %v8910_v49, %s7832_s11 }
 0x789   : > { %3914 = vrot.lane.b32.xlu1 %v8915_v13, %s7832_s11  ;;  %3916 = vrot.lane.b32.xlu0 %v8918_v31, %s7832_s11  ;;  %s10230_s11 = sld [smem:[#allocation10_spill]] }
 0x78d   : > { %3894 = vrot.lane.b32.xlu1 %v8890_v37, %s7833_s15  ;;  %3896 = vrot.lane.b32.xlu0 %v8893_v46, %s7833_s15 }
 0x791   : > { %3890 = vrot.lane.b32.xlu1 %v8898_v55, %s7833_s15  ;;  %3892 = vrot.lane.b32.xlu0 %v8901_v57, %s7833_s15 }
 0x795   : > { %3886 = vrot.lane.b32.xlu1 %v8907_v38, %s7833_s15  ;;  %3888 = vrot.lane.b32.xlu0 %v8910_v49, %s7833_s15 }
 0x799   : > { %3882 = vrot.lane.b32.xlu1 %v8915_v13, %s7833_s15  ;;  %3884 = vrot.lane.b32.xlu0 %v8918_v31, %s7833_s15 }
 0x79d   : > { %3666 = vperm.xlu1 %7526, %v8890_v37   ;;  %3711 = vperm.xlu0 %7568, %v8893_v46  }
 0x7a1   : > { %7567 = vset.pattern.permute.xlu1 %v10216_v26  ;;  %3703 = vperm.xlu0 %7568, %v8901_v57  }
 0x7a2   : > { %3707 = vperm.xlu1 %7567, %v8890_v37  }
 0x7a5   : > { %3695 = vperm.xlu0 %7568, %v8910_v49  }
 0x7a6   : > { %7569 = vset.pattern.permute.xlu1 %v10218_v21 }
 0x7a7   : > { %3755 = vperm.xlu1 %7569, %v8890_v37  }
 0x7ab   : > { %3759 = vperm.xlu1 %7569, %v8893_v46  }
 0x7af   : > { %7570 = vset.pattern.permute.xlu1 %v10212_v60 }
 0x7b0   : > { %3656 = vperm.xlu1 %7570, %v8898_v55  }
 0x7b4   : > { %7571 = vset.pattern.permute.xlu1 %v10216_v26 }
 0x7b5   : > { %3699 = vperm.xlu1 %7571, %v8898_v55  }
 0x7b9   : > { %7572 = vset.pattern.permute.xlu1 %v10218_v21 }
 0x7ba   : > { %3747 = vperm.xlu1 %7572, %v8898_v55  }
 0x7be   : > { %3751 = vperm.xlu1 %7572, %v8901_v57  }
 0x7c2   : > { %7573 = vset.pattern.permute.xlu1 %v10212_v60 }
 0x7c3   : > { %3815 = vperm.xlu1 %7573, %v3633_v15  }
 0x7c7   : > { %3646 = vperm.xlu1 %7573, %v8907_v38  }
 0x7cb   : > { %7574 = vset.pattern.permute.xlu1 %v10216_v26 }
 0x7cc   : > { %3691 = vperm.xlu1 %7574, %v8907_v38  }
 0x7d0   : > { %7575 = vset.pattern.permute.xlu1 %v10218_v21 }
 0x7e8   : > { %v7534_v47 = vpop.permute.xlu1 %7533  ;;  %v7529_v5 = vpop.permute.xlu0 %7528 }
 0x7e9   : > { %v7536_v42 = vunpack.i.h.bf16 %v7534_v47  ;;  %v7535_v20 = vunpack.i.l.bf16 %v7534_v47  ;;  %v7531_v28 = vunpack.i.h.bf16 %v7529_v5  ;;  %v7530_v7 = vunpack.i.l.bf16 %v7529_v5 }
 0x7eb   : > { %v3566_v63 = vmul.f32 %v7535_v20, %v3470_v34  ;;  %v3565_v54 = vmul.f32 %v7531_v28, %v3469_v62  ;;  %v3564_v48 = vmul.f32 %v7530_v7, %v3468_v39  ;;  %v3567_v9 = vmul.f32 %v7536_v42, %v3471_v0  ;;  %v3479_v39 = vld [vmem:[%s10219_s18 + $0x58] sm:$0xff]  ;;  %v3480_v28 = vld [vmem:[%s10219_s18 + $0x60] sm:$0xff] }
 0x7ec   : > { %v7539_v53 = vpop.permute.xlu1 %7538  ;;  %v7544_v23 = vpop.permute.xlu0 %7543 }
 0x7ed   : > { %v3582_v22 = vsel %vm3580_vm9, %v3565_v54, 0.0  ;;  %v3581_v16 = vsel %vm3580_vm9, %v3564_v48, 0.0  ;;  %v7541_v14 = vunpack.i.h.bf16 %v7539_v53  ;;  %v7540_v8 = vunpack.i.l.bf16 %v7539_v53  ;;  %v3481_v53 = vld [vmem:[%s10219_s18 + $0x68] sm:$0xff] }
 0x7ee   : > { %v3583_v50 = vadd.f32 %v3582_v22, %v3581_v16  ;;  %v3584_v24 = vsel %vm3580_vm9, %v3566_v63, 0.0  ;;  %v7545_v36 = vunpack.i.l.bf16 %v7544_v23  ;;  %v3586_v52 = vsel %vm3580_vm9, %v3567_v9, 0.0 }
 0x7ef   : > { %v3568_v1 = vmul.f32 %v7540_v8, %v3472_v59  ;;  %v3569_v17 = vmul.f32 %v7541_v14, %v3473_v41  ;;  %v7546_v43 = vunpack.i.h.bf16 %v7544_v23  ;;  %v3482_v59 = vld [vmem:[%s10219_s18 + $0x70] sm:$0xff] }
 0x7f0   : > { %v3585_v11 = vadd.f32 %v3584_v24, %v3583_v50  ;;  %v7549_v6 = vpop.permute.xlu1 %7548  ;;  %v3570_v19 = vmul.f32 %v7545_v36, %v3474_v12  ;;  %v7554_v56 = vpop.permute.xlu0 %7553  ;;  %v3483_v24 = vld [vmem:[%s10219_s18 + $0x78] sm:$0xff] }
 0x7f1   : > { %v3588_v30 = vsel %vm3580_vm9, %v3568_v1, 0.0  ;;  %v7550_v45 = vunpack.i.l.bf16 %v7549_v6  ;;  %v3590_v35 = vsel %vm3580_vm9, %v3569_v17, 0.0  ;;  %v3571_v2 = vmul.f32 %v7546_v43, %v3475_v33 }
 0x7f2   : > { %v3587_v18 = vadd.f32 %v3586_v52, %v3585_v11  ;;  %v7551_v3 = vunpack.i.h.bf16 %v7549_v6  ;;  %v3592_v10 = vsel %vm3580_vm9, %v3570_v19, 0.0  ;;  %v7555_v32 = vunpack.i.l.bf16 %v7554_v56 }
 0x7f3   : > { %v3572_v51 = vmul.f32 %v7550_v45, %v3476_v4  ;;  %v3594_v25 = vsel %vm3580_vm9, %v3571_v2, 0.0  ;;  %v7556_v34 = vunpack.i.h.bf16 %v7554_v56 }
 0x7f4   : > { %v3589_v58 = vadd.f32 %v3588_v30, %v3587_v18  ;;  %v7559_v44 = vpop.permute.xlu1 %7558  ;;  %v3573_v15 = vmul.f32 %v7551_v3, %v3477_v61  ;;  %v3574_v5 = vmul.f32 %v7555_v32, %v3478_v40  ;;  %v7564_v7 = vpop.permute.xlu0 %7563 }
 0x7f5   : > { %v3596_v62 = vsel %vm3580_vm9, %v3572_v51, 0.0  ;;  %v7560_v42 = vunpack.i.l.bf16 %v7559_v44  ;;  %v3575_v63 = vmul.f32 %v7556_v34, %v3479_v39  ;;  %v7561_v54 = vunpack.i.h.bf16 %v7559_v44 }
 0x7f6   : > { %v3591_v27 = vadd.f32 %v3590_v35, %v3589_v58  ;;  %v3598_v0 = vsel %vm3580_vm9, %v3573_v15, 0.0  ;;  %v3600_v23 = vsel %vm3580_vm9, %v3574_v5, 0.0  ;;  %v7565_v22 = vunpack.i.l.bf16 %v7564_v7 }
 0x7f7   : > { %v3576_v9 = vmul.f32 %v7560_v42, %v3480_v28  ;;  %v3602_v50 = vsel %vm3580_vm9, %v3575_v63, 0.0  ;;  %v3577_v41 = vmul.f32 %v7561_v54, %v3481_v53  ;;  %v7566_v14 = vunpack.i.h.bf16 %v7564_v7  ;;  %v3631_v54 = vld [vmem:[%s10217_s16 + $0x28] sm:$0xff]  ;;  %v3632_v53 = vld [vmem:[%s10217_s16 + $0x30] sm:$0xff] }
 0x7f8   : > { %v3593_v29 = vadd.f32 %v3592_v10, %v3591_v27  ;;  %v3578_v11 = vmul.f32 %v7565_v22, %v3482_v59  ;;  %v3927_v3 = vpop.permute.xlu1 %3926  ;;  %v3929_v27 = vpop.permute.xlu0 %3928 }
 0x7f9   : > { %v3604_v36 = vsel %vm3580_vm9, %v3576_v9, 0.0  ;;  %v3606_v12 = vsel %vm3580_vm9, %v3577_v41, 0.0  ;;  %v3579_v6 = vmul.f32 %v7566_v14, %v3483_v24 }
 0x7fa   : > { %v3595_v47 = vadd.f32 %v3594_v25, %v3593_v29  ;;  %v3608_v17 = vsel %vm3580_vm9, %v3578_v11, 0.0 }
 0x7fb   : > { %v3610_v18 = vsel %vm3580_vm9, %v3579_v6, 0.0 }
 0x7fc   : > { %v3597_v20 = vadd.f32 %v3596_v62, %v3595_v47  ;;  %v3923_v32 = vpop.permute.xlu1 %3922  ;;  %v3925_v29 = vpop.permute.xlu0 %3924 }
 0x7fe   : > { %v3599_v48 = vadd.f32 %v3598_v0, %v3597_v20 }
 0x800   : > { %v3601_v16 = vadd.f32 %v3600_v23, %v3599_v48  ;;  %v3919_v15 = vpop.permute.xlu1 %3918  ;;  %v3921_v34 = vpop.permute.xlu0 %3920 }
 0x802   : > { %v3603_v8 = vadd.f32 %v3602_v50, %v3601_v16 }
 0x804   : > { %v3605_v1 = vadd.f32 %v3604_v36, %v3603_v8  ;;  %v3915_v62 = vpop.permute.xlu1 %3914  ;;  %v3917_v20 = vpop.permute.xlu0 %3916 }
 0x806   : > { %v3607_v52 = vadd.f32 %v3606_v12, %v3605_v1 }
 0x808   : > { %v3609_v43 = vadd.f32 %v3608_v17, %v3607_v52  ;;  %v3895_v0 = vpop.permute.xlu1 %3894  ;;  %v3897_v22 = vpop.permute.xlu0 %3896 }
 0x80a   : > { %v3611_v33 = vadd.f32 %v3610_v18, %v3609_v43 }
 0x80c   : > { %v3612_v30 = vrot.slane %v3611_v33, 4  ;;  %v3891_v63 = vpop.permute.xlu1 %3890 }
 0x80e   : > { %v3613_v19 = vadd.f32 %v3612_v30, %v3611_v33 }
 0x810   : > { %v3614_v45 = vrot.slane %v3613_v19, 2  ;;  %v9064_v48 = vpop.permute.xlu1 %3886 }
 0x812   : > { %v3615_v58 = vadd.f32 %v3614_v45, %v3613_v19 }
 0x814   : > { %v3616_v4 = vrot.slane %v3615_v58, 1 }
 0x816   : > { %v8992_v56 = vadd.f32 %v3616_v4, %v3615_v58 }
 0x818   : > { %10220 = vst [vmem:[#allocation37_spill] sm:$0xff] %v8992_v56  ;;  %v8996_v35 = vmul.f32 %v8893_v46, %v8992_v56  ;;  %v9000_v2 = vmul.f32 %v8890_v37, %v8992_v56  ;;  %v3944_v61 = vmul.f32 %v3927_v3, %v8992_v56  ;;  %v3945_v10 = vmul.f32 %v3929_v27, %v8992_v56 }
 0x819   : > { %v9012_v37 = vmul.f32 %v8901_v57, %v8992_v56  ;;  %v9016_v51 = vmul.f32 %v8898_v55, %v8992_v56  ;;  %v3942_v40 = vmul.f32 %v3923_v32, %v8992_v56  ;;  %v3943_v44 = vmul.f32 %v3925_v29, %v8992_v56 }
 0x81a   : > { %3864 = vrot.lane.b32.xlu0 %v8996_v35, %s7833_s15  ;;  %3862 = vrot.lane.b32.xlu1 %v9000_v2, %s7833_s15  ;;  %v9028_v55 = vmul.f32 %v8910_v49, %v8992_v56  ;;  %v9032_v25 = vmul.f32 %v8907_v38, %v8992_v56  ;;  %v3940_v47 = vmul.f32 %v3919_v15, %v8992_v56 }
 0x81b   : > { %v3941_v39 = vmul.f32 %v3921_v34, %v8992_v56  ;;  %v9044_v5 = vmul.f32 %v8918_v31, %v8992_v56  ;;  %v9048_v42 = vmul.f32 %v8915_v13, %v8992_v56  ;;  %v3938_v28 = vmul.f32 %v3915_v62, %v8992_v56 }
 0x81c   : > { %v3939_v7 = vmul.f32 %v3917_v20, %v8992_v56  ;;  %v3912_v17 = vmul.f32 %v3895_v0, %v8992_v56  ;;  %v3913_v43 = vmul.f32 %v3897_v22, %v8992_v56  ;;  %v4161_v22 = vld [vmem:[%s10221_s0 + $0x78] sm:$0xff] }
 0x81e   : > { %3968 = vrot.lane.b32.xlu0 %v3945_v10, %s7833_s15  ;;  %3966 = vrot.lane.b32.xlu1 %v3944_v61, %s7833_s15 }
 0x822   : > { %3860 = vrot.lane.b32.xlu0 %v9012_v37, %s7833_s15  ;;  %3858 = vrot.lane.b32.xlu1 %v9016_v51, %s7833_s15 }
 0x826   : > { %3964 = vrot.lane.b32.xlu0 %v3943_v44, %s7833_s15  ;;  %3962 = vrot.lane.b32.xlu1 %v3942_v40, %s7833_s15 }
 0x82a   : > { %3856 = vrot.lane.b32.xlu0 %v9028_v55, %s7833_s15  ;;  %3854 = vrot.lane.b32.xlu1 %v9032_v25, %s7833_s15 }
 0x82e   : > { %3960 = vrot.lane.b32.xlu0 %v3941_v39, %s7833_s15  ;;  %3958 = vrot.lane.b32.xlu1 %v3940_v47, %s7833_s15 }
 0x832   : > { %3852 = vrot.lane.b32.xlu0 %v9044_v5, %s7833_s15  ;;  %3850 = vrot.lane.b32.xlu1 %v9048_v42, %s7833_s15 }
 0x836   : > { %3956 = vrot.lane.b32.xlu0 %v3939_v7, %s7833_s15  ;;  %3954 = vrot.lane.b32.xlu1 %v3938_v28, %s7833_s15  ;;  %s10254_s15 = sld [smem:[#allocation16_spill]] }
 0x83a   : > { %3687 = vperm.xlu0 %7568, %v8918_v31   ;;  %3739 = vperm.xlu1 %7575, %v8907_v38   ;;  %v9070_v38 = vpop.permute.xlu1 %3882 }
 0x83b   : > { %v3906_v7 = vmul.f32 %v9070_v38, %v8992_v56  ;;  %v3627_v38 = vld [vmem:[%s10217_s16 + $0x8] sm:$0xff] }
 0x83e   : > { %7578 = vset.pattern.permute.xlu0 %v10212_v60  ;;  %3743 = vperm.xlu1 %7575, %v8910_v49   ;;  %v9076_v23 = vpop.permute.xlu1 %3666 }
 0x83f   : > { %3671 = vperm.xlu0 %7578, %v8893_v46   ;;  %v3630_v46 = vld [vmem:[%s10217_s16 + $0x20] sm:$0xff] }
 0x842   : > { %7576 = vset.pattern.permute.xlu1 %v10212_v60 }
 0x843   : > { %3661 = vperm.xlu0 %7578, %v8901_v57   ;;  %3805 = vperm.xlu1 %7576, %v3631_v54   ;;  %v9081_v57 = vpop.permute.xlu1 %3707 }
 0x847   : > { %3810 = vperm.xlu0 %7578, %v3632_v53   ;;  %3636 = vperm.xlu1 %7576, %v8915_v13  }
 0x84b   : > { %3651 = vperm.xlu0 %7578, %v8910_v49   ;;  %7577 = vset.pattern.permute.xlu1 %v10216_v26  ;;  %v9085_v49 = vpop.permute.xlu1 %3755 }
 0x84c   : > { %3683 = vperm.xlu1 %7577, %v8915_v13  }
 0x84f   : > { %3800 = vperm.xlu0 %7578, %v3630_v46   ;;  %v9087_v26 = vpop.permute.xlu1 %3759  ;;  %v3626_v46 = vld [vmem:[%s10217_s16] sm:$0xff] }
 0x850   : > { %7579 = vset.pattern.permute.xlu1 %v10218_v21  ;;  %v3893_v21 = vpop.permute.xlu0 %3892 }
 0x851   : > { %3731 = vperm.xlu1 %7579, %v8915_v13   ;;  %v3911_v3 = vmul.f32 %v3893_v21, %v8992_v56  ;;  %v4160_v21 = vld [vmem:[%s10221_s0 + $0x70] sm:$0xff] }
 0x853   : > { %3641 = vperm.xlu0 %7578, %v8918_v31   ;;  %v9089_v9 = vpop.permute.xlu1 %3656 }
 0x854   : > { %v3889_v13 = vpop.permute.xlu0 %3888 }
 0x855   : > { %3735 = vperm.xlu1 %7579, %v8918_v31   ;;  %v3909_v15 = vmul.f32 %v3889_v13, %v8992_v56  ;;  %v4159_v13 = vld [vmem:[%s10221_s0 + $0x68] sm:$0xff] }
 0x857   : > { %v9091_v16 = vpop.permute.xlu1 %3699 }
 0x858   : > { %v3885_v41 = vpop.permute.xlu0 %3884 }
 0x859   : > { %7580 = vset.pattern.permute.xlu1 %v10212_v60  ;;  %v3907_v0 = vmul.f32 %v3885_v41, %v8992_v56  ;;  %v4158_v41 = vld [vmem:[%s10221_s0 + $0x60] sm:$0xff] }
 0x85b   : > { %v9093_v59 = vpop.permute.xlu1 %3747 }
 0x85c   : > { %v9099_v31 = vpop.permute.xlu0 %3711 }
 0x85f   : > { %v9095_v50 = vpop.permute.xlu1 %3751 }
 0x860   : > { %v9103_v24 = vpop.permute.xlu0 %3703 }
 0x863   : > { %v9097_v14 = vpop.permute.xlu1 %3815 }
 0x864   : > { %v9107_v11 = vpop.permute.xlu0 %3695 }
 0x867   : > { %v9101_v8 = vpop.permute.xlu1 %3646 }
 0x86b   : > { %v9105_v36 = vpop.permute.xlu1 %3691 }
 0x88c   : > { %v3865_v1 = vpop.permute.xlu0 %3864  ;;  %v3863_v12 = vpop.permute.xlu1 %3862 }
 0x88d   : > { %v3881_v6 = vadd.f32 %v3865_v1, %v8996_v35  ;;  %v3880_v52 = vadd.f32 %v3863_v12, %v9000_v2  ;;  %v3910_v2 = vmul.f32 %v3891_v63, %v8992_v56  ;;  %v4157_v1 = vld [vmem:[%s10221_s0 + $0x58] sm:$0xff]  ;;  %v4156_v12 = vld [vmem:[%s10221_s0 + $0x50] sm:$0xff] }
 0x88f   : > { %4023 = vperm.xlu0 %7578, %v3881_v6   ;;  %4018 = vperm.xlu1 %7580, %v3880_v52   ;;  %v4155_v6 = vld [vmem:[%s10221_s0 + $0x48] sm:$0xff]  ;;  %v4154_v52 = vld [vmem:[%s10221_s0 + $0x40] sm:$0xff] }
 0x890   : > { %v3969_v18 = vpop.permute.xlu0 %3968  ;;  %v3967_v33 = vpop.permute.xlu1 %3966 }
 0x891   : > { %v3985_v30 = vsub.f32 %v3913_v43, %v3969_v18  ;;  %v3984_v19 = vsub.f32 %v3912_v17, %v3967_v33  ;;  %v4153_v17 = vld [vmem:[%s10221_s0 + $0x38] sm:$0xff]  ;;  %v4152_v43 = vld [vmem:[%s10221_s0 + $0x30] sm:$0xff]  ;;  %v4151_v18 = vld [vmem:[%s10221_s0 + $0x28] sm:$0xff] }
 0x892   : > { %v4150_v33 = vld [vmem:[%s10221_s0 + $0x20] sm:$0xff] }
 0x893   : > { %4071 = vperm.xlu0 %7578, %v3985_v30   ;;  %4066 = vperm.xlu1 %7580, %v3984_v19   ;;  %v4149_v30 = vld [vmem:[%s10221_s0 + $0x18] sm:$0xff]  ;;  %v4148_v19 = vld [vmem:[%s10221_s0 + $0x10] sm:$0xff] }
 0x894   : > { %v3861_v45 = vpop.permute.xlu0 %3860  ;;  %v3859_v58 = vpop.permute.xlu1 %3858 }
 0x895   : > { %v3879_v4 = vadd.f32 %v3861_v45, %v9012_v37  ;;  %v3878_v35 = vadd.f32 %v3859_v58, %v9016_v51  ;;  %v3908_v51 = vmul.f32 %v9064_v48, %v8992_v56  ;;  %v4147_v45 = vld [vmem:[%s10221_s0 + $0x8] sm:$0xff]  ;;  %v4146_v58 = vld [vmem:[%s10221_s0] sm:$0xff]  ;;  %s10257_s0 = sld [smem:[#allocation17_spill]] }
 0x897   : > { %4008 = vperm.xlu0 %7578, %v3878_v35   ;;  %4013 = vperm.xlu1 %7580, %v3879_v4   ;;  %v4530_v4 = vld [vmem:[%s10222_s26 + $0xf8] sm:$0xff]  ;;  %v4529_v35 = vld [vmem:[%s10222_s26 + $0xf0] sm:$0xff] }
 0x898   : > { %v3965_v27 = vpop.permute.xlu0 %3964  ;;  %v3963_v61 = vpop.permute.xlu1 %3962 }
 0x899   : > { %v3983_v10 = vsub.f32 %v3911_v3, %v3965_v27  ;;  %v3982_v32 = vsub.f32 %v3910_v2, %v3963_v61  ;;  %v4514_v2 = vld [vmem:[%s10222_s26 + $0x78] sm:$0xff]  ;;  %v4513_v3 = vld [vmem:[%s10222_s26 + $0x70] sm:$0xff]  ;;  %v4528_v27 = vld [vmem:[%s10222_s26 + $0xe8] sm:$0xff] }
 0x89a   : > { %v4527_v61 = vld [vmem:[%s10222_s26 + $0xe0] sm:$0xff] }
 0x89b   : > { %4061 = vperm.xlu0 %7578, %v3983_v10   ;;  %4056 = vperm.xlu1 %7580, %v3982_v32   ;;  %v4512_v10 = vld [vmem:[%s10222_s26 + $0x68] sm:$0xff]  ;;  %v4511_v32 = vld [vmem:[%s10222_s26 + $0x60] sm:$0xff] }
 0x89c   : > { %v3857_v29 = vpop.permute.xlu0 %3856  ;;  %v3855_v40 = vpop.permute.xlu1 %3854 }
 0x89d   : > { %v3877_v44 = vadd.f32 %v3857_v29, %v9028_v55  ;;  %v3876_v37 = vadd.f32 %v3855_v40, %v9032_v25 }
 0x89f   : > { %4003 = vperm.xlu0 %7578, %v3877_v44   ;;  %3998 = vperm.xlu1 %7580, %v3876_v37   ;;  %v4526_v44 = vld [vmem:[%s10222_s26 + $0xd8] sm:$0xff]  ;;  %v4525_v37 = vld [vmem:[%s10222_s26 + $0xd0] sm:$0xff] }
 0x8a0   : > { %v3961_v34 = vpop.permute.xlu0 %3960  ;;  %v3959_v47 = vpop.permute.xlu1 %3958 }
 0x8a1   : > { %v3981_v39 = vsub.f32 %v3909_v15, %v3961_v34  ;;  %v3980_v62 = vsub.f32 %v3908_v51, %v3959_v47  ;;  %v4510_v34 = vld [vmem:[%s10222_s26 + $0x58] sm:$0xff]  ;;  %v4509_v47 = vld [vmem:[%s10222_s26 + $0x50] sm:$0xff] }
 0x8a3   : > { %4051 = vperm.xlu0 %7578, %v3981_v39   ;;  %4046 = vperm.xlu1 %7580, %v3980_v62   ;;  %v4524_v39 = vld [vmem:[%s10222_s26 + $0xc8] sm:$0xff]  ;;  %v4523_v62 = vld [vmem:[%s10222_s26 + $0xc0] sm:$0xff] }
 0x8a4   : > { %v3853_v20 = vpop.permute.xlu0 %3852  ;;  %v3851_v28 = vpop.permute.xlu1 %3850 }
 0x8a5   : > { %v3875_v55 = vadd.f32 %v3853_v20, %v9044_v5  ;;  %v3874_v25 = vadd.f32 %v3851_v28, %v9048_v42  ;;  %v3628_v5 = vld [vmem:[%s10217_s16 + $0x10] sm:$0xff]  ;;  %v3629_v42 = vld [vmem:[%s10217_s16 + $0x18] sm:$0xff] }
 0x8a7   : > { %3993 = vperm.xlu0 %7578, %v3875_v55   ;;  %3988 = vperm.xlu1 %7580, %v3874_v25   ;;  %v4508_v55 = vld [vmem:[%s10222_s26 + $0x48] sm:$0xff]  ;;  %v4507_v25 = vld [vmem:[%s10222_s26 + $0x40] sm:$0xff] }
 0x8a8   : > { %v3957_v63 = vpop.permute.xlu0 %3956  ;;  %v3955_v54 = vpop.permute.xlu1 %3954 }
 0x8a9   : > { %v3979_v48 = vsub.f32 %v3907_v0, %v3957_v63  ;;  %v3978_v53 = vsub.f32 %v3906_v7, %v3955_v54  ;;  %v4522_v63 = vld [vmem:[%s10222_s26 + $0xb8] sm:$0xff]  ;;  %v4521_v54 = vld [vmem:[%s10222_s26 + $0xb0] sm:$0xff] }
 0x8ab   : > { %4041 = vperm.xlu0 %7578, %v3979_v48   ;;  %4036 = vperm.xlu1 %7580, %v3978_v53   ;;  %v4506_v48 = vld [vmem:[%s10222_s26 + $0x38] sm:$0xff]  ;;  %v4505_v53 = vld [vmem:[%s10222_s26 + $0x30] sm:$0xff] }
 0x8af   : > { %3790 = vperm.xlu0 %7578, %v3628_v5   ;;  %3795 = vperm.xlu1 %7580, %v3629_v42  }
 0x8b3   : > { %3785 = vperm.xlu0 %7578, %v3627_v38   ;;  %3780 = vperm.xlu1 %7580, %v3626_v46   ;;  %v4520_v38 = vld [vmem:[%s10222_s26 + $0xa8] sm:$0xff]  ;;  %v4519_v46 = vld [vmem:[%s10222_s26 + $0xa0] sm:$0xff] }
 0x8b5   : > { %v9155_v29 = vpop.permute.xlu0 %3687  ;;  %v9157_v40 = vpop.permute.xlu1 %3739 }
 0x8b7   : > { %4239 = vperm.xlu0 %7578, %v4161_v22   ;;  %4234 = vperm.xlu1 %7580, %v4160_v21  }
 0x8b9   : > { %v9161_v15 = vpop.permute.xlu1 %3743 }
 0x8ba   : > { %v3672_v51 = vpop.permute.xlu0 %3671 }
 0x8bb   : > { %4229 = vperm.xlu0 %7578, %v4159_v13   ;;  %4224 = vperm.xlu1 %7580, %v4158_v41   ;;  %v4504_v13 = vld [vmem:[%s10222_s26 + $0x28] sm:$0xff]  ;;  %v4503_v41 = vld [vmem:[%s10222_s26 + $0x20] sm:$0xff] }
 0x8be   : > { %v9167_v20 = vpop.permute.xlu0 %3661  ;;  %v9169_v28 = vpop.permute.xlu1 %3805 }
 0x8bf   : > { %4219 = vperm.xlu0 %7578, %v4157_v1   ;;  %4214 = vperm.xlu1 %7580, %v4156_v12   ;;  %v4518_v1 = vld [vmem:[%s10222_s26 + $0x98] sm:$0xff]  ;;  %v4517_v12 = vld [vmem:[%s10222_s26 + $0x90] sm:$0xff] }
 0x8c2   : > { %v9173_v7 = vpop.permute.xlu0 %3810  ;;  %v9175_v0 = vpop.permute.xlu1 %3636 }
 0x8c3   : > { %4209 = vperm.xlu0 %7578, %v4155_v6   ;;  %4204 = vperm.xlu1 %7580, %v4154_v52  }
 0x8c6   : > { %v9181_v5 = vpop.permute.xlu0 %3651 }
 0x8c7   : > { %4199 = vperm.xlu0 %7578, %v4153_v17   ;;  %4194 = vperm.xlu1 %7580, %v4152_v43   ;;  %v9183_v42 = vpop.permute.xlu1 %3683  ;;  %v10223_v17 = vld [vmem:[#allocation23_spill] sm:$0xff] }
 0x8c8   : > { %v3720_v43 = vmul.f32 %v9081_v57, %v10223_v17  ;;  %v4516_v57 = vld [vmem:[%s10222_s26 + $0x88] sm:$0xff] }
 0x8ca   : > { %v9187_v22 = vpop.permute.xlu0 %3800 }
 0x8cb   : > { %4189 = vperm.xlu0 %7578, %v4151_v18   ;;  %4184 = vperm.xlu1 %7580, %v4150_v33   ;;  %v10224_v18 = vld [vmem:[#allocation25_spill] sm:$0xff] }
 0x8cc   : > { %v9189_v21 = vpop.permute.xlu1 %3731  ;;  %v3681_v33 = vmul.f32 %v3672_v51, %v10224_v18 }
 0x8ce   : > { %v9195_v6 = vpop.permute.xlu0 %3641 }
 0x8cf   : > { %4179 = vperm.xlu0 %7578, %v4149_v30   ;;  %4174 = vperm.xlu1 %7580, %v4148_v19   ;;  %v4502_v30 = vld [vmem:[%s10222_s26 + $0x18] sm:$0xff]  ;;  %v4501_v19 = vld [vmem:[%s10222_s26 + $0x10] sm:$0xff] }
 0x8d0   : > { %v9197_v52 = vpop.permute.xlu1 %3735 }
 0x8d3   : > { %4169 = vperm.xlu0 %7578, %v4147_v45   ;;  %4164 = vperm.xlu1 %7580, %v4146_v58   ;;  %v3680_v45 = vmul.f32 %v9076_v23, %v10224_v18  ;;  %v10225_v58 = vld [vmem:[#allocation27_spill] sm:$0xff]  ;;  %v10226_v23 = vld [vmem:[#allocation26_spill] sm:$0xff] }
 0x8d7   : > { %4688 = vperm.xlu0 %7578, %v4530_v4   ;;  %4683 = vperm.xlu1 %7580, %v4529_v35   ;;  %v3768_v4 = vmul.f32 %v9085_v49, %v10225_v58  ;;  %v3721_v35 = vmul.f32 %v9099_v31, %v10223_v17 }
 0x8db   : > { %4608 = vperm.xlu0 %7578, %v4514_v2   ;;  %4603 = vperm.xlu1 %7580, %v4513_v3  }
 0x8df   : > { %4678 = vperm.xlu0 %7578, %v4528_v27   ;;  %4673 = vperm.xlu1 %7580, %v4527_v61   ;;  %v3728_v27 = vadd.f32 %v3720_v43, %v3680_v45  ;;  %v3729_v61 = vadd.f32 %v3721_v35, %v3681_v33 }
 0x8e3   : > { %4598 = vperm.xlu0 %7578, %v4512_v10   ;;  %4593 = vperm.xlu1 %7580, %v4511_v32   ;;  %v4515_v10 = vld [vmem:[%s10222_s26 + $0x80] sm:$0xff]  ;;  %v3769_v32 = vmul.f32 %v9087_v26, %v10225_v58 }
 0x8e7   : > { %4668 = vperm.xlu0 %7578, %v4526_v44   ;;  %4663 = vperm.xlu1 %7580, %v4525_v37   ;;  %v3776_v44 = vadd.f32 %v3768_v4, %v3728_v27 }
 0x8eb   : > { %4588 = vperm.xlu0 %7578, %v4510_v34   ;;  %4583 = vperm.xlu1 %7580, %v4509_v47   ;;  %v10227_v47 = vld [vmem:[#allocation24_spill] sm:$0xff] }
 0x8ef   : > { %4658 = vperm.xlu0 %7578, %v4524_v39   ;;  %4653 = vperm.xlu1 %7580, %v4523_v62  }
 0x8f3   : > { %4578 = vperm.xlu0 %7578, %v4508_v55   ;;  %4573 = vperm.xlu1 %7580, %v4507_v25   ;;  %v3678_v55 = vmul.f32 %v9089_v9, %v10224_v18  ;;  %v3718_v25 = vmul.f32 %v9091_v16, %v10223_v17  ;;  %v3719_v9 = vmul.f32 %v9103_v24, %v10223_v17 }
 0x8f4   : > { %v3767_v24 = vmul.f32 %v9095_v50, %v10225_v58 }
 0x8f7   : > { %4648 = vperm.xlu0 %7578, %v4522_v63   ;;  %4643 = vperm.xlu1 %7580, %v4521_v54   ;;  %v3777_v63 = vadd.f32 %v3769_v32, %v3729_v61  ;;  %v3679_v54 = vmul.f32 %v9167_v20, %v10224_v18  ;;  %v3726_v20 = vadd.f32 %v3718_v25, %v3678_v55 }
 0x8fb   : > { %4568 = vperm.xlu0 %7578, %v4506_v48   ;;  %4563 = vperm.xlu1 %7580, %v4505_v53   ;;  %v4500_v48 = vld [vmem:[%s10222_s26 + $0x8] sm:$0xff]  ;;  %v10228_v53 = vld [vmem:[#allocation28_spill] sm:$0xff] }
 0x8ff   : > { %4638 = vperm.xlu0 %7578, %v4520_v38   ;;  %4633 = vperm.xlu1 %7580, %v4519_v46   ;;  %v4096_v38 = vmul.f32 %v9085_v49, %v10228_v53  ;;  %v4097_v46 = vmul.f32 %v9087_v26, %v10228_v53  ;;  %v3766_v49 = vmul.f32 %v9093_v59, %v10225_v58 }
 0x900   : > { %v3727_v26 = vadd.f32 %v3719_v9, %v3679_v54 }
 0x903   : > { %4558 = vperm.xlu0 %7578, %v4504_v13   ;;  %4553 = vperm.xlu1 %7580, %v4503_v41  }
 0x907   : > { %4628 = vperm.xlu0 %7578, %v4518_v1   ;;  %4623 = vperm.xlu1 %7580, %v4517_v12   ;;  %v4499_v1 = vld [vmem:[%s10222_s26] sm:$0xff]  ;;  %v3824_v12 = vadd.f32 %v9173_v7, %v3776_v44 }
 0x909   : > { %v3832_v35 = vmax.f32 %v3824_v12, 0.0 }
 0x90a   : > { %v4024_v2 = vpop.permute.xlu0 %4023  ;;  %v4019_v3 = vpop.permute.xlu1 %4018 }
 0x90b   : > { %4548 = vperm.xlu0 %7578, %v4502_v30   ;;  %4543 = vperm.xlu1 %7580, %v4501_v19   ;;  %v4033_v37 = vmul.f32 %v4024_v2, %v10226_v23  ;;  %v4032_v31 = vmul.f32 %v4019_v3, %v10226_v23  ;;  %v3825_v19 = vadd.f32 %v9097_v14, %v3777_v63 }
 0x90e   : > { %v4072_v51 = vpop.permute.xlu0 %4071  ;;  %v4067_v34 = vpop.permute.xlu1 %4066 }
 0x90f   : > { %v4081_v39 = vmul.f32 %v4072_v51, %v10227_v47  ;;  %v4080_v62 = vmul.f32 %v4067_v34, %v10227_v47  ;;  %4618 = vperm.xlu0 %7578, %v4516_v57   ;;  %4613 = vperm.xlu1 %7580, %v4515_v10   ;;  %v3774_v51 = vadd.f32 %v3766_v49, %v3726_v20 }
 0x910   : > { %v4095_v34 = vmul.f32 %v9095_v50, %v10228_v53  ;;  %v3717_v49 = vmul.f32 %v9107_v11, %v10223_v17  ;;  %v3675_v11 = vmul.f32 %v9195_v6, %v10224_v18 }
 0x911   : > { %v4089_v13 = vadd.f32 %v4081_v39, %v4033_v37  ;;  %v4088_v41 = vadd.f32 %v4080_v62, %v4032_v31  ;;  %v3833_v37 = vmax.f32 %v3825_v19, 0.0  ;;  %v3822_v25 = vadd.f32 %v9187_v22, %v3774_v51 }
 0x912   : > { %v4009_v16 = vpop.permute.xlu0 %4008  ;;  %v4014_v43 = vpop.permute.xlu1 %4013  ;;  %v3764_v19 = vmul.f32 %v9157_v40, %v10225_v58 }
 0x913   : > { %v4105_v33 = vadd.f32 %v4097_v46, %v4089_v13  ;;  %v4104_v30 = vadd.f32 %v4096_v38, %v4088_v41  ;;  %4538 = vperm.xlu0 %7578, %v4500_v48   ;;  %4533 = vperm.xlu1 %7580, %v4499_v1   ;;  %v4030_v2 = vmul.f32 %v4009_v16, %v10226_v23  ;;  %v3830_v41 = vmax.f32 %v3822_v25, 0.0 }
 0x914   : > { %v4031_v3 = vmul.f32 %v4014_v43, %v10226_v23  ;;  %v4144_v55 = vpack.c.bf16 %v3833_v37, %v3832_v35  ;;  %v3676_v16 = vmul.f32 %v9101_v8, %v10224_v18  ;;  %v3716_v43 = vmul.f32 %v9105_v36, %v10223_v17 }
 0x915   : > { %v4112_v45 = vadd.f32 %v4104_v30, %v9173_v7  ;;  %v4113_v4 = vadd.f32 %v4105_v33, %v9097_v14  ;;  %v4094_v7 = vmul.f32 %v9093_v59, %v10228_v53  ;;  %v3775_v14 = vadd.f32 %v3767_v24, %v3727_v26 }
 0x916   : > { %v4062_v27 = vpop.permute.xlu0 %4061  ;;  %v4057_v61 = vpop.permute.xlu1 %4056  ;;  %v3677_v30 = vmul.f32 %v9181_v5, %v10224_v18  ;;  %v3674_v36 = vmul.f32 %v9175_v0, %v10224_v18  ;;  %v3714_v5 = vmul.f32 %v9183_v42, %v10223_v17  ;;  %v3724_v35 = vadd.f32 %v3716_v43, %v3676_v16 }
 0x917   : > { %v4079_v57 = vmul.f32 %v4062_v27, %v10227_v47  ;;  %v4078_v10 = vmul.f32 %v4057_v61, %v10227_v47  ;;  %v4120_v32 = vmax.f32 %v4112_v45, 0.0  ;;  %v4121_v44 = vmax.f32 %v4113_v4, 0.0 }
 0x918   : > { %v3823_v46 = vadd.f32 %v9169_v28, %v3775_v14  ;;  %v3715_v0 = vmul.f32 %v9155_v29, %v10223_v17  ;;  %v4092_v42 = vmul.f32 %v9157_v40, %v10228_v53  ;;  %v3722_v6 = vadd.f32 %v3714_v5, %v3674_v36  ;;  %v7662_v36 = vld [vmem:[%s10229_s28 + $0x18] sm:$0xff]   ;;  %v7663_v5 = vld [vmem:[%s10229_s28 + $0x20] sm:$0xff]  }
 0x919   : > { %v4087_v31 = vadd.f32 %v4079_v57, %v4031_v3  ;;  %v4086_v39 = vadd.f32 %v4078_v10, %v4030_v2  ;;  %v4145_v62 = vpack.c.bf16 %v4121_v44, %v4120_v32  ;;  %v3765_v2 = vmul.f32 %v9161_v15, %v10225_v58 }
 0x91a   : > { %v4004_v63 = vpop.permute.xlu0 %4003  ;;  %v3999_v54 = vpop.permute.xlu1 %3998  ;;  %v3831_v33 = vmax.f32 %v3823_v46, 0.0  ;;  %v3725_v3 = vadd.f32 %v3717_v49, %v3677_v30  ;;  %v4093_v57 = vmul.f32 %v9161_v15, %v10228_v53  ;;  %v3772_v44 = vadd.f32 %v3764_v19, %v3724_v35  ;;  %v7666_v35 = vld [vmem:[%s10229_s28 + $0x38] sm:$0xff]  }
 0x91b   : > { %v4103_v48 = vadd.f32 %v4095_v34, %v4087_v31  ;;  %v4102_v38 = vadd.f32 %v4094_v7, %v4086_v39  ;;  %4314 = vmatprep.subr.bf16.mxu0 %v4145_v62  ;;  %v4029_v4 = vmul.f32 %v4004_v63, %v10226_v23  ;;  %v4028_v24 = vmul.f32 %v3999_v54, %v10226_v23 }
 0x91c   : > { %4315 = vmatpush1.bf16.msra.mxu0 %v4144_v55  ;;  %v4142_v26 = vpack.c.bf16 %v3831_v33, %v3830_v41  ;;  %v3762_v37 = vmul.f32 %v9189_v21, %v10225_v58  ;;  %v3723_v29 = vadd.f32 %v3715_v0, %v3675_v11  ;;  %v3763_v40 = vmul.f32 %v9197_v52, %v10225_v58  ;;  %v7667_v11 = vld [vmem:[%s7908_s6 + $0x10] sm:$0xff]  }
 0x91d   : > { %v4110_v59 = vadd.f32 %v4102_v38, %v9187_v22  ;;  %v4111_v13 = vadd.f32 %v4103_v48, %v9169_v28  ;;  %v3773_v34 = vadd.f32 %v3765_v2, %v3725_v3  ;;  %v4091_v39 = vmul.f32 %v9197_v52, %v10228_v53  ;;  %v7668_v2 = vld [vmem:[%s7908_s6 + $0x18] sm:$0xff]   ;;  %7362 = vmatprep.mubr.msk.bf16.mxu1 %vm1557_vm0, %v7667_v11  ;;  %v7669_v3 = vld [vmem:[%s7908_s6 + $0x20] sm:$0xff]  }
 0x91e   : > { %v4052_v50 = vpop.permute.xlu0 %4051  ;;  %v4047_v1 = vpop.permute.xlu1 %4046  ;;  %v4090_v38 = vmul.f32 %v9189_v21, %v10228_v53  ;;  %v3771_v58 = vadd.f32 %v3763_v40, %v3723_v29  ;;  %7363 = vmatmul.mubr.msk.bf16.gmra.mxu1 %vm1557_vm0, %v7668_v2 }
 0x91f   : > { %v4118_v9 = vmax.f32 %v4110_v59, 0.0  ;;  %v4119_v12 = vmax.f32 %v4111_v13, 0.0  ;;  %v4077_v20 = vmul.f32 %v4052_v50, %v10227_v47  ;;  %v4076_v22 = vmul.f32 %v4047_v1, %v10227_v47  ;;  %7366 = vmatprep.mubr.msk.bf16.mxu1 %vm1557_vm0, %v7669_v3 }
 0x921   : > { %v4143_v28 = vpack.c.bf16 %v4119_v12, %v4118_v9  ;;  %v4085_v27 = vadd.f32 %v4077_v20, %v4029_v4  ;;  %v4084_v61 = vadd.f32 %v4076_v22, %v4028_v24  ;;  %v7664_v4 = vld [vmem:[%s10229_s28 + $0x28] sm:$0xff]   ;;  %v7665_v24 = vld [vmem:[%s10229_s28 + $0x30] sm:$0xff]  }
 0x922   : > { %v3994_v8 = vpop.permute.xlu0 %3993  ;;  %v3989_v45 = vpop.permute.xlu1 %3988 }
 0x923   : > { %4316 = vmatprep.subr.bf16.mxu0 %v4143_v28  ;;  %v4027_v18 = vmul.f32 %v3994_v8, %v10226_v23  ;;  %v4026_v17 = vmul.f32 %v3989_v45, %v10226_v23  ;;  %v4100_v51 = vadd.f32 %v4092_v42, %v4084_v61  ;;  %v4101_v31 = vadd.f32 %v4093_v57, %v4085_v27  ;;  %v7660_v8 = vld [vmem:[%s10229_s28 + $0x8] sm:$0xff]   ;;  %v7661_v45 = vld [vmem:[%s10229_s28 + $0x10] sm:$0xff]   ;;  %v7672_v42 = vld [vmem:[%s7908_s6 + $0x38] sm:$0xff]  }
 0x924   : > { %4317 = vmatpush1.bf16.msra.mxu0 %v4142_v26  ;;  %v3770_v23 = vadd.f32 %v3762_v37, %v3722_v6  ;;  %v7659_v26 = vld [vmem:[%s10229_s28] sm:$0xff]   ;;  %v7670_v27 = vld [vmem:[%s7908_s6 + $0x28] sm:$0xff]   ;;  %v7671_v61 = vld [vmem:[%s7908_s6 + $0x30] sm:$0xff]  }
 0x926   : > { %v4042_v10 = vpop.permute.xlu0 %4041  ;;  %v4037_v32 = vpop.permute.xlu1 %4036  ;;  %7367 = vmatmul.mubr.msk.bf16.gmra.mxu1 %vm1557_vm0, %v7670_v27 }
 0x927   : > { %v4075_v7 = vmul.f32 %v4042_v10, %v10227_v47  ;;  %v4074_v14 = vmul.f32 %v4037_v32, %v10227_v47  ;;  %7370 = vmatprep.mubr.msk.bf16.mxu1 %vm1557_vm0, %v7671_v61 }
 0x929   : > { %v4083_v15 = vadd.f32 %v4075_v7, %v4027_v18  ;;  %v4082_v62 = vadd.f32 %v4074_v14, %v4026_v17 }
 0x92a   : > { %v3791_v55 = vpop.permute.xlu0 %3790  ;;  %v3796_v25 = vpop.permute.xlu1 %3795 }
 0x92b   : > { %v3820_v47 = vadd.f32 %v3791_v55, %v3772_v44  ;;  %v4108_v63 = vadd.f32 %v4100_v51, %v3791_v55  ;;  %v3821_v54 = vadd.f32 %v3796_v25, %v3773_v34  ;;  %v4109_v48 = vadd.f32 %v4101_v31, %v3796_v25 }
 0x92c   : > { %v4099_v46 = vadd.f32 %v4091_v39, %v4083_v15  ;;  %v4098_v9 = vadd.f32 %v4090_v38, %v4082_v62 }
 0x92d   : > { %v3828_v59 = vmax.f32 %v3820_v47, 0.0  ;;  %v4116_v13 = vmax.f32 %v4108_v63, 0.0  ;;  %v3829_v41 = vmax.f32 %v3821_v54, 0.0  ;;  %v4117_v50 = vmax.f32 %v4109_v48, 0.0 }
 0x92e   : > { %v3786_v1 = vpop.permute.xlu0 %3785  ;;  %v3781_v52 = vpop.permute.xlu1 %3780  ;;  %7371 = vmatmul.mubr.msk.bf16.gmra.mxu1 %vm1557_vm0, %v7672_v42 }
 0x92f   : > { %v4140_v12 = vpack.c.bf16 %v3829_v41, %v3828_v59  ;;  %v3819_v16 = vadd.f32 %v3786_v1, %v3771_v58  ;;  %v4107_v43 = vadd.f32 %v4099_v46, %v3786_v1  ;;  %v3818_v33 = vadd.f32 %v3781_v52, %v3770_v23  ;;  %4819 = vmatprep.mubr.bf16.mxu1 %v10212_v60 }
 0x930   : > { %v4106_v30 = vadd.f32 %v4098_v9, %v3781_v52  ;;  %v4141_v20 = vpack.c.bf16 %v4117_v50, %v4116_v13 }
 0x931   : > { %v3827_v22 = vmax.f32 %v3819_v16, 0.0  ;;  %v4115_v21 = vmax.f32 %v4107_v43, 0.0  ;;  %v3826_v53 = vmax.f32 %v3818_v33, 0.0 }
 0x932   : > { %v4114_v28 = vmax.f32 %v4106_v30, 0.0  ;;  %4318 = vmatprep.subr.bf16.mxu0 %v4141_v20  ;;  %v9324_v0 = vpop.permute.xlu1 %4234  ;;  %v9328_v57 = vpop.permute.xlu0 %4239 }
 0x933   : > { %v4138_v49 = vpack.c.bf16 %v3827_v22, %v3826_v53  ;;  %4319 = vmatpush1.bf16.msra.mxu0 %v4140_v12 }
 0x934   : > { %v4139_v19 = vpack.c.bf16 %v4115_v21, %v4114_v28 }
 0x936   : > { %4320 = vmatprep.subr.bf16.mxu0 %v4139_v19  ;;  %v9332_v10 = vpop.permute.xlu1 %4224  ;;  %v4230_v32 = vpop.permute.xlu0 %4229 }
 0x937   : > { %4321 = vmatpush1.bf16.msra.mxu0 %v4138_v49 }
 0x93a   : > { %6810 = vmatmul.mubr.msk.bf16.vlgmr.msra.gmra.mxu0 %vm1557_vm0, %v7659_v26  ;;  %v9334_v44 = vpop.permute.xlu1 %4214  ;;  %v9336_v6 = vpop.permute.xlu0 %4219 }
 0x93b   : > { %4348 = vmatprep.mubr.bf16.mxu0 %v10212_v60 }
 0x93e   : > { %v9338_v18 = vpop.permute.xlu1 %4204  ;;  %v9340_v7 = vpop.permute.xlu0 %4209 }
 0x942   : > { %6811 = vmatmul.mubr.msk.bf16.gmra.mxu0 %vm1557_vm0, %v7660_v8  ;;  %v9342_v14 = vpop.permute.xlu1 %4194  ;;  %v9344_v37 = vpop.permute.xlu0 %4199 }
 0x943   : > { %4358 = vmatprep.mubr.bf16.mxu0 %v10212_v60 }
 0x946   : > { %v9346_v29 = vpop.permute.xlu1 %4184  ;;  %v9348_v40 = vpop.permute.xlu0 %4189 }
 0x94a   : > { %6812 = vmatmul.mubr.msk.bf16.gmra.mxu0 %vm1557_vm0, %v7661_v45  ;;  %v9350_v17 = vpop.permute.xlu1 %4174  ;;  %v9352_v15 = vpop.permute.xlu0 %4179 }
 0x94b   : > { %4368 = vmatprep.mubr.bf16.mxu0 %v10212_v60 }
 0x94e   : > { %v9354_v34 = vpop.permute.xlu1 %4164  ;;  %v9359_v62 = vpop.permute.xlu0 %4169 }
 0x952   : > { %6813 = vmatmul.mubr.msk.bf16.gmra.mxu0 %vm1557_vm0, %v7662_v36 }
 0x953   : > { %4378 = vmatprep.mubr.bf16.mxu0 %v10212_v60 }
 0x95a   : > { %6814 = vmatmul.mubr.msk.bf16.gmra.mxu0 %vm1557_vm0, %v7663_v5 }
 0x95b   : > { %4388 = vmatprep.mubr.bf16.mxu0 %v10212_v60 }
 0x962   : > { %6815 = vmatmul.mubr.msk.bf16.gmra.mxu0 %vm1557_vm0, %v7664_v4 }
 0x963   : > { %4398 = vmatprep.mubr.bf16.mxu0 %v10212_v60 }
 0x96a   : > { %6816 = vmatmul.mubr.msk.bf16.gmra.mxu0 %vm1557_vm0, %v7665_v24 }
 0x96b   : > { %4408 = vmatprep.mubr.bf16.mxu0 %v10212_v60 }
 0x972   : > { %6817 = vmatmul.mubr.msk.bf16.gmra.mxu0 %vm1557_vm0, %v7666_v35 }
 0x9fa   : > { %v4340_v51 = vpop.f32.mrf.mxu0 }
 0x9fb   : > { %v4341_v39 = vadd.f32 %v4340_v51, %v9354_v34 }
 0x9fc   : > { %v9356_v31 = vpop.f32.mrf.mxu0 }
 0x9fd   : > { %v4419_v63 = vmax.f32 %v4341_v39, 0.0 }
 0x9fe   : > { %v4344_v55 = vpop.f32.mrf.mxu0 }
 0x9ff   : > { %v4345_v25 = vadd.f32 %v4344_v55, %v9359_v62 }
 0xa00   : > { %v9362_v47 = vpop.f32.mrf.mxu0 }
 0xa01   : > { %v4421_v54 = vmax.f32 %v4345_v25, 0.0 }
 0xa02   : > { %v4350_v48 = vpop.f32.mrf.mxu0 }
 0xa03   : > { %v9364_v38 = vpack.c.bf16 %v4421_v54, %v4419_v63  ;;  %v4351_v46 = vadd.f32 %v4350_v48, %v9350_v17 }
 0xa04   : > { %v9366_v58 = vpop.f32.mrf.mxu0 }
 0xa05   : > { %v4423_v41 = vmax.f32 %v4351_v46, 0.0 }
 0xa06   : > { %v4354_v23 = vpop.f32.mrf.mxu0 }
 0xa07   : > { %v4355_v59 = vadd.f32 %v4354_v23, %v9352_v15 }
 0xa08   : > { %v9370_v13 = vpop.f32.mrf.mxu0 }
 0xa09   : > { %v4425_v50 = vmax.f32 %v4355_v59, 0.0 }
 0xa0a   : > { %v9372_v1 = vpop.f32.mrf.mxu0 }
 0xa0b   : > { %v9374_v9 = vpack.c.bf16 %v4425_v50, %v4423_v41 }
 0xa0c   : > { %v9376_v52 = vpop.f32.mrf.mxu0 }
 0xa0e   : > { %v9378_v12 = vpop.f32.mrf.mxu0 }
 0xa10   : > { %v9380_v16 = vpop.f32.mrf.mxu0 }
 0xa12   : > { %v9382_v43 = vpop.f32.mrf.mxu0 }
 0xa14   : > { %v4372_v33 = vpop.f32.mrf.mxu0 }
 0xa16   : > { %v4374_v30 = vpop.f32.mrf.mxu0 }
 0xa18   : > { %v4376_v20 = vpop.f32.mrf.mxu0 }
 0xa1a   : > { %v4380_v22 = vpop.f32.mrf.mxu0 }
 0xa1c   : > { %v4382_v21 = vpop.f32.mrf.mxu0 }
 0xa1e   : > { %v4384_v53 = vpop.f32.mrf.mxu0 }
 0xa20   : > { %v4386_v28 = vpop.f32.mrf.mxu0 }
 0xa22   : > { %v4390_v49 = vpop.f32.mrf.mxu0 }
 0xa24   : > { %v4392_v19 = vpop.f32.mrf.mxu0 }
 0xa25   : > { %v4393_v41 = vadd.f32 %v4392_v19, %v9334_v44  ;;  %v4385_v19 = vadd.f32 %v4384_v53, %v9340_v7 }
 0xa26   : > { %v4394_v26 = vpop.f32.mrf.mxu0 }
 0xa28   : > { %v4396_v8 = vpop.f32.mrf.mxu0 }
 0xa29   : > { %v4397_v63 = vadd.f32 %v4396_v8, %v9336_v6  ;;  %v4391_v8 = vadd.f32 %v4390_v49, %v9334_v44  ;;  %v4373_v44 = vadd.f32 %v4372_v33, %v9342_v14 }
 0xa2a   : > { %v4400_v45 = vpop.f32.mrf.mxu0 }
 0xa2b   : > { %v4401_v23 = vadd.f32 %v4400_v45, %v9332_v10  ;;  %v4440_v45 = vmax.f32 %v4393_v41, 0.0  ;;  %v4432_v33 = vmax.f32 %v4373_v44, 0.0  ;;  %v7678_v41 = vld [vmem:[%s10230_s11 + $0x28] sm:$0xff]  }
 0xa2c   : > { %v4402_v36 = vpop.f32.mrf.mxu0  ;;  %v3064_v44 = vld [vmem:[%s10213_s1 + $0x48] sm:$0xff] }
 0xa2d   : > { %v4403_v51 = vadd.f32 %v4402_v36, %v9332_v10  ;;  %v4383_v10 = vadd.f32 %v4382_v21, %v9338_v18  ;;  %v4375_v21 = vadd.f32 %v4374_v30, %v9344_v37 }
 0xa2e   : > { %v4404_v5 = vpop.f32.mrf.mxu0 }
 0xa2f   : > { %v4405_v55 = vadd.f32 %v4404_v5, %v4230_v32  ;;  %v4444_v50 = vmax.f32 %v4403_v51, 0.0  ;;  %v4436_v49 = vmax.f32 %v4383_v10, 0.0  ;;  %v4433_v30 = vmax.f32 %v4375_v21, 0.0  ;;  %v3065_v10 = vld [vmem:[%s10213_s1 + $0x50] sm:$0xff] }
 0xa30   : > { %v4406_v4 = vpop.f32.mrf.mxu0 }
 0xa31   : > { %v4407_v2 = vadd.f32 %v4406_v4, %v4230_v32  ;;  %v4442_v32 = vmax.f32 %v4397_v63, 0.0 }
 0xa32   : > { %v4410_v24 = vpop.f32.mrf.mxu0 }
 0xa33   : > { %v4411_v61 = vadd.f32 %v4410_v24, %v9324_v0  ;;  %v4446_v54 = vmax.f32 %v4407_v2, 0.0  ;;  %v4445_v24 = vmax.f32 %v4405_v55, 0.0 }
 0xa34   : > { %v4412_v35 = vpop.f32.mrf.mxu0 }
 0xa35   : > { %v4413_v3 = vadd.f32 %v4412_v35, %v9324_v0  ;;  %v4447_v59 = vmax.f32 %v4411_v61, 0.0  ;;  %v4395_v0 = vadd.f32 %v4394_v26, %v9336_v6  ;;  %v4496_v5 = vpack.c.bf16 %v4446_v54, %v4444_v50  ;;  %v7364_v50 = vpop.f32.mrf.mxu1 }
 0xa36   : > { %v4414_v11 = vpop.f32.mrf.mxu0  ;;  %v4443_v35 = vmax.f32 %v4401_v23, 0.0  ;;  %v4377_v6 = vadd.f32 %v4376_v20, %v9344_v37  ;;  %v4437_v61 = vmax.f32 %v4385_v19, 0.0  ;;  %v4371_v20 = vadd.f32 %v9382_v43, %v9342_v14 }
 0xa37   : > { %v4415_v27 = vadd.f32 %v4414_v11, %v9328_v57  ;;  %v4448_v48 = vmax.f32 %v4413_v3, 0.0  ;;  %v4441_v11 = vmax.f32 %v4395_v0, 0.0  ;;  %v4494_v3 = vpack.c.bf16 %v4442_v32, %v4440_v45  ;;  %v7679_v45 = vld [vmem:[%s10230_s11 + $0x30] sm:$0xff]  }
 0xa38   : > { %v4416_v42 = vpop.f32.mrf.mxu0  ;;  %v4495_v2 = vpack.c.bf16 %v4445_v24, %v4443_v35  ;;  %v4434_v53 = vmax.f32 %v4377_v6, 0.0  ;;  %v4365_v37 = vadd.f32 %v9378_v12, %v9348_v40  ;;  %v4361_v14 = vadd.f32 %v9372_v1, %v9346_v29  ;;  %v3185_v24 = vpop.f32.mrf.mxu1 }
 0xa39   : > { %v4417_v39 = vadd.f32 %v4416_v42, %v9328_v57  ;;  %v4449_v25 = vmax.f32 %v4415_v27, 0.0  ;;  %v4387_v57 = vadd.f32 %v4386_v28, %v9340_v7  ;;  %v4381_v28 = vadd.f32 %v4380_v22, %v9338_v18 }
 0xa3a   : > { %v4439_v27 = vmax.f32 %v4391_v8, 0.0  ;;  %v4367_v7 = vadd.f32 %v9380_v16, %v9348_v40  ;;  %v4363_v18 = vadd.f32 %v9376_v52, %v9346_v29  ;;  %v4357_v16 = vadd.f32 %v9370_v13, %v9352_v15  ;;  %v7365_v32 = vpop.f32.mrf.mxu1 }
 0xa3b   : > { %v4450_v46 = vmax.f32 %v4417_v39, 0.0  ;;  %v4497_v36 = vpack.c.bf16 %v4449_v25, %v4447_v59  ;;  %v4438_v26 = vmax.f32 %v4387_v57, 0.0  ;;  %v4435_v39 = vmax.f32 %v4381_v28, 0.0  ;;  %v3061_v59 = vld [vmem:[%s10213_s1 + $0x30] sm:$0xff] }
 0xa3c   : > { %v4493_v42 = vpack.c.bf16 %v4441_v11, %v4439_v27  ;;  %v4430_v55 = vmax.f32 %v4367_v7, 0.0  ;;  %v4490_v25 = vpack.c.bf16 %v4434_v53, %v4432_v33  ;;  %v4431_v43 = vmax.f32 %v4371_v20, 0.0  ;;  %v3188_v35 = vpop.f32.mrf.mxu1 }
 0xa3d   : > { %v4498_v4 = vpack.c.bf16 %v4450_v46, %v4448_v48  ;;  %v4492_v51 = vpack.c.bf16 %v4438_v26, %v4436_v49  ;;  %v4491_v22 = vpack.c.bf16 %v4437_v61, %v4435_v39  ;;  %v4353_v52 = vadd.f32 %v9366_v58, %v9350_v17  ;;  %v3069_v61 = vld [vmem:[%s10213_s1 + $0x70] sm:$0xff] }
 0xa3e   : > { %v4428_v63 = vmax.f32 %v4363_v18, 0.0  ;;  %v4429_v54 = vmax.f32 %v4365_v37, 0.0  ;;  %v4489_v48 = vpack.c.bf16 %v4433_v30, %v4431_v43  ;;  %v4347_v40 = vadd.f32 %v9362_v47, %v9359_v62  ;;  %v7673_v47 = vld [vmem:[%s10230_s11] sm:$0xff]   ;;  %v7368_v11 = vpop.f32.mrf.mxu1  ;;  %v3070_v18 = vld [vmem:[%s10213_s1 + $0x78] sm:$0xff]  ;;  %v3068_v30 = vld [vmem:[%s10213_s1 + $0x68] sm:$0xff] }
 0xa3f   : > { %4787 = vmatprep.subr.bf16.mxu1 %v4498_v4  ;;  %v4426_v12 = vmax.f32 %v4357_v16, 0.0  ;;  %v4427_v13 = vmax.f32 %v4361_v14, 0.0  ;;  %v4343_v29 = vadd.f32 %v9356_v31, %v9354_v34  ;;  %v4424_v1 = vmax.f32 %v4353_v52, 0.0  ;;  %v7674_v34 = vld [vmem:[%s10230_s11 + $0x8] sm:$0xff]   ;;  %v7675_v31 = vld [vmem:[%s10230_s11 + $0x10] sm:$0xff]   ;;  %v3059_v4 = vld [vmem:[%s10213_s1 + $0x20] sm:$0xff] }
 0xa40   : > { %4788 = vmatpush1.bf16.msra.mxu1 %v4497_v36  ;;  %v4488_v15 = vpack.c.bf16 %v4430_v55, %v4428_v63  ;;  %v4422_v17 = vmax.f32 %v4347_v40, 0.0  ;;  %v3194_v0 = vadd.f32 %v7364_v50, %v3061_v59  ;;  %v3062_v36 = vld [vmem:[%s10213_s1 + $0x38] sm:$0xff]  ;;  %v3186_v57 = vadd.f32 %v3185_v24, %v3059_v4  ;;  %v3201_v26 = vpop.f32.mrf.mxu1  ;;  %v7681_v55 = vld [vmem:[%s10230_s11 + $0x40] sm:$0xff]   ;;  %v7682_v14 = vld [vmem:[%s10230_s11 + $0x48] sm:$0xff]   ;;  %v9487_v40 = vpop.permute.xlu0 %4688 }
 0xa41   : > { %4789 = vmatprep.subr.bf16.mxu1 %v4496_v5  ;;  %v4487_v46 = vpack.c.bf16 %v4429_v54, %v4427_v13  ;;  %v4486_v58 = vpack.c.bf16 %v4426_v12, %v4424_v1  ;;  %v4420_v23 = vmax.f32 %v4343_v29, 0.0  ;;  %v3060_v5 = vld [vmem:[%s10213_s1 + $0x28] sm:$0xff]  ;;  %v3197_v8 = vadd.f32 %v7365_v32, %v3062_v36  ;;  %v7683_v43 = vld [vmem:[%s10230_s11 + $0x50] sm:$0xff]   ;;  %v7684_v52 = vld [vmem:[%s10230_s11 + $0x58] sm:$0xff]  }
 0xa42   : > { %3239 = vst.msk [vmem:[%s8718_s7 + $0x30] sm:$0xff] %vm3232_vm1, %v3194_v0  ;;  %3237 = vst.msk [vmem:[%s8718_s7 + $0x20] sm:$0xff] %vm3232_vm1, %v3186_v57  ;;  %v3189_v19 = vadd.f32 %v3188_v35, %v3060_v5  ;;  %v3210_v6 = vadd.f32 %v7368_v11, %v3065_v10  ;;  %v7369_v27 = vpop.f32.mrf.mxu1  ;;  %v7685_v63 = vld [vmem:[%s10230_s11 + $0x60] sm:$0xff]   ;;  %v7686_v54 = vld [vmem:[%s10230_s11 + $0x68] sm:$0xff]  }
 0xa43   : > { %v4484_v62 = vpack.c.bf16 %v4422_v17, %v4420_v23  ;;  %3240 = vst.msk [vmem:[%s8718_s7 + $0x38] sm:$0xff] %vm3232_vm1, %v3197_v8  ;;  %v7688_v1 = vld [vmem:[%s10230_s11 + $0x78] sm:$0xff]  }
 0xa44   : > { %4790 = vmatpush1.bf16.msra.mxu1 %v4495_v2  ;;  %v3063_v2 = vld [vmem:[%s10213_s1 + $0x40] sm:$0xff]  ;;  %3238 = vst.msk [vmem:[%s8718_s7 + $0x28] sm:$0xff] %vm3232_vm1, %v3189_v19  ;;  %3243 = vst.msk [vmem:[%s8718_s7 + $0x50] sm:$0xff] %vm3232_vm1, %v3210_v6  ;;  %v3204_v21 = vpop.f32.mrf.mxu1  ;;  %v9492_v13 = vpop.permute.xlu0 %4608 }
 0xa45   : > { %4791 = vmatprep.subr.bf16.mxu1 %v4494_v3  ;;  %v3066_v3 = vld [vmem:[%s10213_s1 + $0x58] sm:$0xff]  ;;  %v3202_v28 = vadd.f32 %v3201_v26, %v3063_v2  ;;  %v3205_v7 = vadd.f32 %v3204_v21, %v3064_v44 }
 0xa46   : > { %v3213_v49 = vadd.f32 %v7369_v27, %v3066_v3  ;;  %v7372_v53 = vpop.f32.mrf.mxu1 }
 0xa47   : > { %3241 = vst.msk [vmem:[%s8718_s7 + $0x40] sm:$0xff] %vm3232_vm1, %v3202_v28  ;;  %3242 = vst.msk [vmem:[%s8718_s7 + $0x48] sm:$0xff] %vm3232_vm1, %v3205_v7  ;;  %v3226_v20 = vadd.f32 %v7372_v53, %v3069_v61 }
 0xa48   : > { %4792 = vmatpush1.bf16.msra.mxu1 %v4493_v42  ;;  %v7680_v42 = vld [vmem:[%s10230_s11 + $0x38] sm:$0xff]   ;;  %3244 = vst.msk [vmem:[%s8718_s7 + $0x58] sm:$0xff] %vm3232_vm1, %v3213_v49  ;;  %v3217_v39 = vpop.f32.mrf.mxu1 }
 0xa49   : > { %4793 = vmatprep.subr.bf16.mxu1 %v4492_v51  ;;  %v3067_v51 = vld [vmem:[%s10213_s1 + $0x60] sm:$0xff]  ;;  %3247 = vst.msk [vmem:[%s8718_s7 + $0x70] sm:$0xff] %vm3232_vm1, %v3226_v20  ;;  %s10258_s1 = sld [smem:[#allocation21_spill]] }
 0xa4a   : > { %v3218_v33 = vadd.f32 %v3217_v39, %v3067_v51  ;;  %v7373_v37 = vpop.f32.mrf.mxu1 }
 0xa4c   : > { %4794 = vmatpush1.bf16.msra.mxu1 %v4491_v22  ;;  %3245 = vst.msk [vmem:[%s8718_s7 + $0x60] sm:$0xff] %vm3232_vm1, %v3218_v33  ;;  %v3229_v22 = vadd.f32 %v7373_v37, %v3070_v18  ;;  %v3220_v16 = vpop.f32.mrf.mxu1 }
 0xa4d   : > { %4795 = vmatprep.subr.bf16.mxu1 %v4490_v25  ;;  %v3221_v25 = vadd.f32 %v3220_v16, %v3068_v30 }
 0xa4e   : > { %3248 = vst.msk [vmem:[%s8718_s7 + $0x78] sm:$0xff] %vm3232_vm1, %v3229_v22 }
 0xa4f   : > { %3246 = vst.msk [vmem:[%s8718_s7 + $0x68] sm:$0xff] %vm3232_vm1, %v3221_v25  ;;  %s10242_s7 = sld [smem:[#allocation12_spill]] }
 0xa50   : > { %4796 = vmatpush1.bf16.msra.mxu1 %v4489_v48  ;;  %v9484_v48 = vpop.permute.xlu1 %4683 }
 0xa51   : > { %4797 = vmatprep.subr.bf16.mxu1 %v4488_v15  ;;  %v7687_v15 = vld [vmem:[%s10230_s11 + $0x70] sm:$0xff]  }
 0xa54   : > { %4798 = vmatpush1.bf16.msra.mxu1 %v4487_v46  ;;  %v9489_v12 = vpop.permute.xlu1 %4603  ;;  %v9498_v46 = vpop.permute.xlu0 %4678 }
 0xa55   : > { %4799 = vmatprep.subr.bf16.mxu1 %v4486_v58 }
 0xa58   : > { %4800 = vmatpush1.bf16.msra.mxu1 %v9374_v9  ;;  %v7676_v9 = vld [vmem:[%s10230_s11 + $0x18] sm:$0xff]   ;;  %v9495_v29 = vpop.permute.xlu1 %4673  ;;  %v9502_v58 = vpop.permute.xlu0 %4598 }
 0xa59   : > { %4801 = vmatprep.subr.bf16.mxu1 %v4484_v62 }
 0xa5c   : > { %4802 = vmatpush1.bf16.msra.mxu1 %v9364_v38  ;;  %v7677_v38 = vld [vmem:[%s10230_s11 + $0x20] sm:$0xff]   ;;  %v9500_v17 = vpop.permute.xlu1 %4593  ;;  %v9506_v62 = vpop.permute.xlu0 %4668 }
 0xa5f   : > { %4820 = vmatmul.mubr.bf16.vlgmr.msra.gmra.mxu1 %v7673_v47 }
 0xa60   : > { %4829 = vmatprep.mubr.bf16.mxu1 %v10212_v60  ;;  %v9504_v23 = vpop.permute.xlu1 %4663 }
 0xa64   : > { %v9508_v47 = vpop.permute.xlu1 %4583 }
 0xa67   : > { %4830 = vmatmul.mubr.bf16.gmra.mxu1 %v7674_v34  ;;  %v9510_v34 = vpop.permute.xlu0 %4588 }
 0xa68   : > { %4839 = vmatprep.mubr.bf16.mxu1 %v10212_v60 }
 0xa6f   : > { %4840 = vmatmul.mubr.bf16.gmra.mxu1 %v7675_v31  ;;  %v9512_v31 = vpop.permute.xlu1 %4653 }
 0xa70   : > { %4849 = vmatprep.mubr.bf16.mxu1 %v10212_v60 }
 0xa77   : > { %4850 = vmatmul.mubr.bf16.gmra.mxu1 %v7676_v9  ;;  %v9516_v9 = vpop.permute.xlu1 %4573 }
 0xa78   : > { %4859 = vmatprep.mubr.bf16.mxu1 %v10212_v60 }
 0xa7b   : > { %v9520_v59 = vpop.permute.xlu1 %4643 }
 0xa7f   : > { %4860 = vmatmul.mubr.bf16.gmra.mxu1 %v7677_v38  ;;  %v9524_v50 = vpop.permute.xlu1 %4563 }
 0xa80   : > { %4869 = vmatprep.mubr.bf16.mxu1 %v10212_v60 }
 0xa83   : > { %v9528_v0 = vpop.permute.xlu1 %4633 }
 0xa87   : > { %4870 = vmatmul.mubr.bf16.gmra.mxu1 %v7678_v41  ;;  %v9532_v36 = vpop.permute.xlu1 %4553 }
 0xa88   : > { %4879 = vmatprep.mubr.bf16.mxu1 %v10212_v60 }
 0xa8b   : > { %v9536_v32 = vpop.permute.xlu1 %4623 }
 0xa8f   : > { %4880 = vmatmul.mubr.bf16.gmra.mxu1 %v7679_v45  ;;  %v9540_v8 = vpop.permute.xlu1 %4543 }
 0xa90   : > { %4889 = vmatprep.mubr.bf16.mxu1 %v10212_v60  ;;  %10231 = vst [vmem:[#allocation46_spill] sm:$0xff] %v9540_v8 }
 0xa93   : > { %v9544_v10 = vpop.permute.xlu1 %4613 }
 0xa94   : > { %10232 = vst [vmem:[#allocation45_spill] sm:$0xff] %v9544_v10 }
 0xa97   : > { %4890 = vmatmul.mubr.bf16.gmra.mxu1 %v7680_v42  ;;  %v9548_v19 = vpop.permute.xlu1 %4533 }
 0xa98   : > { %4899 = vmatprep.mubr.bf16.mxu1 %v10212_v60  ;;  %10234 = vst [vmem:[#allocation44_spill] sm:$0xff] %v9548_v19 }
 0xa9f   : > { %4900 = vmatmul.mubr.bf16.gmra.mxu1 %v7681_v55 }
 0xaa0   : > { %4909 = vmatprep.mubr.bf16.mxu1 %v10212_v60 }
 0xaa7   : > { %4910 = vmatmul.mubr.bf16.gmra.mxu1 %v7682_v14 }
 0xaa8   : > { %4919 = vmatprep.mubr.bf16.mxu1 %v10212_v60 }
 0xaaf   : > { %4920 = vmatmul.mubr.bf16.gmra.mxu1 %v7683_v43 }
 0xab0   : > { %4929 = vmatprep.mubr.bf16.mxu1 %v10212_v60 }
 0xab7   : > { %4930 = vmatmul.mubr.bf16.gmra.mxu1 %v7684_v52 }
 0xab8   : > { %4939 = vmatprep.mubr.bf16.mxu1 %v10212_v60 }
 0xabf   : > { %4940 = vmatmul.mubr.bf16.gmra.mxu1 %v7685_v63 }
 0xac0   : > { %4949 = vmatprep.mubr.bf16.mxu1 %v10212_v60 }
 0xac7   : > { %4950 = vmatmul.mubr.bf16.gmra.mxu1 %v7686_v54 }
 0xac8   : > { %4959 = vmatprep.mubr.bf16.mxu1 %v10212_v60 }
 0xacf   : > { %4960 = vmatmul.mubr.bf16.gmra.mxu1 %v7687_v15 }
 0xad0   : > { %4969 = vmatprep.mubr.bf16.mxu1 %v10212_v60  ;;  %v9514_v60 = vpop.permute.xlu0 %4658 }
 0xad4   : > { %v9518_v38 = vpop.permute.xlu0 %4578 }
 0xad7   : > { %4970 = vmatmul.mubr.bf16.gmra.mxu1 %v7688_v1 }
 0xad8   : > { %v9522_v41 = vpop.permute.xlu0 %4648 }
 0xadc   : > { %v9526_v4 = vpop.permute.xlu0 %4568 }
 0xae0   : > { %v9530_v24 = vpop.permute.xlu0 %4638 }
 0xae4   : > { %v9534_v57 = vpop.permute.xlu0 %4558 }
 0xae8   : > { %v9538_v5 = vpop.permute.xlu0 %4628 }
 0xaec   : > { %v9542_v35 = vpop.permute.xlu0 %4548 }
 0xaf0   : > { %v9546_v45 = vpop.permute.xlu0 %4618 }
 0xaf1   : > { %10233 = vst [vmem:[#allocation36_spill] sm:$0xff] %v9546_v45 }
 0xaf4   : > { %v9553_v3 = vpop.permute.xlu0 %4538 }
 0xaf5   : > { %10236 = vst [vmem:[#allocation43_spill] sm:$0xff] %v9553_v3 }
 0xb1f   : > { %v4821_v11 = vpop.f32.mrf.mxu1 }
 0xb20   : > { %v4822_v2 = vadd.f32 %v4821_v11, %v9548_v19 }
 0xb21   : > { %v9551_v6 = vpop.f32.mrf.mxu1 }
 0xb22   : > { %10235 = vst [vmem:[#allocation35_spill] sm:$0xff] %v9551_v6  ;;  %v4980_v26 = vmax.f32 %v4822_v2, 0.0 }
 0xb23   : > { %v4825_v28 = vpop.f32.mrf.mxu1 }
 0xb24   : > { %v4826_v27 = vadd.f32 %v4825_v28, %v9553_v3  ;;  %5044 = vmax.xlane.f32.xlu0 %v4980_v26 }
 0xb25   : > { %v9556_v44 = vpop.f32.mrf.mxu1 }
 0xb26   : > { %10237 = vst [vmem:[#allocation34_spill] sm:$0xff] %v9556_v44  ;;  %v4982_v49 = vmax.f32 %v4826_v27, 0.0 }
 0xb27   : > { %v4831_v21 = vpop.f32.mrf.mxu1 }
 0xb28   : > { %v4832_v61 = vadd.f32 %v4831_v21, %v9540_v8  ;;  %5046 = vmax.xlane.f32.xlu1 %v4982_v49 }
 0xb29   : > { %v9559_v42 = vpop.f32.mrf.mxu1 }
 0xb2a   : > { %10238 = vst [vmem:[#allocation42_spill] sm:$0xff] %v9559_v42  ;;  %v4984_v7 = vmax.f32 %v4832_v61, 0.0 }
 0xb2b   : > { %v4835_v53 = vpop.f32.mrf.mxu1 }
 0xb2c   : > { %v4836_v51 = vadd.f32 %v4835_v53, %v9542_v35  ;;  %5048 = vmax.xlane.f32.xlu0 %v4984_v7 }
 0xb2d   : > { %v9562_v20 = vpop.f32.mrf.mxu1 }
 0xb2e   : > { %v4986_v39 = vmax.f32 %v4836_v51, 0.0 }
 0xb2f   : > { %v4841_v18 = vpop.f32.mrf.mxu1 }
 0xb30   : > { %v4842_v33 = vadd.f32 %v4841_v18, %v9532_v36  ;;  %5050 = vmax.xlane.f32.xlu1 %v4986_v39 }
 0xb31   : > { %v9565_v37 = vpop.f32.mrf.mxu1 }
 0xb32   : > { %v4988_v30 = vmax.f32 %v4842_v33, 0.0 }
 0xb33   : > { %v4845_v22 = vpop.f32.mrf.mxu1 }
 0xb34   : > { %v4846_v16 = vadd.f32 %v4845_v22, %v9534_v57  ;;  %5052 = vmax.xlane.f32.xlu0 %v4988_v30 }
 0xb35   : > { %v9568_v55 = vpop.f32.mrf.mxu1 }
 0xb36   : > { %v4990_v25 = vmax.f32 %v4846_v16, 0.0 }
 0xb37   : > { %v4851_v14 = vpop.f32.mrf.mxu1 }
 0xb38   : > { %v4852_v43 = vadd.f32 %v4851_v14, %v9524_v50  ;;  %5054 = vmax.xlane.f32.xlu1 %v4990_v25 }
 0xb39   : > { %v9571_v52 = vpop.f32.mrf.mxu1 }
 0xb3a   : > { %v4992_v63 = vmax.f32 %v4852_v43, 0.0 }
 0xb3b   : > { %v4855_v54 = vpop.f32.mrf.mxu1 }
 0xb3c   : > { %v4856_v15 = vadd.f32 %v4855_v54, %v9526_v4  ;;  %5056 = vmax.xlane.f32.xlu0 %v4992_v63 }
 0xb3d   : > { %v9574_v1 = vpop.f32.mrf.mxu1 }
 0xb3e   : > { %v4994_v11 = vmax.f32 %v4856_v15, 0.0 }
 0xb3f   : > { %v4861_v2 = vpop.f32.mrf.mxu1 }
 0xb40   : > { %v4862_v26 = vadd.f32 %v4861_v2, %v9516_v9  ;;  %5058 = vmax.xlane.f32.xlu1 %v4994_v11 }
 0xb41   : > { %v9577_v28 = vpop.f32.mrf.mxu1 }
 0xb42   : > { %v4996_v27 = vmax.f32 %v4862_v26, 0.0 }
 0xb43   : > { %v4865_v49 = vpop.f32.mrf.mxu1 }
 0xb44   : > { %v4866_v21 = vadd.f32 %v4865_v49, %v9518_v38  ;;  %5060 = vmax.xlane.f32.xlu0 %v4996_v27 }
 0xb45   : > { %v9580_v61 = vpop.f32.mrf.mxu1 }
 0xb46   : > { %v4998_v7 = vmax.f32 %v4866_v21, 0.0 }
 0xb47   : > { %v4871_v53 = vpop.f32.mrf.mxu1 }
 0xb48   : > { %v4872_v51 = vadd.f32 %v4871_v53, %v9508_v47  ;;  %5062 = vmax.xlane.f32.xlu1 %v4998_v7 }
 0xb49   : > { %v9583_v39 = vpop.f32.mrf.mxu1 }
 0xb4a   : > { %v5000_v18 = vmax.f32 %v4872_v51, 0.0 }
 0xb4b   : > { %v4875_v33 = vpop.f32.mrf.mxu1 }
 0xb4c   : > { %v4876_v30 = vadd.f32 %v4875_v33, %v9510_v34  ;;  %5064 = vmax.xlane.f32.xlu0 %v5000_v18 }
 0xb4d   : > { %v9586_v22 = vpop.f32.mrf.mxu1 }
 0xb4e   : > { %v5002_v16 = vmax.f32 %v4876_v30, 0.0 }
 0xb4f   : > { %v4881_v25 = vpop.f32.mrf.mxu1 }
 0xb50   : > { %v4882_v14 = vadd.f32 %v4881_v25, %v9500_v17  ;;  %5066 = vmax.xlane.f32.xlu1 %v5002_v16 }
 0xb51   : > { %v9589_v43 = vpop.f32.mrf.mxu1 }
 0xb52   : > { %v5004_v63 = vmax.f32 %v4882_v14, 0.0 }
 0xb53   : > { %v4885_v54 = vpop.f32.mrf.mxu1 }
 0xb54   : > { %v4886_v15 = vadd.f32 %v4885_v54, %v9502_v58  ;;  %5068 = vmax.xlane.f32.xlu0 %v5004_v63 }
 0xb55   : > { %v9592_v11 = vpop.f32.mrf.mxu1 }
 0xb56   : > { %v5006_v2 = vmax.f32 %v4886_v15, 0.0 }
 0xb57   : > { %v4891_v26 = vpop.f32.mrf.mxu1 }
 0xb58   : > { %v4892_v27 = vadd.f32 %v4891_v26, %v9489_v12  ;;  %5070 = vmax.xlane.f32.xlu1 %v5006_v2 }
 0xb59   : > { %v9595_v49 = vpop.f32.mrf.mxu1 }
 0xb5a   : > { %v5008_v21 = vmax.f32 %v4892_v27, 0.0 }
 0xb5b   : > { %v4895_v7 = vpop.f32.mrf.mxu1 }
 0xb5c   : > { %v4896_v53 = vadd.f32 %v4895_v7, %v9492_v13  ;;  %5072 = vmax.xlane.f32.xlu0 %v5008_v21 }
 0xb5d   : > { %v9598_v51 = vpop.f32.mrf.mxu1 }
 0xb5e   : > { %v5010_v18 = vmax.f32 %v4896_v53, 0.0 }
 0xb5f   : > { %v4901_v33 = vpop.f32.mrf.mxu1 }
 0xb60   : > { %v4902_v30 = vadd.f32 %v4901_v33, %v9544_v10  ;;  %5074 = vmax.xlane.f32.xlu1 %v5010_v18 }
 0xb61   : > { %v9601_v16 = vpop.f32.mrf.mxu1 }
 0xb62   : > { %10239 = vst [vmem:[#allocation33_spill] sm:$0xff] %v9601_v16  ;;  %v5012_v25 = vmax.f32 %v4902_v30, 0.0 }
 0xb63   : > { %v4905_v14 = vpop.f32.mrf.mxu1 }
 0xb64   : > { %v4906_v63 = vadd.f32 %v4905_v14, %v9546_v45  ;;  %5076 = vmax.xlane.f32.xlu0 %v5012_v25 }
 0xb65   : > { %v9604_v54 = vpop.f32.mrf.mxu1 }
 0xb66   : > { %10240 = vst [vmem:[#allocation41_spill] sm:$0xff] %v9604_v54  ;;  %v5014_v15 = vmax.f32 %v4906_v63, 0.0 }
 0xb67   : > { %v4911_v2 = vpop.f32.mrf.mxu1 }
 0xb68   : > { %v4912_v26 = vadd.f32 %v4911_v2, %v9536_v32  ;;  %5078 = vmax.xlane.f32.xlu1 %v5014_v15 }
 0xb69   : > { %v9607_v27 = vpop.f32.mrf.mxu1 }
 0xb6a   : > { %10241 = vst [vmem:[#allocation32_spill] sm:$0xff] %v9607_v27  ;;  %v5016_v21 = vmax.f32 %v4912_v26, 0.0 }
 0xb6b   : > { %v4915_v7 = vpop.f32.mrf.mxu1 }
 0xb6c   : > { %v4916_v53 = vadd.f32 %v4915_v7, %v9538_v5  ;;  %5080 = vmax.xlane.f32.xlu0 %v5016_v21 }
 0xb6d   : > { %v9610_v18 = vpop.f32.mrf.mxu1 }
 0xb6e   : > { %v5018_v33 = vmax.f32 %v4916_v53, 0.0 }
 0xb6f   : > { %v4921_v30 = vpop.f32.mrf.mxu1 }
 0xb70   : > { %v4922_v25 = vadd.f32 %v4921_v30, %v9528_v0  ;;  %5082 = vmax.xlane.f32.xlu1 %v5018_v33 }
 0xb71   : > { %v9613_v14 = vpop.f32.mrf.mxu1 }
 0xb72   : > { %v5020_v63 = vmax.f32 %v4922_v25, 0.0 }
 0xb73   : > { %v4925_v56 = vpop.f32.mrf.mxu1 }
 0xb74   : > { %v4926_v15 = vadd.f32 %v4925_v56, %v9530_v24  ;;  %5084 = vmax.xlane.f32.xlu0 %v5020_v63 }
 0xb75   : > { %v9616_v2 = vpop.f32.mrf.mxu1 }
 0xb76   : > { %v5022_v26 = vmax.f32 %v4926_v15, 0.0 }
 0xb77   : > { %v4931_v6 = vpop.f32.mrf.mxu1 }
 0xb78   : > { %v4932_v21 = vadd.f32 %v4931_v6, %v9520_v59  ;;  %5086 = vmax.xlane.f32.xlu1 %v5022_v26 }
 0xb79   : > { %v9619_v7 = vpop.f32.mrf.mxu1 }
 0xb7a   : > { %v5024_v53 = vmax.f32 %v4932_v21, 0.0 }
 0xb7b   : > { %v4935_v19 = vpop.f32.mrf.mxu1 }
 0xb7c   : > { %v4936_v33 = vadd.f32 %v4935_v19, %v9522_v41  ;;  %5088 = vmax.xlane.f32.xlu0 %v5024_v53 }
 0xb7d   : > { %v9622_v30 = vpop.f32.mrf.mxu1 }
 0xb7e   : > { %v5026_v25 = vmax.f32 %v4936_v33, 0.0 }
 0xb7f   : > { %v4941_v16 = vpop.f32.mrf.mxu1 }
 0xb80   : > { %v4942_v56 = vadd.f32 %v4941_v16, %v9512_v31  ;;  %5090 = vmax.xlane.f32.xlu1 %v5026_v25 }
 0xb81   : > { %v9625_v63 = vpop.f32.mrf.mxu1 }
 0xb82   : > { %v5028_v15 = vmax.f32 %v4942_v56, 0.0 }
 0xb83   : > { %v4945_v10 = vpop.f32.mrf.mxu1 }
 0xb84   : > { %v4946_v6 = vadd.f32 %v4945_v10, %v9514_v60  ;;  %5092 = vmax.xlane.f32.xlu0 %v5028_v15 }
 0xb85   : > { %v4947_v26 = vpop.f32.mrf.mxu1 }
 0xb86   : > { %v5030_v21 = vmax.f32 %v4946_v6, 0.0 }
 0xb87   : > { %v4951_v44 = vpop.f32.mrf.mxu1 }
 0xb88   : > { %v4952_v19 = vadd.f32 %v4951_v44, %v9504_v23  ;;  %5094 = vmax.xlane.f32.xlu1 %v5030_v21 }
 0xb89   : > { %v4953_v53 = vpop.f32.mrf.mxu1 }
 0xb8a   : > { %v5032_v3 = vmax.f32 %v4952_v19, 0.0 }
 0xb8b   : > { %v4955_v33 = vpop.f32.mrf.mxu1 }
 0xb8c   : > { %v4956_v54 = vadd.f32 %v4955_v33, %v9506_v62  ;;  %5096 = vmax.xlane.f32.xlu0 %v5032_v3  ;;  %v4898_v3 = vadd.f32 %v9598_v51, %v9492_v13 }
 0xb8d   : > { %v4957_v16 = vpop.f32.mrf.mxu1 }
 0xb8e   : > { %v5034_v25 = vmax.f32 %v4956_v54, 0.0 }
 0xb8f   : > { %v4961_v45 = vpop.f32.mrf.mxu1 }
 0xb90   : > { %v4962_v56 = vadd.f32 %v4961_v45, %v9495_v29  ;;  %5098 = vmax.xlane.f32.xlu1 %v5034_v25  ;;  %v5011_v25 = vmax.f32 %v4898_v3, 0.0 }
 0xb91   : > { %v4963_v10 = vpop.f32.mrf.mxu1 }
 0xb92   : > { %v5036_v15 = vmax.f32 %v4962_v56, 0.0 }
 0xb93   : > { %v4965_v42 = vpop.f32.mrf.mxu1 }
 0xb94   : > { %v4966_v6 = vadd.f32 %v4965_v42, %v9498_v46  ;;  %5100 = vmax.xlane.f32.xlu0 %v5036_v15 }
 0xb95   : > { %v4967_v44 = vpop.f32.mrf.mxu1 }
 0xb96   : > { %v5038_v21 = vmax.f32 %v4966_v6, 0.0  ;;  %v4968_v56 = vadd.f32 %v4967_v44, %v9498_v46  ;;  %v4894_v6 = vadd.f32 %v9595_v49, %v9489_v12  ;;  %v4964_v46 = vadd.f32 %v4963_v10, %v9495_v29 }
 0xb97   : > { %v4971_v8 = vpop.f32.mrf.mxu1  ;;  %v4868_v29 = vadd.f32 %v9580_v61, %v9518_v38  ;;  %v4864_v38 = vadd.f32 %v9577_v28, %v9516_v9  ;;  %v4854_v9 = vadd.f32 %v9571_v52, %v9524_v50  ;;  %v4844_v52 = vadd.f32 %v9565_v37, %v9532_v36 }
 0xb98   : > { %v4972_v19 = vadd.f32 %v4971_v8, %v9484_v48  ;;  %5102 = vmax.xlane.f32.xlu1 %v5038_v21  ;;  %v4888_v8 = vadd.f32 %v9592_v11, %v9502_v58  ;;  %v5039_v13 = vmax.f32 %v4968_v56, 0.0  ;;  %v5009_v21 = vmax.f32 %v4894_v6, 0.0 }
 0xb99   : > { %v4973_v33 = vpop.f32.mrf.mxu1  ;;  %v4884_v58 = vadd.f32 %v9589_v43, %v9500_v17  ;;  %v5037_v12 = vmax.f32 %v4964_v46, 0.0  ;;  %v4874_v17 = vadd.f32 %v9583_v39, %v9508_v47  ;;  %v4938_v39 = vadd.f32 %v9622_v30, %v9522_v41  ;;  %v10247_v46 = vld [vmem:[#allocation41_spill] sm:$0xff] }
 0xb9a   : > { %v5040_v54 = vmax.f32 %v4972_v19, 0.0  ;;  %v4974_v42 = vadd.f32 %v4973_v33, %v9484_v48  ;;  %v4958_v19 = vadd.f32 %v4957_v16, %v9506_v62  ;;  %v4878_v48 = vadd.f32 %v9586_v22, %v9510_v34 }
 0xb9b   : > { %v4975_v27 = vpop.f32.mrf.mxu1  ;;  %v5005_v44 = vmax.f32 %v4884_v58, 0.0  ;;  %v4948_v33 = vadd.f32 %v4947_v26, %v9514_v60  ;;  %v4954_v62 = vadd.f32 %v4953_v53, %v9504_v23  ;;  %v4999_v60 = vmax.f32 %v4868_v29, 0.0  ;;  %v10253_v29 = vld [vmem:[#allocation35_spill] sm:$0xff] }
 0xb9c   : > { %v4976_v45 = vadd.f32 %v4975_v27, %v9487_v40  ;;  %5104 = vmax.xlane.f32.xlu1 %v5040_v54  ;;  %v5041_v51 = vmax.f32 %v4974_v42, 0.0  ;;  %v5007_v27 = vmax.f32 %v4888_v8, 0.0  ;;  %v5035_v11 = vmax.f32 %v4958_v19, 0.0  ;;  %v10246_v19 = vld [vmem:[#allocation36_spill] sm:$0xff] }
 0xb9d   : > { %v5003_v49 = vmax.f32 %v4878_v48, 0.0  ;;  %v5031_v22 = vmax.f32 %v4948_v33, 0.0  ;;  %v5033_v43 = vmax.f32 %v4954_v62, 0.0  ;;  %v4977_v3 = vpop.f32.mrf.mxu1  ;;  %v5001_v26 = vmax.f32 %v4874_v17, 0.0  ;;  %v10252_v62 = vld [vmem:[#allocation44_spill] sm:$0xff] }
 0xb9e   : > { %v5042_v15 = vmax.f32 %v4976_v45, 0.0  ;;  %v4944_v23 = vadd.f32 %v9625_v63, %v9512_v31  ;;  %v4978_v53 = vadd.f32 %v4977_v3, %v9487_v40  ;;  %v4858_v31 = vadd.f32 %v9574_v1, %v9526_v4 }
 0xb9f   : > { %v4997_v40 = vmax.f32 %v4864_v38, 0.0  ;;  %v4934_v63 = vadd.f32 %v9619_v7, %v9520_v59  ;;  %v5027_v56 = vmax.f32 %v4938_v39, 0.0  ;;  %v4928_v42 = vadd.f32 %v9616_v2, %v9530_v24 }
 0xba0   : > { %5154 = vmax.xlane.f32.xlu1 %v5011_v25  ;;  %5106 = vmax.xlane.f32.xlu0 %v5042_v15  ;;  %v5029_v54 = vmax.f32 %v4944_v23, 0.0  ;;  %v5043_v45 = vmax.f32 %v4978_v53, 0.0  ;;  %v4995_v30 = vmax.f32 %v4858_v31, 0.0  ;;  %v4848_v59 = vadd.f32 %v9568_v55, %v9534_v57  ;;  %v7691_v57 = vld [vmem:[%s10242_s7 + $0x4] ss:$8 sps:$4 sm:$0xff]  }
 0xba1   : > { %v5025_v15 = vmax.f32 %v4934_v63, 0.0  ;;  %v4993_v4 = vmax.f32 %v4854_v9, 0.0  ;;  %v4924_v1 = vadd.f32 %v9613_v14, %v9528_v0  ;;  %v5023_v50 = vmax.f32 %v4928_v42, 0.0  ;;  %5292 = vmatprep.mubr.bf16.mxu0 %v7691_v57  ;;  %v10243_v14 = vld [vmem:[#allocation32_spill] sm:$0xff] }
 0xba2   : > { %v4991_v7 = vmax.f32 %v4848_v59, 0.0  ;;  %v4918_v6 = vadd.f32 %v9610_v18, %v9538_v5  ;;  %v4838_v0 = vadd.f32 %v9562_v20, %v9542_v35  ;;  %v4989_v55 = vmax.f32 %v4844_v52, 0.0 }
 0xba3   : > { %v4914_v36 = vadd.f32 %v10243_v14, %v9536_v32  ;;  %v4908_v48 = vadd.f32 %v10247_v46, %v10246_v19 }
 0xba4   : > { %5182 = vmax.xlane.f32.xlu1 %v5039_v13  ;;  %5184 = vmax.xlane.f32.xlu0 %v5041_v51  ;;  %v5021_v13 = vmax.f32 %v4924_v1, 0.0  ;;  %v5019_v37 = vmax.f32 %v4918_v6, 0.0  ;;  %v4987_v18 = vmax.f32 %v4838_v0, 0.0 }
 0xba5   : > { %v5017_v58 = vmax.f32 %v4914_v36, 0.0  ;;  %v5015_v33 = vmax.f32 %v4908_v48, 0.0 }
 0xba8   : > { %5150 = vmax.xlane.f32.xlu1 %v5007_v27  ;;  %5152 = vmax.xlane.f32.xlu0 %v5009_v21  ;;  %v10244_v27 = vld [vmem:[#allocation46_spill] sm:$0xff] }
 0xba9   : > { %v10245_v21 = vld [vmem:[#allocation42_spill] sm:$0xff] }
 0xbaa   : > { %v4834_v5 = vadd.f32 %v10245_v21, %v10244_v27 }
 0xbac   : > { %5178 = vmax.xlane.f32.xlu1 %v5035_v11  ;;  %5180 = vmax.xlane.f32.xlu0 %v5037_v12  ;;  %v10248_v11 = vld [vmem:[#allocation43_spill] sm:$0xff]  ;;  %v10249_v12 = vld [vmem:[#allocation34_spill] sm:$0xff]  ;;  %v4985_v20 = vmax.f32 %v4834_v5, 0.0 }
 0xbad   : > { %v5045_v16 = vpop.xlane.xlu0 %5044  ;;  %v4828_v35 = vadd.f32 %v10249_v12, %v10248_v11 }
 0xbb0   : > { %5146 = vmax.xlane.f32.xlu1 %v5003_v49  ;;  %5148 = vmax.xlane.f32.xlu0 %v5005_v44  ;;  %v10250_v49 = vld [vmem:[#allocation45_spill] sm:$0xff] }
 0xbb1   : > { %v5047_v34 = vpop.xlane.xlu1 %5046  ;;  %v10251_v44 = vld [vmem:[#allocation33_spill] sm:$0xff] }
 0xbb2   : > { %v9654_v10 = vpack.c.bf16 %v5047_v34, %v5045_v16  ;;  %v4904_v32 = vadd.f32 %v10251_v44, %v10250_v49  ;;  %v4824_v16 = vadd.f32 %v10253_v29, %v10252_v62  ;;  %v4983_v34 = vmax.f32 %v4828_v35, 0.0 }
 0xbb4   : > { %5174 = vmax.xlane.f32.xlu1 %v5031_v22  ;;  %5176 = vmax.xlane.f32.xlu0 %v5033_v43  ;;  %v5013_v17 = vmax.f32 %v4904_v32, 0.0  ;;  %v4981_v22 = vmax.f32 %v4824_v16, 0.0  ;;  %v10255_v43 = vld [vmem:[#allocation37_spill] sm:$0xff] }
 0xbb5   : > { %v5049_v47 = vpop.xlane.xlu0 %5048  ;;  %v7694_v16 = vld [vmem:[%s10242_s7 + $0x14] ss:$8 sps:$4 sm:$0xff]  }
 0xbb8   : > { %5142 = vmax.xlane.f32.xlu1 %v4999_v60  ;;  %5144 = vmax.xlane.f32.xlu0 %v5001_v26 }
 0xbb9   : > { %v5051_v61 = vpop.xlane.xlu1 %5050 }
 0xbba   : > { %v9663_v25 = vpack.c.bf16 %v5051_v61, %v5049_v47 }
 0xbbc   : > { %5186 = vmax.xlane.f32.xlu1 %v5043_v45  ;;  %5172 = vmax.xlane.f32.xlu0 %v5029_v54  ;;  %v7718_v54 = vld [vmem:[%s10254_s15 + $0x4] ss:$8 sps:$4 sm:$0xff]  }
 0xbbd   : > { %v5053_v41 = vpop.xlane.xlu0 %5052  ;;  %5783 = vmatprep.mubr.bf16.mxu1 %v7718_v54 }
 0xbc0   : > { %5170 = vmax.xlane.f32.xlu1 %v5027_v56  ;;  %5140 = vmax.xlane.f32.xlu0 %v4997_v40 }
 0xbc1   : > { %v5055_v28 = vpop.xlane.xlu1 %5054 }
 0xbc2   : > { %v9673_v8 = vpack.c.bf16 %v5055_v28, %v5053_v41 }
 0xbc4   : > { %5138 = vmax.xlane.f32.xlu1 %v4995_v30  ;;  %5168 = vmax.xlane.f32.xlu0 %v5025_v15 }
 0xbc5   : > { %v5057_v24 = vpop.xlane.xlu0 %5056 }
 0xbc8   : > { %5166 = vmax.xlane.f32.xlu1 %v5023_v50  ;;  %5136 = vmax.xlane.f32.xlu0 %v4993_v4 }
 0xbc9   : > { %v5059_v2 = vpop.xlane.xlu1 %5058 }
 0xbca   : > { %v9683_v51 = vpack.c.bf16 %v5059_v2, %v5057_v24 }
 0xbcc   : > { %5134 = vmax.xlane.f32.xlu1 %v4991_v7  ;;  %5164 = vmax.xlane.f32.xlu0 %v5021_v13 }
 0xbcd   : > { %v5061_v60 = vpop.xlane.xlu0 %5060 }
 0xbd0   : > { %5162 = vmax.xlane.f32.xlu1 %v5019_v37  ;;  %5132 = vmax.xlane.f32.xlu0 %v4989_v55 }
 0xbd1   : > { %v5063_v3 = vpop.xlane.xlu1 %5062 }
 0xbd2   : > { %v5112_v5 = vpack.c.bf16 %v5063_v3, %v5061_v60  ;;  %v7692_v60 = vld [vmem:[%s10242_s7 + $0x10] ss:$8 sps:$4 sm:$0xff]  }
 0xbd4   : > { %5130 = vmax.xlane.f32.xlu1 %v4987_v18  ;;  %5160 = vmax.xlane.f32.xlu0 %v5017_v58 }
 0xbd5   : > { %v5065_v23 = vpop.xlane.xlu0 %5064 }
 0xbd8   : > { %5158 = vmax.xlane.f32.xlu1 %v5015_v33  ;;  %5128 = vmax.xlane.f32.xlu0 %v4985_v20  ;;  %v7689_v33 = vld [vmem:[%s10242_s7] ss:$8 sps:$4 sm:$0xff]  }
 0xbd9   : > { %v5067_v26 = vpop.xlane.xlu1 %5066 }
 0xbda   : > { %v5113_v36 = vpack.c.bf16 %v5067_v26, %v5065_v23  ;;  %v7722_v26 = vld [vmem:[%s10254_s15 + $0x10] ss:$8 sps:$4 sm:$0xff]  }
 0xbdc   : > { %5126 = vmax.xlane.f32.xlu1 %v4983_v34  ;;  %5156 = vmax.xlane.f32.xlu0 %v5013_v17  ;;  %v7724_v34 = vld [vmem:[%s10254_s15 + $0x14] ss:$8 sps:$4 sm:$0xff]  }
 0xbdd   : > { %v5069_v38 = vpop.xlane.xlu0 %5068 }
 0xbe0   : > { %5124 = vmax.xlane.f32.xlu0 %v4981_v22 }
 0xbe1   : > { %v5071_v53 = vpop.xlane.xlu1 %5070 }
 0xbe2   : > { %v5114_v57 = vpack.c.bf16 %v5071_v53, %v5069_v38  ;;  %v7697_v38 = vld [vmem:[%s10242_s7 + $0x24] ss:$8 sps:$4 sm:$0xff]  }
 0xbe5   : > { %v5073_v61 = vpop.xlane.xlu0 %5072 }
 0xbe9   : > { %v5075_v47 = vpop.xlane.xlu1 %5074 }
 0xbea   : > { %v5115_v2 = vpack.c.bf16 %v5075_v47, %v5073_v61  ;;  %v7730_v47 = vld [vmem:[%s10254_s15 + $0x24] ss:$8 sps:$4 sm:$0xff]  }
 0xbed   : > { %v9704_v45 = vpop.xlane.xlu0 %5076 }
 0xbf1   : > { %v9701_v39 = vpop.xlane.xlu1 %5078 }
 0xbf2   : > { %v5116_v49 = vpack.c.bf16 %v9701_v39, %v9704_v45 }
 0xbf5   : > { %v5081_v40 = vpop.xlane.xlu0 %5080 }
 0xbf6   : > { %5865 = vrot.lane.b32.xlu0 %v10255_v43, %s7834_s2  ;;  %s10256_s2 = sld [smem:[#allocation14_spill]] }
 0xbf9   : > { %v5083_v31 = vpop.xlane.xlu1 %5082 }
 0xbfa   : > { %v5117_v12 = vpack.c.bf16 %v5083_v31, %v5081_v40 }
 0xbfd   : > { %v5085_v56 = vpop.xlane.xlu0 %5084 }
 0xc01   : > { %v5087_v63 = vpop.xlane.xlu1 %5086 }
 0xc02   : > { %v5118_v48 = vpack.c.bf16 %v5087_v63, %v5085_v56  ;;  %v7695_v63 = vld [vmem:[%s10242_s7 + $0x20] ss:$8 sps:$4 sm:$0xff]  }
 0xc03   : > { %v7728_v56 = vld [vmem:[%s10254_s15 + $0x20] ss:$8 sps:$4 sm:$0xff]  }
 0xc05   : > { %v5089_v41 = vpop.xlane.xlu0 %5088 }
 0xc09   : > { %v5091_v9 = vpop.xlane.xlu1 %5090 }
 0xc0a   : > { %v5119_v18 = vpack.c.bf16 %v5091_v9, %v5089_v41 }
 0xc0d   : > { %v5093_v30 = vpop.xlane.xlu0 %5092 }
 0xc11   : > { %v5095_v28 = vpop.xlane.xlu1 %5094 }
 0xc12   : > { %v5120_v37 = vpack.c.bf16 %v5095_v28, %v5093_v30  ;;  %v7700_v28 = vld [vmem:[%s10242_s7 + $0x34] ss:$8 sps:$4 sm:$0xff]  }
 0xc13   : > { %v7736_v30 = vld [vmem:[%s10254_s15 + $0x34] ss:$8 sps:$4 sm:$0xff]  }
 0xc15   : > { %v5097_v15 = vpop.xlane.xlu0 %5096 }
 0xc19   : > { %v5099_v42 = vpop.xlane.xlu1 %5098 }
 0xc1a   : > { %v5121_v0 = vpack.c.bf16 %v5099_v42, %v5097_v15 }
 0xc1d   : > { %v5101_v4 = vpop.xlane.xlu0 %5100 }
 0xc21   : > { %v5103_v59 = vpop.xlane.xlu1 %5102 }
 0xc22   : > { %v5122_v7 = vpack.c.bf16 %v5103_v59, %v5101_v4 }
 0xc25   : > { %v5105_v1 = vpop.xlane.xlu1 %5104 }
 0xc29   : > { %v5107_v50 = vpop.xlane.xlu0 %5106  ;;  %v9706_v52 = vpop.xlane.xlu1 %5154 }
 0xc2a   : > { %v5123_v24 = vpack.c.bf16 %v5107_v50, %v5105_v1 }
 0xc2c   : > { %7078 = vmatprep.subr.bf16.mxu0 %v5123_v24  ;;  %7222 = vmatprep.subr.bf16.mxu1 %v5123_v24  ;;  %v7734_v24 = vld [vmem:[%s10254_s15 + $0x30] ss:$8 sps:$4 sm:$0xff]  }
 0xc2d   : > { %v5185_v6 = vpop.xlane.xlu0 %5184  ;;  %7079 = vmatpush3.bf16.msra.mxu0 %v5115_v2  ;;  %7223 = vmatpush3.bf16.msra.mxu1 %v5115_v2  ;;  %v5183_v13 = vpop.xlane.xlu1 %5182 }
 0xc2e   : > { %7080 = vmatprep.subr.bf16.mxu0 %v5122_v7  ;;  %7224 = vmatprep.subr.bf16.mxu1 %v5122_v7  ;;  %v7703_v7 = vld [vmem:[%s10256_s2 + $0x4] ss:$8 sps:$4 sm:$0xff]  }
 0xc31   : > { %v5153_v55 = vpop.xlane.xlu0 %5152  ;;  %7081 = vmatpush3.bf16.msra.mxu0 %v5114_v57  ;;  %7225 = vmatpush3.bf16.msra.mxu1 %v5114_v57  ;;  %v5151_v14 = vpop.xlane.xlu1 %5150 }
 0xc32   : > { %7082 = vmatprep.subr.bf16.mxu0 %v5121_v0  ;;  %7226 = vmatprep.subr.bf16.mxu1 %v5121_v0 }
 0xc35   : > { %v5181_v27 = vpop.xlane.xlu0 %5180  ;;  %7083 = vmatpush3.bf16.msra.mxu0 %v5113_v36  ;;  %7227 = vmatpush3.bf16.msra.mxu1 %v5113_v36  ;;  %v5179_v21 = vpop.xlane.xlu1 %5178 }
 0xc36   : > { %7084 = vmatprep.subr.bf16.mxu0 %v5120_v37  ;;  %7228 = vmatprep.subr.bf16.mxu1 %v5120_v37  ;;  %v9728_v17 = vpack.c.bf16 %v5183_v13, %v5181_v27  ;;  %v7742_v13 = vld [vmem:[%s10254_s15 + $0x44] ss:$8 sps:$4 sm:$0xff]   ;;  %v7748_v27 = vld [vmem:[%s10254_s15 + $0x54] ss:$8 sps:$4 sm:$0xff]  }
 0xc39   : > { %v5149_v19 = vpop.xlane.xlu0 %5148  ;;  %7085 = vmatpush3.bf16.msra.mxu0 %v5112_v5  ;;  %7229 = vmatpush3.bf16.msra.mxu1 %v5112_v5  ;;  %v5147_v46 = vpop.xlane.xlu1 %5146  ;;  %v7701_v5 = vld [vmem:[%s10256_s2] ss:$8 sps:$4 sm:$0xff]  }
 0xc3a   : > { %7086 = vmatprep.subr.bf16.mxu0 %v5119_v18  ;;  %7230 = vmatprep.subr.bf16.mxu1 %v5119_v18  ;;  %v9732_v43 = vpack.c.bf16 %v5151_v14, %v5149_v19  ;;  %v7740_v14 = vld [vmem:[%s10254_s15 + $0x40] ss:$8 sps:$4 sm:$0xff]   ;;  %v7706_v18 = vld [vmem:[%s10256_s2 + $0x14] ss:$8 sps:$4 sm:$0xff]   ;;  %v7746_v19 = vld [vmem:[%s10254_s15 + $0x50] ss:$8 sps:$4 sm:$0xff]  }
 0xc3d   : > { %v5177_v58 = vpop.xlane.xlu0 %5176  ;;  %7087 = vmatpush3.bf16.msra.mxu0 %v9683_v51  ;;  %7231 = vmatpush3.bf16.msra.mxu1 %v9683_v51  ;;  %v5175_v11 = vpop.xlane.xlu1 %5174 }
 0xc3e   : > { %7088 = vmatprep.subr.bf16.mxu0 %v5118_v48  ;;  %7232 = vmatprep.subr.bf16.mxu1 %v5118_v48  ;;  %v9734_v3 = vpack.c.bf16 %v5179_v21, %v5177_v58  ;;  %v7704_v48 = vld [vmem:[%s10256_s2 + $0x10] ss:$8 sps:$4 sm:$0xff]   ;;  %v7709_v58 = vld [vmem:[%s10256_s2 + $0x24] ss:$8 sps:$4 sm:$0xff]  }
 0xc41   : > { %v5145_v35 = vpop.xlane.xlu0 %5144  ;;  %7089 = vmatpush3.bf16.msra.mxu0 %v9673_v8  ;;  %7233 = vmatpush3.bf16.msra.mxu1 %v9673_v8  ;;  %v5143_v20 = vpop.xlane.xlu1 %5142  ;;  %v7716_v8 = vld [vmem:[%s10254_s15] ss:$8 sps:$4 sm:$0xff]  }
 0xc42   : > { %7090 = vmatprep.subr.bf16.mxu0 %v5117_v12  ;;  %7234 = vmatprep.subr.bf16.mxu1 %v5117_v12  ;;  %v9742_v61 = vpack.c.bf16 %v5147_v46, %v5145_v35  ;;  %v7754_v46 = vld [vmem:[%s10254_s15 + $0x64] ss:$8 sps:$4 sm:$0xff]   ;;  %v7760_v12 = vld [vmem:[%s10254_s15 + $0x74] ss:$8 sps:$4 sm:$0xff]   ;;  %v7707_v35 = vld [vmem:[%s10256_s2 + $0x20] ss:$8 sps:$4 sm:$0xff]  }
 0xc45   : > { %v5173_v51 = vpop.xlane.xlu0 %5172  ;;  %7091 = vmatpush3.bf16.msra.mxu0 %v9663_v25  ;;  %7235 = vmatpush3.bf16.msra.mxu1 %v9663_v25  ;;  %v5187_v44 = vpop.xlane.xlu1 %5186  ;;  %v9726_v25 = vpack.c.bf16 %v9706_v52, %v5153_v55  ;;  %v7698_v52 = vld [vmem:[%s10242_s7 + $0x30] ss:$8 sps:$4 sm:$0xff]  }
 0xc46   : > { %7092 = vmatprep.subr.bf16.mxu0 %v5116_v49  ;;  %7236 = vmatprep.subr.bf16.mxu1 %v5116_v49  ;;  %v9716_v32 = vpack.c.bf16 %v5187_v44, %v5185_v6  ;;  %v9744_v39 = vpack.c.bf16 %v5175_v11, %v5173_v51  ;;  %v7752_v11 = vld [vmem:[%s10254_s15 + $0x60] ss:$8 sps:$4 sm:$0xff]   ;;  %v7758_v49 = vld [vmem:[%s10254_s15 + $0x70] ss:$8 sps:$4 sm:$0xff]   ;;  %v7715_v44 = vld [vmem:[%s10257_s0 + $0x4] ss:$8 sps:$4 sm:$0xff]  }
 0xc47   : > { %v7710_v51 = vld [vmem:[%s10256_s2 + $0x30] ss:$8 sps:$4 sm:$0xff]  }
 0xc49   : > { %v5141_v62 = vpop.xlane.xlu0 %5140  ;;  %7093 = vmatpush3.bf16.msra.mxu0 %v9654_v10  ;;  %7237 = vmatpush3.bf16.msra.mxu1 %v9654_v10  ;;  %v5171_v29 = vpop.xlane.xlu1 %5170 }
 0xc4a   : > { %7118 = vmatprep.subr.bf16.mxu0 %v9716_v32  ;;  %v9748_v31 = vpack.c.bf16 %v5143_v20, %v5141_v62  ;;  %v7712_v20 = vld [vmem:[%s10256_s2 + $0x34] ss:$8 sps:$4 sm:$0xff]   ;;  %v7727_v62 = vld [vmem:[%s10257_s0 + $0x24] ss:$8 sps:$4 sm:$0xff]   ;;  %s10260_s2 = sld [smem:[#allocation20_spill]] }
 0xc4c   : > { %5293 = vmatmul.mubr.bf16.vlgmr.msra.gmra.mxu0 %v7689_v33  ;;  %5784 = vmatmul.mubr.bf16.vlgmr.msra.gmra.mxu1 %v7716_v8  ;;  %v7721_v33 = vld [vmem:[%s10257_s0 + $0x14] ss:$8 sps:$4 sm:$0xff]   ;;  %v7719_v8 = vld [vmem:[%s10257_s0 + $0x10] ss:$8 sps:$4 sm:$0xff]  }
 0xc4d   : > { %v5169_v22 = vpop.xlane.xlu0 %5168  ;;  %7119 = vmatpush3.bf16.msra.mxu0 %v9726_v25  ;;  %v5139_v10 = vpop.xlane.xlu1 %5138  ;;  %5300 = vmatprep.mubr.bf16.mxu0 %v7694_v16  ;;  %v7733_v16 = vld [vmem:[%s10257_s0 + $0x34] ss:$8 sps:$4 sm:$0xff]  }
 0xc4e   : > { %7120 = vmatprep.subr.bf16.mxu0 %v9728_v17  ;;  %5791 = vmatprep.mubr.bf16.mxu1 %v7724_v34  ;;  %v9750_v40 = vpack.c.bf16 %v5171_v29, %v5169_v22  ;;  %v7725_v29 = vld [vmem:[%s10257_s0 + $0x20] ss:$8 sps:$4 sm:$0xff]   ;;  %v7731_v34 = vld [vmem:[%s10257_s0 + $0x30] ss:$8 sps:$4 sm:$0xff]   ;;  %v7745_v22 = vld [vmem:[%s10257_s0 + $0x54] ss:$8 sps:$4 sm:$0xff]  }
 0xc51   : > { %v5137_v23 = vpop.xlane.xlu0 %5136  ;;  %7121 = vmatpush3.bf16.msra.mxu0 %v9732_v43  ;;  %v5167_v53 = vpop.xlane.xlu1 %5166 }
 0xc52   : > { %7122 = vmatprep.subr.bf16.mxu0 %v9734_v3  ;;  %v9758_v42 = vpack.c.bf16 %v5139_v10, %v5137_v23  ;;  %v7743_v10 = vld [vmem:[%s10257_s0 + $0x50] ss:$8 sps:$4 sm:$0xff]   ;;  %v7761_v23 = vld [vmem:[%s10258_s1] sm:$0xff]  }
 0xc54   : > { %5301 = vmatmul.mubr.bf16.gmra.mxu0 %v7692_v60  ;;  %5792 = vmatmul.mubr.bf16.gmra.mxu1 %v7722_v26  ;;  %v7757_v60 = vld [vmem:[%s10257_s0 + $0x74] ss:$8 sps:$4 sm:$0xff]   ;;  %v7755_v26 = vld [vmem:[%s10257_s0 + $0x70] ss:$8 sps:$4 sm:$0xff]  }
 0xc55   : > { %v5165_v54 = vpop.xlane.xlu0 %5164  ;;  %7123 = vmatpush3.bf16.msra.mxu0 %v9742_v61  ;;  %v5135_v45 = vpop.xlane.xlu1 %5134  ;;  %5308 = vmatprep.mubr.bf16.mxu0 %v7697_v38 }
 0xc56   : > { %7124 = vmatprep.subr.bf16.mxu0 %v9744_v39  ;;  %5799 = vmatprep.mubr.bf16.mxu1 %v7730_v47  ;;  %v9760_v15 = vpack.c.bf16 %v5167_v53, %v5165_v54 }
 0xc59   : > { %v5133_v9 = vpop.xlane.xlu0 %5132  ;;  %7125 = vmatpush3.bf16.msra.mxu0 %v9748_v31  ;;  %v5163_v41 = vpop.xlane.xlu1 %5162 }
 0xc5a   : > { %7126 = vmatprep.subr.bf16.mxu0 %v9750_v40  ;;  %v5190_v1 = vpack.c.bf16 %v5135_v45, %v5133_v9 }
 0xc5c   : > { %5309 = vmatmul.mubr.bf16.gmra.mxu0 %v7695_v63  ;;  %5800 = vmatmul.mubr.bf16.gmra.mxu1 %v7728_v56 }
 0xc5d   : > { %v5161_v59 = vpop.xlane.xlu0 %5160  ;;  %7127 = vmatpush3.bf16.msra.mxu0 %v9758_v42  ;;  %v5131_v4 = vpop.xlane.xlu1 %5130  ;;  %5316 = vmatprep.mubr.bf16.mxu0 %v7700_v28 }
 0xc5e   : > { %7128 = vmatprep.subr.bf16.mxu0 %v9760_v15  ;;  %5807 = vmatprep.mubr.bf16.mxu1 %v7736_v30  ;;  %v5197_v50 = vpack.c.bf16 %v5163_v41, %v5161_v59 }
 0xc61   : > { %v5129_v2 = vpop.xlane.xlu0 %5128  ;;  %7129 = vmatpush3.bf16.msra.mxu0 %v5190_v1  ;;  %v5159_v57 = vpop.xlane.xlu1 %5158 }
 0xc62   : > { %v5189_v6 = vpack.c.bf16 %v5131_v4, %v5129_v2  ;;  %7130 = vmatprep.subr.bf16.mxu0 %v5197_v50 }
 0xc64   : > { %5317 = vmatmul.mubr.bf16.gmra.mxu0 %v7698_v52  ;;  %5808 = vmatmul.mubr.bf16.gmra.mxu1 %v7734_v24 }
 0xc65   : > { %v5157_v0 = vpop.xlane.xlu0 %5156  ;;  %7131 = vmatpush3.bf16.msra.mxu0 %v5189_v6  ;;  %5421 = vmatprep.mubr.bf16.mxu0 %v7703_v7  ;;  %v5127_v36 = vpop.xlane.xlu1 %5126 }
 0xc66   : > { %v5196_v55 = vpack.c.bf16 %v5159_v57, %v5157_v0  ;;  %5815 = vmatprep.mubr.bf16.mxu1 %v7742_v13 }
 0xc68   : > { %7132 = vmatprep.subr.bf16.mxu0 %v5196_v55 }
 0xc69   : > { %v5125_v37 = vpop.xlane.xlu0 %5124 }
 0xc6a   : > { %v5188_v21 = vpack.c.bf16 %v5127_v36, %v5125_v37 }
 0xc6c   : > { %7133 = vmatpush3.bf16.msra.mxu0 %v5188_v21  ;;  %5816 = vmatmul.mubr.bf16.gmra.mxu1 %v7740_v14 }
 0xc6d   : > { %7158 = vmatprep.subr.bf16.mxu0 %v9716_v32  ;;  %5823 = vmatprep.mubr.bf16.mxu1 %v7748_v27  ;;  %v7713_v32 = vld [vmem:[%s10257_s0] ss:$8 sps:$4 sm:$0xff]  }
 0xc6f   : > { %5422 = vmatmul.mubr.bf16.vlgmr.msra.gmra.mxu0 %v7701_v5 }
 0xc70   : > { %7159 = vmatpush3.bf16.msra.mxu0 %v9726_v25  ;;  %5429 = vmatprep.mubr.bf16.mxu0 %v7706_v18  ;;  %v7739_v25 = vld [vmem:[%s10257_s0 + $0x44] ss:$8 sps:$4 sm:$0xff]  }
 0xc71   : > { %7160 = vmatprep.subr.bf16.mxu0 %v9728_v17  ;;  %v7737_v17 = vld [vmem:[%s10257_s0 + $0x40] ss:$8 sps:$4 sm:$0xff]  }
 0xc74   : > { %7161 = vmatpush3.bf16.msra.mxu0 %v9732_v43  ;;  %5824 = vmatmul.mubr.bf16.gmra.mxu1 %v7746_v19  ;;  %v7751_v43 = vld [vmem:[%s10257_s0 + $0x64] ss:$8 sps:$4 sm:$0xff]  }
 0xc75   : > { %7162 = vmatprep.subr.bf16.mxu0 %v9734_v3  ;;  %5831 = vmatprep.mubr.bf16.mxu1 %v7754_v46  ;;  %v7749_v3 = vld [vmem:[%s10257_s0 + $0x60] ss:$8 sps:$4 sm:$0xff]   ;;  %s10259_s0 = sld [smem:[#allocation13_spill]] }
 0xc77   : > { %5430 = vmatmul.mubr.bf16.gmra.mxu0 %v7704_v48 }
 0xc78   : > { %7163 = vmatpush3.bf16.msra.mxu0 %v9742_v61  ;;  %5437 = vmatprep.mubr.bf16.mxu0 %v7709_v58 }
 0xc79   : > { %7164 = vmatprep.subr.bf16.mxu0 %v9744_v39 }
 0xc7b   : > { %v5217_v0 = vld [vmem:[%s10259_s0 + $0x28] sm:$0xff]  ;;  %v5216_v37 = vld [vmem:[%s10259_s0 + $0x20] sm:$0xff]  ;;  %v5219_v27 = vld [vmem:[%s10259_s0 + $0x38] sm:$0xff] }
 0xc7c   : > { %7165 = vmatpush3.bf16.msra.mxu0 %v9748_v31  ;;  %5832 = vmatmul.mubr.bf16.gmra.mxu1 %v7752_v11  ;;  %v5215_v48 = vld [vmem:[%s10259_s0 + $0x18] sm:$0xff] }
 0xc7d   : > { %7166 = vmatprep.subr.bf16.mxu0 %v9750_v40  ;;  %5839 = vmatprep.mubr.bf16.mxu1 %v7760_v12 }
 0xc7f   : > { %5438 = vmatmul.mubr.bf16.gmra.mxu0 %v7707_v35 }
 0xc80   : > { %7167 = vmatpush3.bf16.msra.mxu0 %v9758_v42  ;;  %5445 = vmatprep.mubr.bf16.mxu0 %v7712_v20  ;;  %v5214_v20 = vld [vmem:[%s10259_s0 + $0x10] sm:$0xff] }
 0xc81   : > { %7168 = vmatprep.subr.bf16.mxu0 %v9760_v15 }
 0xc84   : > { %7169 = vmatpush3.bf16.msra.mxu0 %v5190_v1  ;;  %5840 = vmatmul.mubr.bf16.gmra.mxu1 %v7758_v49 }
 0xc85   : > { %7170 = vmatprep.subr.bf16.mxu0 %v5197_v50 }
 0xc87   : > { %5446 = vmatmul.mubr.bf16.gmra.mxu0 %v7710_v51 }
 0xc88   : > { %7171 = vmatpush3.bf16.msra.mxu0 %v5189_v6  ;;  %5606 = vmatprep.mubr.bf16.mxu0 %v7715_v44 }
 0xc89   : > { %7172 = vmatprep.subr.bf16.mxu0 %v5196_v55  ;;  %v5218_v55 = vld [vmem:[%s10259_s0 + $0x30] sm:$0xff] }
 0xc8c   : > { %7173 = vmatpush3.bf16.msra.mxu0 %v5188_v21 }
 0xc8f   : > { %5607 = vmatmul.mubr.bf16.vlgmr.msra.gmra.mxu0 %v7713_v32 }
 0xc90   : > { %5614 = vmatprep.mubr.bf16.mxu0 %v7721_v33 }
 0xc97   : > { %5615 = vmatmul.mubr.bf16.gmra.mxu0 %v7719_v8 }
 0xc98   : > { %5622 = vmatprep.mubr.bf16.mxu0 %v7727_v62  ;;  %v5213_v62 = vld [vmem:[%s10259_s0 + $0x8] sm:$0xff] }
 0xc9f   : > { %5623 = vmatmul.mubr.bf16.gmra.mxu0 %v7725_v29 }
 0xca0   : > { %5630 = vmatprep.mubr.bf16.mxu0 %v7733_v16 }
 0xca7   : > { %5631 = vmatmul.mubr.bf16.gmra.mxu0 %v7731_v34 }
 0xca8   : > { %5638 = vmatprep.mubr.bf16.mxu0 %v7739_v25 }
 0xcaf   : > { %5639 = vmatmul.mubr.bf16.gmra.mxu0 %v7737_v17 }
 0xcb0   : > { %5646 = vmatprep.mubr.bf16.mxu0 %v7745_v22  ;;  %v5212_v22 = vld [vmem:[%s10259_s0] sm:$0xff]  ;;  %s10261_s0 = sld [smem:[#allocation15_spill]] }
 0xcb7   : > { %5647 = vmatmul.mubr.bf16.gmra.mxu0 %v7743_v10 }
 0xcb8   : > { %5654 = vmatprep.mubr.bf16.mxu0 %v7751_v43 }
 0xcbf   : > { %5655 = vmatmul.mubr.bf16.gmra.mxu0 %v7749_v3 }
 0xcc0   : > { %5662 = vmatprep.mubr.bf16.mxu0 %v7757_v60 }
 0xcc7   : > { %5663 = vmatmul.mubr.bf16.gmra.mxu0 %v7755_v26 }
 0xcc8   : > { %7382 = vmatprep.mubr.msk.bf16.mxu0 %vm1557_vm0, %v7761_v23 }
 0xd0c   : > { %v7094_v53 = vpop.f32.mrf.mxu0  ;;  %v7238_v38 = vpop.f32.mrf.mxu1 }
 0xd0e   : > { %v7095_v47 = vpop.f32.mrf.mxu0  ;;  %v7239_v61 = vpop.f32.mrf.mxu1 }
 0xd0f   : > { %v9811_v39 = vadd.f32 %v7239_v61, %v7238_v38  ;;  %v7096_v29 = vadd.f32 %v7095_v47, %v7094_v53 }
 0xd10   : > { %v7097_v54 = vpop.f32.mrf.mxu0  ;;  %v7241_v45 = vpop.f32.mrf.mxu1 }
 0xd11   : > { %v5295_v23 = vadd.f32 %v7096_v29, %v5212_v22 }
 0xd12   : > { %v7098_v31 = vpop.f32.mrf.mxu0  ;;  %v7242_v40 = vpop.f32.mrf.mxu1 }
 0xd13   : > { %v9813_v63 = vadd.f32 %v7242_v40, %v7241_v45  ;;  %v7099_v35 = vadd.f32 %v7098_v31, %v7097_v54  ;;  %v7769_v31 = vld [vmem:[%s10260_s2] sm:$0xff]   ;;  %v5325_v40 = vmax.f32 %v5295_v23, 0.0  ;;  %v5342_v23 = vld [vmem:[%s10261_s0 + $0x8] sm:$0xff] }
 0xd14   : > { %v7100_v56 = vpop.f32.mrf.mxu0  ;;  %v7244_v9 = vpop.f32.mrf.mxu1  ;;  %7414 = vmatprep.mubr.bf16.mxu1 %v7769_v31 }
 0xd15   : > { %v5298_v43 = vadd.f32 %v7099_v35, %v5213_v62 }
 0xd16   : > { %v7101_v41 = vpop.f32.mrf.mxu0  ;;  %v7245_v28 = vpop.f32.mrf.mxu1 }
 0xd17   : > { %v9815_v30 = vadd.f32 %v7245_v28, %v7244_v9  ;;  %v7102_v58 = vadd.f32 %v7101_v41, %v7100_v56  ;;  %v5326_v47 = vmax.f32 %v5298_v43, 0.0  ;;  %v5343_v43 = vld [vmem:[%s10261_s0 + $0x10] sm:$0xff] }
 0xd18   : > { %v7103_v42 = vpop.f32.mrf.mxu0  ;;  %v7247_v15 = vpop.f32.mrf.mxu1 }
 0xd19   : > { %v5303_v16 = vadd.f32 %v7102_v58, %v5214_v20  ;;  %v5988_v28 = vpack.c.bf16 %v5326_v47, %v5325_v40 }
 0xd1a   : > { %v7104_v59 = vpop.f32.mrf.mxu0  ;;  %v7248_v4 = vpop.f32.mrf.mxu1 }
 0xd1b   : > { %v9817_v1 = vadd.f32 %v7248_v4, %v7247_v15  ;;  %v7105_v5 = vadd.f32 %v7104_v59, %v7103_v42  ;;  %v5327_v38 = vmax.f32 %v5303_v16, 0.0  ;;  %v7762_v4 = vld [vmem:[%s10258_s1 + $0x8] sm:$0xff]  }
 0xd1c   : > { %v7106_v50 = vpop.f32.mrf.mxu0  ;;  %v9825_v49 = vpop.f32.mrf.mxu1 }
 0xd1d   : > { %v5306_v51 = vadd.f32 %v7105_v5, %v5215_v48  ;;  %v5348_v48 = vld [vmem:[%s10261_s0 + $0x38] sm:$0xff] }
 0xd1e   : > { %v7107_v52 = vpop.f32.mrf.mxu0  ;;  %v9833_v10 = vpop.f32.mrf.mxu1 }
 0xd1f   : > { %v7108_v36 = vadd.f32 %v7107_v52, %v7106_v50  ;;  %v5328_v3 = vmax.f32 %v5306_v51, 0.0  ;;  %v7763_v50 = vld [vmem:[%s10258_s1 + $0x10] sm:$0xff]  }
 0xd20   : > { %v7109_v24 = vpop.f32.mrf.mxu0  ;;  %v9837_v53 = vpop.f32.mrf.mxu1 }
 0xd21   : > { %v5311_v11 = vadd.f32 %v7108_v36, %v5216_v37  ;;  %v5989_v45 = vpack.c.bf16 %v5328_v3, %v5327_v38 }
 0xd22   : > { %v7110_v2 = vpop.f32.mrf.mxu0  ;;  %v9840_v9 = vpop.f32.mrf.mxu1 }
 0xd23   : > { %v7111_v13 = vadd.f32 %v7110_v2, %v7109_v24  ;;  %v5329_v34 = vmax.f32 %v5311_v11, 0.0  ;;  %v5344_v11 = vld [vmem:[%s10261_s0 + $0x18] sm:$0xff] }
 0xd24   : > { %v7112_v7 = vpop.f32.mrf.mxu0  ;;  %v9842_v15 = vpop.f32.mrf.mxu1 }
 0xd25   : > { %v5314_v18 = vadd.f32 %v7111_v13, %v5217_v0  ;;  %v7765_v0 = vld [vmem:[%s10258_s1 + $0x20] sm:$0xff]  }
 0xd26   : > { %v7113_v6 = vpop.f32.mrf.mxu0  ;;  %v9846_v24 = vpop.f32.mrf.mxu1 }
 0xd27   : > { %v7114_v57 = vadd.f32 %v7113_v6, %v7112_v7  ;;  %v5330_v44 = vmax.f32 %v5314_v18, 0.0 }
 0xd28   : > { %v7115_v14 = vpop.f32.mrf.mxu0  ;;  %v9850_v6 = vpop.f32.mrf.mxu1 }
 0xd29   : > { %v5319_v19 = vadd.f32 %v7114_v57, %v5218_v55  ;;  %v5990_v26 = vpack.c.bf16 %v5330_v44, %v5329_v34  ;;  %v7764_v57 = vld [vmem:[%s10258_s1 + $0x18] sm:$0xff]   ;;  %v5848_v34 = vld [vmem:[%s10262_s3] sm:$0xff] }
 0xd2a   : > { %v7116_v21 = vpop.f32.mrf.mxu0  ;;  %v9854_v37 = vpop.f32.mrf.mxu1 }
 0xd2b   : > { %v7117_v46 = vadd.f32 %v7116_v21, %v7115_v14  ;;  %v5331_v32 = vmax.f32 %v5319_v19, 0.0  ;;  %v5347_v21 = vld [vmem:[%s10261_s0 + $0x30] sm:$0xff] }
 0xd2c   : > { %v9863_v51 = vpop.f32.mrf.mxu1 }
 0xd2d   : > { %v5322_v12 = vadd.f32 %v7117_v46, %v5219_v27  ;;  %v5346_v27 = vld [vmem:[%s10261_s0 + $0x28] sm:$0xff]  ;;  %v5345_v46 = vld [vmem:[%s10261_s0 + $0x20] sm:$0xff] }
 0xd2e   : > { %v9873_v40 = vpop.f32.mrf.mxu1 }
 0xd2f   : > { %v5332_v33 = vmax.f32 %v5322_v12, 0.0  ;;  %v9827_v8 = vpop.f32.mrf.mxu0 }
 0xd31   : > { %v9830_v25 = vpop.f32.mrf.mxu0  ;;  %v5991_v17 = vpack.c.bf16 %v5332_v33, %v5331_v32  ;;  %v7766_v32 = vld [vmem:[%s10258_s1 + $0x28] sm:$0xff]   ;;  %v9866_v33 = vpop.permute.xlu0 %5865 }
 0xd33   : > { %v9835_v60 = vpop.f32.mrf.mxu0  ;;  %7374 = vmatprep.subr.bf16.mxu0 %v5991_v17 }
 0xd34   : > { %7375 = vmatpush3.bf16.msra.mxu0 %v5991_v17  ;;  %v7767_v17 = vld [vmem:[%s10258_s1 + $0x30] sm:$0xff]  }
 0xd35   : > { %v7138_v61 = vpop.f32.mrf.mxu0  ;;  %7376 = vmatprep.subr.bf16.mxu0 %v5990_v26 }
 0xd36   : > { %v7139_v22 = vadd.f32 %v7138_v61, %v9835_v60  ;;  %v5341_v60 = vld [vmem:[%s10261_s0] sm:$0xff]  ;;  %s10264_s0 = sshll.u32 %s10266_s23, 7 }
 0xd37   : > { %v7140_v54 = vpop.f32.mrf.mxu0 }
 0xd38   : > { %7377 = vmatpush3.bf16.msra.mxu0 %v5990_v26 }
 0xd39   : > { %v7141_v56 = vpop.f32.mrf.mxu0  ;;  %7378 = vmatprep.subr.bf16.mxu0 %v5989_v45 }
 0xd3a   : > { %v7142_v62 = vadd.f32 %v7141_v56, %v7140_v54  ;;  %v7136_v54 = vadd.f32 %v9830_v25, %v9827_v8  ;;  %v5868_v56 = vmul.f32 %v9866_v33, %v5848_v34 }
 0xd3b   : > { %v7143_v41 = vpop.f32.mrf.mxu0 }
 0xd3c   : > { %7379 = vmatpush3.bf16.msra.mxu0 %v5989_v45  ;;  %v5432_v61 = vadd.f32 %v7142_v62, %v5343_v43 }
 0xd3d   : > { %v7144_v42 = vpop.f32.mrf.mxu0  ;;  %7380 = vmatprep.subr.bf16.mxu0 %v5988_v28 }
 0xd3e   : > { %v7145_v19 = vadd.f32 %v7144_v42, %v7143_v41 }
 0xd3f   : > { %v7146_v59 = vpop.f32.mrf.mxu0 }
 0xd40   : > { %7381 = vmatpush3.bf16.msra.mxu0 %v5988_v28  ;;  %v5435_v3 = vadd.f32 %v7145_v19, %v5344_v11  ;;  %v5901_v19 = vld [vmem:[%s10263_s5 + $0x8] sm:$0xff] }
 0xd41   : > { %v7147_v52 = vpop.f32.mrf.mxu0 }
 0xd42   : > { %v7148_v18 = vadd.f32 %v7147_v52, %v7146_v59  ;;  %v5849_v52 = vld [vmem:[%s10262_s3 + $0x8] sm:$0xff] }
 0xd43   : > { %v7149_v2 = vpop.f32.mrf.mxu0  ;;  %7383 = vmatmul.mubr.msk.bf16.vlgmr.msra.gmra.mxu0 %vm1557_vm0, %v7762_v4  ;;  %v5427_v4 = vadd.f32 %v7139_v22, %v5342_v23  ;;  %v5902_v23 = vld [vmem:[%s10263_s5 + $0x10] sm:$0xff] }
 0xd44   : > { %7386 = vmatprep.mubr.msk.bf16.mxu0 %vm1557_vm0, %v7763_v50  ;;  %v5440_v29 = vadd.f32 %v7148_v18, %v5345_v46  ;;  %v5850_v18 = vld [vmem:[%s10262_s3 + $0x10] sm:$0xff]  ;;  %v7771_v46 = vld [vmem:[%s8003_s27] sm:$0xff]  }
 0xd45   : > { %v7150_v7 = vpop.f32.mrf.mxu0 }
 0xd46   : > { %v7151_v14 = vadd.f32 %v7150_v7, %v7149_v2  ;;  %v5458_v28 = vmax.f32 %v5440_v29, 0.0  ;;  %v5457_v2 = vmax.f32 %v5435_v3, 0.0 }
 0xd47   : > { %v7152_v13 = vpop.f32.mrf.mxu0 }
 0xd48   : > { %v5443_v12 = vadd.f32 %v7151_v14, %v5346_v27  ;;  %v7768_v27 = vld [vmem:[%s10258_s1 + $0x38] sm:$0xff]   ;;  %s10030_s1 = scalar_lea.vmem %s8018_s20, %s10264_s0 }
 0xd49   : > { %v7153_v55 = vpop.f32.mrf.mxu0 }
 0xd4a   : > { %v7154_v36 = vadd.f32 %v7153_v55, %v7152_v13  ;;  %v5459_v38 = vmax.f32 %v5443_v12, 0.0  ;;  %v9883_v13 = vpop.f32.mrf.mxu1  ;;  %v5456_v55 = vmax.f32 %v5432_v61, 0.0 }
 0xd4b   : > { %v7155_v5 = vpop.f32.mrf.mxu0  ;;  %7387 = vmatmul.mubr.msk.bf16.gmra.mxu0 %vm1557_vm0, %v7764_v57  ;;  %v5424_v57 = vadd.f32 %v7136_v54, %v5341_v60  ;;  %v5903_v54 = vld [vmem:[%s10263_s5 + $0x18] sm:$0xff]  ;;  %v7252_v60 = vadd.f32 %v9833_v10, %v9825_v49 }
 0xd4c   : > { %7390 = vmatprep.mubr.msk.bf16.mxu0 %vm1557_vm0, %v7765_v0  ;;  %v5448_v35 = vadd.f32 %v7154_v36, %v5347_v21  ;;  %v6316_v7 = vpack.c.bf16 %v5459_v38, %v5458_v28  ;;  %v5869_v36 = vmul.f32 %v9866_v33, %v5849_v52  ;;  %v5455_v21 = vmax.f32 %v5427_v4, 0.0  ;;  %v9892_v12 = vpop.f32.mrf.mxu1 }
 0xd4d   : > { %v7156_v58 = vpop.f32.mrf.mxu0  ;;  %v6315_v11 = vpack.c.bf16 %v5457_v2, %v5456_v55  ;;  %v7779_v55 = vld [vmem:[%s8003_s27 + $0x20] sm:$0xff]  }
 0xd4e   : > { %v7157_v20 = vadd.f32 %v7156_v58, %v7155_v5  ;;  %v5460_v47 = vmax.f32 %v5448_v35, 0.0  ;;  %v9899_v43 = vpop.f32.mrf.mxu1 }
 0xd4f   : > { %v7174_v44 = vpop.f32.mrf.mxu0 }
 0xd50   : > { %v5451_v16 = vadd.f32 %v7157_v20, %v5348_v48  ;;  %v5454_v20 = vmax.f32 %v5424_v57, 0.0  ;;  %v9909_v61 = vpop.f32.mrf.mxu1 }
 0xd51   : > { %v7175_v26 = vpop.f32.mrf.mxu0 }
 0xd52   : > { %v5461_v45 = vmax.f32 %v5451_v16, 0.0  ;;  %v7176_v31 = vadd.f32 %v7175_v26, %v7174_v44  ;;  %v5851_v16 = vld [vmem:[%s10262_s3 + $0x18] sm:$0xff]  ;;  %v6314_v34 = vpack.c.bf16 %v5455_v21, %v5454_v20  ;;  %v7271_v2 = vpop.f32.mrf.mxu1 }
 0xd53   : > { %v7177_v41 = vpop.f32.mrf.mxu0  ;;  %7391 = vmatmul.mubr.msk.bf16.gmra.mxu0 %vm1557_vm0, %v7766_v32  ;;  %v5870_v32 = vmul.f32 %v9866_v33, %v5850_v18  ;;  %v7780_v18 = vld [vmem:[%s8003_s27 + $0x28] sm:$0xff]  }
 0xd54   : > { %v5786_v42 = vadd.f32 %v9811_v39, %v7176_v31  ;;  %v6317_v59 = vpack.c.bf16 %v5461_v45, %v5460_v47  ;;  %7394 = vmatprep.mubr.msk.bf16.mxu0 %vm1557_vm0, %v7767_v17  ;;  %v5900_v39 = vld [vmem:[%s10263_s5] sm:$0xff]  ;;  %v5871_v47 = vmul.f32 %v9866_v33, %v5851_v16  ;;  %v7272_v57 = vpop.f32.mrf.mxu1 }
 0xd55   : > { %v7178_v50 = vpop.f32.mrf.mxu0 }
 0xd56   : > { %v5884_v8 = vadd.f32 %v5868_v56, %v5786_v42  ;;  %v7179_v25 = vadd.f32 %v7178_v50, %v7177_v41  ;;  %7430 = vmatprep.subr.bf16.mxu0 %v6317_v59  ;;  %v7772_v42 = vld [vmem:[%s8003_s27 + $0x8] sm:$0xff]  }
 0xd57   : > { %v7180_v0 = vpop.f32.mrf.mxu0  ;;  %7431 = vmatpush3.bf16.msra.mxu0 %v6317_v59 }
 0xd58   : > { %v5789_v14 = vadd.f32 %v9813_v63, %v7179_v25  ;;  %7432 = vmatprep.subr.bf16.mxu0 %v6316_v7  ;;  %v5916_v35 = vadd.f32 %v5900_v39, %v5884_v8 }
 0xd59   : > { %v7181_v5 = vpop.f32.mrf.mxu0 }
 0xd5a   : > { %v5885_v48 = vadd.f32 %v5869_v36, %v5789_v14  ;;  %v7182_v58 = vadd.f32 %v7181_v5, %v7180_v0  ;;  %v5932_v3 = vmax.f32 %v5916_v35, 0.0  ;;  %v7776_v0 = vld [vmem:[%s8003_s27 + $0x18] sm:$0xff]   ;;  %v7274_v36 = vpop.f32.mrf.mxu1 }
 0xd5b   : > { %v7183_v44 = vpop.f32.mrf.mxu0  ;;  %7433 = vmatpush3.bf16.msra.mxu0 %v6316_v7 }
 0xd5c   : > { %v5794_v63 = vadd.f32 %v9815_v30, %v7182_v58  ;;  %7434 = vmatprep.subr.bf16.mxu0 %v6315_v11  ;;  %v5917_v62 = vadd.f32 %v5901_v19, %v5885_v48  ;;  %7395 = vmatmul.mubr.msk.bf16.gmra.mxu0 %vm1557_vm0, %v7768_v27  ;;  %v7275_v5 = vpop.f32.mrf.mxu1 }
 0xd5d   : > { %v7184_v29 = vpop.f32.mrf.mxu0  ;;  %7438 = vmatprep.mubr.msk.bf16.mxu0 %vm1557_vm0, %v7771_v46  ;;  %v7783_v46 = vld [vmem:[%s8003_s27 + $0x30] sm:$0xff]  }
 0xd5e   : > { %v5886_v17 = vadd.f32 %v5870_v32, %v5794_v63  ;;  %v7185_v22 = vadd.f32 %v7184_v29, %v7183_v44  ;;  %v5933_v30 = vmax.f32 %v5917_v62, 0.0  ;;  %v7277_v58 = vpop.f32.mrf.mxu1  ;;  %v7784_v44 = vld [vmem:[%s8003_s27 + $0x38] sm:$0xff]  }
 0xd5f   : > { %v7186_v26 = vpop.f32.mrf.mxu0  ;;  %7435 = vmatpush3.bf16.msra.mxu0 %v6315_v11 }
 0xd60   : > { %v5797_v38 = vadd.f32 %v9817_v1, %v7185_v22  ;;  %7436 = vmatprep.subr.bf16.mxu0 %v6314_v34  ;;  %v9904_v45 = vpack.c.bf16 %v5933_v30, %v5932_v3  ;;  %v5918_v28 = vadd.f32 %v5902_v23, %v5886_v17  ;;  %v7775_v1 = vld [vmem:[%s8003_s27 + $0x10] sm:$0xff]   ;;  %v7278_v20 = vpop.f32.mrf.mxu1 }
 0xd61   : > { %v7187_v31 = vpop.f32.mrf.mxu0 }
 0xd62   : > { %v5887_v56 = vadd.f32 %v5871_v47, %v5797_v38  ;;  %v7188_v41 = vadd.f32 %v7187_v31, %v7186_v26  ;;  %v5934_v8 = vmax.f32 %v5918_v28, 0.0  ;;  %v7280_v62 = vpop.f32.mrf.mxu1  ;;  %v7279_v38 = vadd.f32 %v7278_v20, %v7277_v58  ;;  %v5861_v47 = vld [vmem:[%s10262_s3 + $0x68] sm:$0xff]  ;;  %v5862_v31 = vld [vmem:[%s10262_s3 + $0x70] sm:$0xff] }
 0xd63   : > { %v9912_v59 = vpop.f32.mrf.mxu0  ;;  %7437 = vmatpush3.bf16.msra.mxu0 %v6314_v34 }
 0xd64   : > { %v9915_v4 = vadd.f32 %v7252_v60, %v7188_v41  ;;  %v5919_v50 = vadd.f32 %v5903_v54, %v5887_v56  ;;  %v7281_v34 = vpop.f32.mrf.mxu1  ;;  %v7276_v54 = vadd.f32 %v7275_v5, %v7274_v36  ;;  %v5860_v60 = vld [vmem:[%s10262_s3 + $0x60] sm:$0xff]  ;;  %v5863_v5 = vld [vmem:[%s10262_s3 + $0x78] sm:$0xff] }
 0xd65   : > { %v9917_v52 = vpop.f32.mrf.mxu0 }
 0xd66   : > { %v5935_v25 = vmax.f32 %v5919_v50, 0.0  ;;  %7439 = vmatmul.mubr.msk.bf16.vlgmr.msra.gmra.mxu0 %vm1557_vm0, %v7772_v42  ;;  %v7283_v30 = vpop.f32.mrf.mxu1 }
 0xd67   : > { %v9920_v49 = vpop.f32.mrf.mxu0  ;;  %7442 = vmatprep.mubr.msk.bf16.mxu0 %vm1557_vm0, %v7775_v1  ;;  %v7282_v1 = vadd.f32 %v7281_v34, %v7280_v62 }
 0xd68   : > { %v9923_v10 = vpack.c.bf16 %v5935_v25, %v5934_v8  ;;  %v7284_v50 = vpop.f32.mrf.mxu1  ;;  %v5881_v8 = vmul.f32 %v9866_v33, %v5861_v47  ;;  %v5882_v25 = vmul.f32 %v9866_v33, %v5862_v31  ;;  %v5915_v47 = vld [vmem:[%s10263_s5 + $0x78] sm:$0xff]  ;;  %v5912_v31 = vld [vmem:[%s10263_s5 + $0x60] sm:$0xff] }
 0xd69   : > { %v9925_v7 = vpop.f32.mrf.mxu0  ;;  %v7285_v62 = vadd.f32 %v7284_v50, %v7283_v30 }
 0xd6b   : > { %v9928_v39 = vpop.f32.mrf.mxu0 }
 0xd6d   : > { %v9931_v14 = vpop.f32.mrf.mxu0 }
 0xd6e   : > { %7443 = vmatmul.mubr.msk.bf16.gmra.mxu0 %vm1557_vm0, %v7776_v0 }
 0xd6f   : > { %v9934_v27 = vpop.f32.mrf.mxu0  ;;  %7446 = vmatprep.mubr.msk.bf16.mxu0 %vm1557_vm0, %v7779_v55 }
 0xd71   : > { %v7199_v21 = vpop.f32.mrf.mxu0 }
 0xd72   : > { %v7200_v34 = vadd.f32 %v7199_v21, %v9934_v27 }
 0xd73   : > { %v7201_v19 = vpop.f32.mrf.mxu0 }
 0xd75   : > { %v7202_v48 = vpop.f32.mrf.mxu0 }
 0xd76   : > { %7447 = vmatmul.mubr.msk.bf16.gmra.mxu0 %vm1557_vm0, %v7780_v18  ;;  %v7273_v18 = vadd.f32 %v7272_v57, %v7271_v2  ;;  %v7203_v20 = vadd.f32 %v7202_v48, %v7201_v19  ;;  %v5883_v48 = vmul.f32 %v9866_v33, %v5863_v5 }
 0xd77   : > { %v7204_v11 = vpop.f32.mrf.mxu0  ;;  %7450 = vmatprep.mubr.msk.bf16.mxu0 %vm1557_vm0, %v7783_v46  ;;  %v5859_v46 = vld [vmem:[%s10262_s3 + $0x58] sm:$0xff] }
 0xd78   : > { %v5879_v19 = vmul.f32 %v9866_v33, %v5859_v46 }
 0xd79   : > { %v7205_v35 = vpop.f32.mrf.mxu0 }
 0xd7a   : > { %v7206_v55 = vadd.f32 %v7205_v35, %v7204_v11  ;;  %v7267_v35 = vadd.f32 %v9892_v12, %v9883_v13  ;;  %v7264_v13 = vadd.f32 %v9873_v40, %v9863_v51  ;;  %v5911_v40 = vld [vmem:[%s10263_s5 + $0x58] sm:$0xff] }
 0xd7b   : > { %v7207_v63 = vpop.f32.mrf.mxu0 }
 0xd7c   : > { %v5821_v12 = vadd.f32 %v7267_v35, %v7203_v20 }
 0xd7d   : > { %v7208_v32 = vpop.f32.mrf.mxu0 }
 0xd7e   : > { %7451 = vmatmul.mubr.msk.bf16.gmra.mxu0 %vm1557_vm0, %v7784_v44  ;;  %v7209_v41 = vadd.f32 %v7208_v32, %v7207_v63  ;;  %v7270_v44 = vadd.f32 %v9909_v61, %v9899_v43  ;;  %v5880_v63 = vmul.f32 %v9866_v33, %v5860_v60  ;;  %v5914_v43 = vld [vmem:[%s10263_s5 + $0x70] sm:$0xff]  ;;  %v5913_v61 = vld [vmem:[%s10263_s5 + $0x68] sm:$0xff]  ;;  %v5855_v60 = vld [vmem:[%s10262_s3 + $0x38] sm:$0xff] }
 0xd7f   : > { %v7210_v29 = vpop.f32.mrf.mxu0 }
 0xd81   : > { %v7211_v16 = vpop.f32.mrf.mxu0 }
 0xd82   : > { %v7212_v23 = vadd.f32 %v7211_v16, %v7210_v29  ;;  %v5858_v29 = vld [vmem:[%s10262_s3 + $0x50] sm:$0xff]  ;;  %v5829_v16 = vadd.f32 %v7273_v18, %v7209_v41  ;;  %v7194_v41 = vadd.f32 %v9925_v7, %v9920_v49  ;;  %v7258_v49 = vadd.f32 %v9846_v24, %v9842_v15 }
 0xd83   : > { %v7213_v17 = vpop.f32.mrf.mxu0 }
 0xd84   : > { %v5834_v58 = vadd.f32 %v7276_v54, %v7212_v23  ;;  %v7197_v23 = vadd.f32 %v9931_v14, %v9928_v39  ;;  %v5895_v54 = vadd.f32 %v5879_v19, %v5829_v16  ;;  %v7261_v39 = vadd.f32 %v9854_v37, %v9850_v6  ;;  %v5910_v6 = vld [vmem:[%s10263_s5 + $0x50] sm:$0xff] }
 0xd85   : > { %v7214_v22 = vpop.f32.mrf.mxu0  ;;  %v5854_v37 = vld [vmem:[%s10262_s3 + $0x30] sm:$0xff] }
 0xd86   : > { %v7215_v3 = vadd.f32 %v7214_v22, %v7213_v17  ;;  %v5856_v17 = vld [vmem:[%s10262_s3 + $0x40] sm:$0xff]  ;;  %v5857_v22 = vld [vmem:[%s10262_s3 + $0x48] sm:$0xff]  ;;  %v5896_v30 = vadd.f32 %v5880_v63, %v5834_v58  ;;  %v5813_v7 = vadd.f32 %v7261_v39, %v7197_v23  ;;  %v5927_v46 = vadd.f32 %v5911_v40, %v5895_v54  ;;  %v7773_v39 = vld [vmem:[%s10260_s2 + $0x10] sm:$0xff]  }
 0xd87   : > { %v7216_v26 = vpop.f32.mrf.mxu0  ;;  %v5876_v14 = vmul.f32 %v9866_v33, %v5856_v17  ;;  %v5877_v51 = vmul.f32 %v9866_v33, %v5857_v22  ;;  %v7255_v58 = vadd.f32 %v9840_v9, %v9837_v53  ;;  %v5853_v63 = vld [vmem:[%s10262_s3 + $0x28] sm:$0xff] }
 0xd88   : > { %v5837_v28 = vadd.f32 %v7279_v38, %v7215_v3  ;;  %v5826_v3 = vadd.f32 %v7270_v44, %v7206_v55  ;;  %v5878_v38 = vmul.f32 %v9866_v33, %v5858_v29  ;;  %v5928_v50 = vadd.f32 %v5912_v31, %v5896_v30  ;;  %v5852_v29 = vld [vmem:[%s10262_s3 + $0x20] sm:$0xff]  ;;  %v5905_v30 = vld [vmem:[%s10263_s5 + $0x28] sm:$0xff] }
 0xd89   : > { %v7217_v56 = vpop.f32.mrf.mxu0  ;;  %v5943_v53 = vmax.f32 %v5927_v46, 0.0  ;;  %v7778_v40 = vld [vmem:[%s10260_s2 + $0x28] sm:$0xff]  }
 0xd8a   : > { %v7218_v42 = vadd.f32 %v7217_v56, %v7216_v26  ;;  %v5897_v11 = vadd.f32 %v5881_v8, %v5837_v28  ;;  %v5818_v28 = vadd.f32 %v7264_v13, %v7200_v34  ;;  %v7191_v8 = vadd.f32 %v9917_v52, %v9912_v59  ;;  %v5909_v52 = vld [vmem:[%s10263_s5 + $0x48] sm:$0xff] }
 0xd8b   : > { %v7219_v0 = vpop.f32.mrf.mxu0  ;;  %v5875_v59 = vmul.f32 %v9866_v33, %v5855_v60  ;;  %v5944_v5 = vmax.f32 %v5928_v50, 0.0  ;;  %v7781_v60 = vld [vmem:[%s10260_s2 + $0x30] sm:$0xff]  }
 0xd8c   : > { %v5842_v36 = vadd.f32 %v7282_v1, %v7218_v42  ;;  %v5929_v56 = vadd.f32 %v5913_v61, %v5897_v11  ;;  %v5894_v42 = vadd.f32 %v5878_v38, %v5826_v3  ;;  %v5892_v15 = vadd.f32 %v5876_v14, %v5818_v28  ;;  %v5906_v61 = vld [vmem:[%s10263_s5 + $0x30] sm:$0xff]  ;;  %v7774_v14 = vld [vmem:[%s10260_s2 + $0x18] sm:$0xff]  }
 0xd8d   : > { %v7220_v32 = vpop.f32.mrf.mxu0  ;;  %v5805_v44 = vadd.f32 %v7255_v58, %v7191_v8  ;;  %v5891_v16 = vadd.f32 %v5875_v59, %v5813_v7  ;;  %v7782_v28 = vld [vmem:[%s10260_s2 + $0x38] sm:$0xff]  }
 0xd8e   : > { %v5898_v2 = vadd.f32 %v5882_v25, %v5842_v36  ;;  %v7221_v57 = vadd.f32 %v7220_v32, %v7219_v0  ;;  %v5893_v25 = vadd.f32 %v5877_v51, %v5821_v12  ;;  %v5945_v18 = vmax.f32 %v5929_v56, 0.0  ;;  %v5904_v12 = vld [vmem:[%s10263_s5 + $0x20] sm:$0xff] }
 0xd8f   : > { %v5810_v36 = vadd.f32 %v7258_v49, %v7194_v41  ;;  %v5926_v20 = vadd.f32 %v5910_v6, %v5894_v42  ;;  %v5874_v32 = vmul.f32 %v9866_v33, %v5854_v37  ;;  %v7770_v41 = vld [vmem:[%s10260_s2 + $0x8] sm:$0xff]   ;;  %v7777_v51 = vld [vmem:[%s10260_s2 + $0x20] sm:$0xff]  }
 0xd90   : > { %v5845_v26 = vadd.f32 %v7285_v62, %v7221_v57  ;;  %v5930_v21 = vadd.f32 %v5914_v43, %v5898_v2  ;;  %v5908_v62 = vld [vmem:[%s10263_s5 + $0x40] sm:$0xff]  ;;  %v5970_v11 = vpack.c.bf16 %v5945_v18, %v5944_v5  ;;  %v5925_v9 = vadd.f32 %v5909_v52, %v5893_v25  ;;  %v5907_v2 = vld [vmem:[%s10263_s5 + $0x38] sm:$0xff] }
 0xd91   : > { %v5873_v57 = vmul.f32 %v9866_v33, %v5853_v63  ;;  %v5890_v35 = vadd.f32 %v5874_v32, %v5810_v36  ;;  %v5942_v19 = vmax.f32 %v5926_v20, 0.0  ;;  %v5872_v43 = vmul.f32 %v9866_v33, %v5852_v29  ;;  %v6497_v29 = vld [vmem:[%s8008_s4 + $0x10] sm:$0xff] }
 0xd92   : > { %v5899_v27 = vadd.f32 %v5883_v48, %v5845_v26  ;;  %v5946_v0 = vmax.f32 %v5930_v21, 0.0  ;;  %v5924_v48 = vadd.f32 %v5908_v62, %v5892_v15  ;;  %v5941_v22 = vmax.f32 %v5925_v9, 0.0  ;;  %v6495_v9 = vld [vmem:[%s8008_s4] sm:$0xff] }
 0xd93   : > { %v5889_v34 = vadd.f32 %v5873_v57, %v5805_v44  ;;  %v5969_v17 = vpack.c.bf16 %v5943_v53, %v5942_v19  ;;  %v5923_v3 = vadd.f32 %v5907_v2, %v5891_v16  ;;  %v5888_v26 = vadd.f32 %v5872_v43, %v9915_v4  ;;  %v6498_v43 = vld [vmem:[%s8008_s4 + $0x18] sm:$0xff] }
 0xd94   : > { %v5931_v1 = vadd.f32 %v5915_v47, %v5899_v27  ;;  %v5940_v23 = vmax.f32 %v5924_v48, 0.0  ;;  %v5922_v13 = vadd.f32 %v5906_v61, %v5890_v35 }
 0xd95   : > { %v5939_v47 = vmax.f32 %v5923_v3, 0.0  ;;  %v5921_v31 = vadd.f32 %v5905_v30, %v5889_v34  ;;  %v5920_v54 = vadd.f32 %v5904_v12, %v5888_v26  ;;  %v6496_v3 = vld [vmem:[%s8008_s4 + $0x8] sm:$0xff] }
 0xd96   : > { %v5947_v55 = vmax.f32 %v5931_v1, 0.0  ;;  %v5968_v38 = vpack.c.bf16 %v5941_v22, %v5940_v23  ;;  %v5938_v33 = vmax.f32 %v5922_v13, 0.0 }
 0xd97   : > { %v5937_v21 = vmax.f32 %v5921_v31, 0.0  ;;  %v5936_v4 = vmax.f32 %v5920_v54, 0.0 }
 0xd98   : > { %v5971_v24 = vpack.c.bf16 %v5947_v55, %v5946_v0  ;;  %v5967_v27 = vpack.c.bf16 %v5939_v47, %v5938_v33 }
 0xd99   : > { %v5966_v56 = vpack.c.bf16 %v5937_v21, %v5936_v4 }
 0xd9a   : > { %7398 = vmatprep.subr.bf16.mxu1 %v5971_v24 }
 0xd9b   : > { %7399 = vmatpush3.bf16.msra.mxu1 %v5971_v24 }
 0xd9c   : > { %7400 = vmatprep.subr.bf16.mxu1 %v5970_v11 }
 0xd9f   : > { %7401 = vmatpush3.bf16.msra.mxu1 %v5970_v11 }
 0xda0   : > { %7402 = vmatprep.subr.bf16.mxu1 %v5969_v17 }
 0xda3   : > { %7403 = vmatpush3.bf16.msra.mxu1 %v5969_v17 }
 0xda4   : > { %7404 = vmatprep.subr.bf16.mxu1 %v5968_v38 }
 0xda7   : > { %7405 = vmatpush3.bf16.msra.mxu1 %v5968_v38  ;;  %v6501_v38 = vld [vmem:[%s8008_s4 + $0x30] sm:$0xff] }
 0xda8   : > { %7406 = vmatprep.subr.bf16.mxu1 %v5967_v27 }
 0xdab   : > { %7407 = vmatpush3.bf16.msra.mxu1 %v5967_v27  ;;  %v6499_v27 = vld [vmem:[%s8008_s4 + $0x20] sm:$0xff] }
 0xdac   : > { %7408 = vmatprep.subr.bf16.mxu1 %v5966_v56 }
 0xdaf   : > { %7409 = vmatpush3.bf16.msra.mxu1 %v5966_v56 }
 0xdb0   : > { %7410 = vmatprep.subr.bf16.mxu1 %v9923_v10 }
 0xdb3   : > { %7411 = vmatpush3.bf16.msra.mxu1 %v9923_v10 }
 0xdb4   : > { %7412 = vmatprep.subr.bf16.mxu1 %v9904_v45 }
 0xdb7   : > { %7413 = vmatpush3.bf16.msra.mxu1 %v9904_v45 }
 0xdba   : > { %7415 = vmatmul.mubr.bf16.vlgmr.msra.gmra.mxu1 %v7770_v41 }
 0xdbb   : > { %7418 = vmatprep.mubr.bf16.mxu1 %v7773_v39 }
 0xdc2   : > { %7419 = vmatmul.mubr.bf16.gmra.mxu1 %v7774_v14  ;;  %v6502_v14 = vld [vmem:[%s8008_s4 + $0x38] sm:$0xff] }
 0xdc3   : > { %7422 = vmatprep.mubr.bf16.mxu1 %v7777_v51 }
 0xdca   : > { %7423 = vmatmul.mubr.bf16.gmra.mxu1 %v7778_v40 }
 0xdcb   : > { %7426 = vmatprep.mubr.bf16.mxu1 %v7781_v60 }
 0xdd2   : > { %7427 = vmatmul.mubr.bf16.gmra.mxu1 %v7782_v28 }
 0xe03   : > { %v7384_v42 = vpop.f32.mrf.mxu0 }
 0xe05   : > { %v6090_v10 = vpop.f32.mrf.mxu0 }
 0xe07   : > { %v7385_v1 = vpop.f32.mrf.mxu0 }
 0xe09   : > { %v6093_v50 = vpop.f32.mrf.mxu0 }
 0xe0b   : > { %v7388_v8 = vpop.f32.mrf.mxu0 }
 0xe0d   : > { %v6106_v49 = vpop.f32.mrf.mxu0 }
 0xe0f   : > { %v7389_v45 = vpop.f32.mrf.mxu0 }
 0xe11   : > { %v6109_v7 = vpop.f32.mrf.mxu0 }
 0xe13   : > { %v10010_v25 = vpop.f32.mrf.mxu0 }
 0xe15   : > { %v10012_v6 = vpop.f32.mrf.mxu0 }
 0xe17   : > { %v10014_v37 = vpop.f32.mrf.mxu0 }
 0xe19   : > { %v10016_v0 = vpop.f32.mrf.mxu0 }
 0xe1c   : > { %v10018_v55 = vpop.f32.mrf.mxu0 }
 0xe1e   : > { %v10020_v18 = vpop.f32.mrf.mxu0 }
 0xe20   : > { %v10022_v46 = vpop.f32.mrf.mxu0 }
 0xe22   : > { %v10024_v58 = vpop.f32.mrf.mxu0 }
 0xe26   : > { %v7440_v36 = vpop.f32.mrf.mxu0 }
 0xe28   : > { %v6416_v59 = vpop.f32.mrf.mxu0 }
 0xe2a   : > { %v7441_v52 = vpop.f32.mrf.mxu0 }
 0xe2c   : > { %v6419_v15 = vpop.f32.mrf.mxu0 }
 0xe2e   : > { %v7444_v24 = vpop.f32.mrf.mxu0 }
 0xe30   : > { %v6432_v5 = vpop.f32.mrf.mxu0 }
 0xe32   : > { %v7445_v20 = vpop.f32.mrf.mxu0 }
 0xe34   : > { %v6435_v63 = vpop.f32.mrf.mxu0 }
 0xe36   : > { %v7448_v2 = vpop.f32.mrf.mxu0 }
 0xe38   : > { %v6448_v30 = vpop.f32.mrf.mxu0 }
 0xe3a   : > { %v7449_v21 = vpop.f32.mrf.mxu0 }
 0xe7a   : > { %v7416_v44 = vpop.f32.mrf.mxu1 }
 0xe7b   : > { %v6244_v32 = vadd.f32 %v7416_v44, %v7384_v42  ;;  %v6500_v42 = vld [vmem:[%s8008_s4 + $0x28] sm:$0xff] }
 0xe7c   : > { %v6235_v62 = vpop.f32.mrf.mxu1 }
 0xe7d   : > { %v6236_v16 = vadd.f32 %v6235_v62, %v6090_v10  ;;  %v6481_v11 = vadd.f32 %v7440_v36, %v6244_v32  ;;  %v6451_v10 = vpop.f32.mrf.mxu0 }
 0xe7e   : > { %v7417_v53 = vpop.f32.mrf.mxu1 }
 0xe7f   : > { %v6513_v57 = vadd.f32 %v6497_v29, %v6481_v11  ;;  %v6247_v35 = vadd.f32 %v7417_v53, %v7385_v1  ;;  %v6479_v19 = vadd.f32 %v6416_v59, %v6236_v16  ;;  %v6504_v16 = vld [vmem:[%s8008_s4 + $0x48] sm:$0xff] }
 0xe80   : > { %v6238_v48 = vpop.f32.mrf.mxu1 }
 0xe81   : > { %6529 = vst.msk [vmem:[%s10030_s1 + $0x10] sm:$0xff] %vm3232_vm1, %v6513_v57  ;;  %v6511_v61 = vadd.f32 %v6495_v9, %v6479_v19  ;;  %v6239_v34 = vadd.f32 %v6238_v48, %v6093_v50  ;;  %v6482_v17 = vadd.f32 %v7441_v52, %v6247_v35  ;;  %v6509_v57 = vld [vmem:[%s8008_s4 + $0x70] sm:$0xff] }
 0xe82   : > { %v7420_v22 = vpop.f32.mrf.mxu1 }
 0xe83   : > { %6527 = vst.msk [vmem:[%s10030_s1] sm:$0xff] %vm3232_vm1, %v6511_v61  ;;  %v6514_v26 = vadd.f32 %v6498_v43, %v6482_v17  ;;  %v6260_v23 = vadd.f32 %v7420_v22, %v7388_v8  ;;  %v6480_v13 = vadd.f32 %v6419_v15, %v6239_v34  ;;  %v6503_v15 = vld [vmem:[%s8008_s4 + $0x40] sm:$0xff] }
 0xe84   : > { %v6251_v12 = vpop.f32.mrf.mxu1  ;;  %v6507_v43 = vld [vmem:[%s8008_s4 + $0x60] sm:$0xff] }
 0xe85   : > { %6530 = vst.msk [vmem:[%s10030_s1 + $0x18] sm:$0xff] %vm3232_vm1, %v6514_v26  ;;  %v6512_v47 = vadd.f32 %v6496_v3, %v6480_v13  ;;  %v6252_v31 = vadd.f32 %v6251_v12, %v6106_v49  ;;  %v6485_v33 = vadd.f32 %v7444_v24, %v6260_v23  ;;  %v7452_v24 = vpop.f32.mrf.mxu0  ;;  %v6510_v3 = vld [vmem:[%s8008_s4 + $0x78] sm:$0xff]  ;;  %v6508_v13 = vld [vmem:[%s8008_s4 + $0x68] sm:$0xff] }
 0xe86   : > { %v7421_v54 = vpop.f32.mrf.mxu1 }
 0xe87   : > { %6528 = vst.msk [vmem:[%s10030_s1 + $0x8] sm:$0xff] %vm3232_vm1, %v6512_v47  ;;  %v6517_v4 = vadd.f32 %v6501_v38, %v6485_v33  ;;  %v6263_v56 = vadd.f32 %v7421_v54, %v7389_v45  ;;  %v6483_v41 = vadd.f32 %v6432_v5, %v6252_v31  ;;  %v6505_v45 = vld [vmem:[%s8008_s4 + $0x50] sm:$0xff]  ;;  %v6464_v11 = vpop.f32.mrf.mxu0 }
 0xe88   : > { %v6254_v39 = vpop.f32.mrf.mxu1 }
 0xe89   : > { %6533 = vst.msk [vmem:[%s10030_s1 + $0x30] sm:$0xff] %vm3232_vm1, %v6517_v4  ;;  %v6515_v51 = vadd.f32 %v6499_v27, %v6483_v41  ;;  %v6255_v40 = vadd.f32 %v6254_v39, %v6109_v7  ;;  %v6486_v60 = vadd.f32 %v7445_v20, %v6263_v56  ;;  %v7453_v61 = vpop.f32.mrf.mxu0 }
 0xe8a   : > { %v7424_v28 = vpop.f32.mrf.mxu1 }
 0xe8b   : > { %6531 = vst.msk [vmem:[%s10030_s1 + $0x20] sm:$0xff] %vm3232_vm1, %v6515_v51  ;;  %v6518_v1 = vadd.f32 %v6502_v14, %v6486_v60  ;;  %v6276_v50 = vadd.f32 %v7424_v28, %v10010_v25  ;;  %v6484_v8 = vadd.f32 %v6435_v63, %v6255_v40  ;;  %v6506_v63 = vld [vmem:[%s8008_s4 + $0x58] sm:$0xff]  ;;  %v6467_v23 = vpop.f32.mrf.mxu0 }
 0xe8c   : > { %v6267_v49 = vpop.f32.mrf.mxu1 }
 0xe8d   : > { %6534 = vst.msk [vmem:[%s10030_s1 + $0x38] sm:$0xff] %vm3232_vm1, %v6518_v1  ;;  %v6516_v36 = vadd.f32 %v6500_v42, %v6484_v8  ;;  %v6268_v7 = vadd.f32 %v6267_v49, %v10012_v6  ;;  %v6489_v59 = vadd.f32 %v7448_v2, %v6276_v50 }
 0xe8e   : > { %v7425_v52 = vpop.f32.mrf.mxu1 }
 0xe8f   : > { %6532 = vst.msk [vmem:[%s10030_s1 + $0x28] sm:$0xff] %vm3232_vm1, %v6516_v36  ;;  %v6521_v5 = vadd.f32 %v6505_v45, %v6489_v59  ;;  %v6279_v25 = vadd.f32 %v7425_v52, %v10014_v37  ;;  %v6487_v20 = vadd.f32 %v6448_v30, %v6268_v7 }
 0xe90   : > { %v6270_v44 = vpop.f32.mrf.mxu1 }
 0xe91   : > { %6537 = vst.msk [vmem:[%s10030_s1 + $0x50] sm:$0xff] %vm3232_vm1, %v6521_v5  ;;  %v6519_v32 = vadd.f32 %v6503_v15, %v6487_v20  ;;  %v6271_v6 = vadd.f32 %v6270_v44, %v10016_v0  ;;  %v6490_v62 = vadd.f32 %v7449_v21, %v6279_v25 }
 0xe92   : > { %v7428_v29 = vpop.f32.mrf.mxu1 }
 0xe93   : > { %6535 = vst.msk [vmem:[%s10030_s1 + $0x40] sm:$0xff] %vm3232_vm1, %v6519_v32  ;;  %v6522_v53 = vadd.f32 %v6506_v63, %v6490_v62  ;;  %v6292_v37 = vadd.f32 %v7428_v29, %v10018_v55  ;;  %v6488_v9 = vadd.f32 %v6451_v10, %v6271_v6 }
 0xe94   : > { %v6283_v2 = vpop.f32.mrf.mxu1 }
 0xe95   : > { %6538 = vst.msk [vmem:[%s10030_s1 + $0x58] sm:$0xff] %vm3232_vm1, %v6522_v53  ;;  %v6520_v35 = vadd.f32 %v6504_v16, %v6488_v9  ;;  %v6284_v0 = vadd.f32 %v6283_v2, %v10020_v18  ;;  %v6493_v19 = vadd.f32 %v7452_v24, %v6292_v37 }
 0xe96   : > { %v7429_v48 = vpop.f32.mrf.mxu1 }
 0xe97   : > { %6536 = vst.msk [vmem:[%s10030_s1 + $0x48] sm:$0xff] %vm3232_vm1, %v6520_v35  ;;  %v6525_v55 = vadd.f32 %v6509_v57, %v6493_v19  ;;  %v6295_v34 = vadd.f32 %v7429_v48, %v10022_v46  ;;  %v6491_v17 = vadd.f32 %v6464_v11, %v6284_v0 }
 0xe98   : > { %v6286_v22 = vpop.f32.mrf.mxu1 }
 0xe99   : > { %6541 = vst.msk [vmem:[%s10030_s1 + $0x70] sm:$0xff] %vm3232_vm1, %v6525_v55  ;;  %v6523_v30 = vadd.f32 %v6507_v43, %v6491_v17  ;;  %v6287_v18 = vadd.f32 %v6286_v22, %v10024_v58  ;;  %v6494_v26 = vadd.f32 %v7453_v61, %v6295_v34 }
 0xe9b   : > { %6539 = vst.msk [vmem:[%s10030_s1 + $0x60] sm:$0xff] %vm3232_vm1, %v6523_v30  ;;  %v6526_v12 = vadd.f32 %v6510_v3, %v6494_v26  ;;  %v6492_v38 = vadd.f32 %v6467_v23, %v6287_v18 }
 0xe9d   : > { %6542 = vst.msk [vmem:[%s10030_s1 + $0x78] sm:$0xff] %vm3232_vm1, %v6526_v12  ;;  %v6524_v47 = vadd.f32 %v6508_v13, %v6492_v38 }
 0xe9f   : > { %6540 = vst.msk [vmem:[%s10030_s1 + $0x68] sm:$0xff] %vm3232_vm1, %v6524_v47 }
 0xea0 PF: > { %s82_s22 = sadd.s32 1, %s7791_s22  }
 0xea1   : > { %p79_p4 = scmp.ge.s32.totalorder %s82_s22, 4  }
 0xea3   :  { %81 = sbr.rel (!%p79_p4) target bundleno = 67 (0x43), region = 236 }

</bundles_post_ra>
